<compile_context>
chip_gen: v5e
topology: v5e:2x2
jax: 0.10.0
libtpu: 0.0.40
codegen_flags: <defaults>
</compile_context>

<pallas_src>
import jax
import jax.numpy as jnp
import numpy as np
from jax import lax
from jax.experimental import pallas as pl
from jax.experimental.pallas import tpu as pltpu


def _round_up(x, m):
    return (x + m - 1) // m * m


def _encoder_dir_kernel(emb_ref, m_ref, wih_ref, whh_ref, bih_ref, bhn_ref,
                        out_ref, hid_ref, xp_ref):
    """One GRU direction per grid step (d=0 forward, d=1 backward)."""
    T, Bp, _ = xp_ref.shape
    Hp = whh_ref.shape[0]
    d = pl.program_id(0)

    # Input projection for this direction, all timesteps at once: [T*Bp, E] @ [E, 3Hp].
    xp = jnp.dot(emb_ref[...], wih_ref[...], preferred_element_type=jnp.float32)
    xp_ref[...] = (xp + bih_ref[...]).reshape(T, Bp, 3 * Hp).astype(jnp.bfloat16)

    whh = whh_ref[...]          # [Hp, 3Hp] bf16, this direction's recurrent weights
    bhn = bhn_ref[...]          # [1, Hp]  f32, recurrent n-gate bias (kept inside r*(...))

    def step(i, h):             # h: [Bp, Hp] f32
        # Forward processes time i, backward processes time T-1-i.
        t = jnp.where(d == 0, i, T - 1 - i)
        gh = jnp.dot(h.astype(jnp.bfloat16), whh,
                     preferred_element_type=jnp.float32)               # [Bp, 3Hp] f32
        gf = xp_ref[t]                                                  # [Bp, 3Hp] bf16

        r = jax.nn.sigmoid(gf[:, 0 * Hp:1 * Hp] + gh[:, 0 * Hp:1 * Hp])
        z = jax.nn.sigmoid(gf[:, 1 * Hp:2 * Hp] + gh[:, 1 * Hp:2 * Hp])
        n = jnp.tanh(gf[:, 2 * Hp:3 * Hp] + r * (gh[:, 2 * Hp:3 * Hp] + bhn))
        h_new = (1.0 - z) * n + z * h                                   # [Bp, Hp] f32

        m = m_ref[t]                                                    # [Bp, 1]  f32
        mh = m * h_new                                                  # zeros where padded
        out_ref[t] = mh                      # pad_packed_sequence: padded positions are zero
        return mh + (1.0 - m) * h            # hold state past sequence end

    h = lax.fori_loop(0, T, step, jnp.zeros((Bp, Hp), jnp.float32),
                      unroll=min(8, T))
    hid_ref[...] = h


def _pack_dir(wih, whh, bih, bhh, H, Hp):
    """PyTorch GRU weights [3H, in] (gate order r,z,n) -> transposed, H->Hp lane-padded blocks.

    Recurrent r/z biases are folded into the input bias (legal: only b_hn must stay inside the
    r*(...) term).  Returns (wih_p [E,3Hp], whh_p [Hp,3Hp], bih_p [1,3Hp], bhn_p [1,Hp])."""
    E = wih.shape[1]
    wih_t, whh_t = wih.T, whh.T                          # [E, 3H], [H, 3H]
    wih_p = jnp.zeros((E, 3 * Hp), jnp.float32)
    whh_p = jnp.zeros((Hp, 3 * Hp), jnp.float32)
    bih_p = jnp.zeros((1, 3 * Hp), jnp.float32)
    bhn_p = jnp.zeros((1, Hp), jnp.float32)
    for g in range(3):
        src = slice(g * H, (g + 1) * H)
        dst = slice(g * Hp, g * Hp + H)
        wih_p = wih_p.at[:, dst].set(wih_t[:, src])
        whh_p = whh_p.at[:H, dst].set(whh_t[:, src])
        if g < 2:   # r, z gates: fold recurrent bias into the input-side bias
            bih_p = bih_p.at[:, dst].set(bih[:, src] + bhh[:, src])
        else:       # n gate: b_hn stays separate
            bih_p = bih_p.at[:, dst].set(bih[:, src])
            bhn_p = bhn_p.at[:, :H].set(bhh[:, src])
    return wih_p, whh_p, bih_p, bhn_p


def encoder_forward(src, src_len, params):
    """src: [T, B] int32 tokens, src_len: [B] int32. Returns (outputs [T,B,2H], hidden [B,D])."""
    T, B = src.shape
    E = params["embedding"].shape[1]
    H = params["whh_f"].shape[1]
    Bp = _round_up(B, 16)       # sublane alignment (16 keeps bf16 packing clean too)
    Hp = _round_up(H, 128)      # lane alignment

    # --- wrapper glue: embedding gather, batch/lane padding, per-direction weight packing ---
    emb = jnp.take(params["embedding"], src, axis=0).astype(jnp.float32)        # [T, B, E]
    emb_p = jnp.zeros((T, Bp, E), jnp.float32).at[:, :B, :].set(emb)
    emb2 = emb_p.reshape(T * Bp, E).astype(jnp.bfloat16)                         # [T*Bp, E]

    fwd = _pack_dir(params["wih_f"], params["whh_f"], params["bih_f"], params["bhh_f"], H, Hp)
    bwd = _pack_dir(params["wih_b"], params["whh_b"], params["bih_b"], params["bhh_b"], H, Hp)
    wih = jnp.stack([fwd[0], bwd[0]], 0).astype(jnp.bfloat16)                    # [2, E, 3Hp]
    whh = jnp.stack([fwd[1], bwd[1]], 0).astype(jnp.bfloat16)                    # [2, Hp, 3Hp]
    bih = jnp.stack([fwd[2], bwd[2]], 0)                                         # [2, 1, 3Hp]
    bhn = jnp.stack([fwd[3], bwd[3]], 0)                                         # [2, 1, Hp]

    lens = jnp.zeros((Bp,), jnp.int32).at[:B].set(src_len.astype(jnp.int32))
    m = (lens[None, :] > jnp.arange(T)[:, None]).astype(jnp.float32)[:, :, None]  # [T, Bp, 1]

    # VMEM budget: per-core resident blocks (x2 for BlockSpec buffering) + xp scratch.
    block_bytes = (T * Bp * E * 2          # emb (bf16)
                   + T * Bp * 1 * 4        # mask (f32)
                   + E * 3 * Hp * 2        # wih block (bf16)
                   + Hp * 3 * Hp * 2       # whh block (bf16)
                   + 3 * Hp * 4 + Hp * 4   # biases (f32)
                   + T * Bp * Hp * 4       # out block (f32)
                   + Bp * Hp * 4)          # hid block (f32)
    scratch_bytes = T * Bp * 3 * Hp * 2    # xp (bf16)
    vmem_limit = int(min(100 << 20,
                         max(2 * block_bytes + scratch_bytes + (4 << 20), 32 << 20)))

    out_p, hid_p = pl.pallas_call(
        _encoder_dir_kernel,
        grid=(2,),   # direction axis: forward / backward, parallel across TensorCores on v7x
        out_shape=(jax.ShapeDtypeStruct((2, T, Bp, Hp), jnp.float32),
                   jax.ShapeDtypeStruct((2, Bp, Hp), jnp.float32)),
        in_specs=[
            pl.BlockSpec((T * Bp, E), lambda d: (0, 0)),           # shared embedding
            pl.BlockSpec((T, Bp, 1), lambda d: (0, 0, 0)),         # shared (lens > t) mask
            pl.BlockSpec((None, E, 3 * Hp), lambda d: (d, 0, 0)),  # per-direction weights
            pl.BlockSpec((None, Hp, 3 * Hp), lambda d: (d, 0, 0)),
            pl.BlockSpec((None, 1, 3 * Hp), lambda d: (d, 0, 0)),
            pl.BlockSpec((None, 1, Hp), lambda d: (d, 0, 0)),
        ],
        out_specs=(
            pl.BlockSpec((None, T, Bp, Hp), lambda d: (d, 0, 0, 0)),
            pl.BlockSpec((None, Bp, Hp), lambda d: (d, 0, 0)),
        ),
        scratch_shapes=[pltpu.VMEM((T, Bp, 3 * Hp), jnp.bfloat16)],   # xp: input projections
        compiler_params=pltpu.CompilerParams(
            dimension_semantics=("parallel",),
            vmem_limit_bytes=vmem_limit),
    )(emb2, m, wih, whh, bih, bhn)

    # Slice padding off and assemble bidirectional features (no-op copies at aligned sizes).
    # Outputs could be emitted in bf16 if the decoder consumes bf16 (halves vst/HBM traffic).
    outputs = jnp.concatenate([out_p[0, :, :B, :H], out_p[1, :, :B, :H]], axis=-1)  # [T, B, 2H]

    # fc + tanh on the two direction-final states: one-off tiny GEMM, done in f32 in the wrapper
    # (the two directions finish on different cores under the parallel grid).
    h_cat = jnp.concatenate([hid_p[0, :B, :H], hid_p[1, :B, :H]], axis=-1)           # [B, 2H]
    hidden = jnp.tanh(h_cat @ params["wfc"].T + params["bfc"])                       # [B, D]
    return outputs, hidden


def encoder_reference(src, src_len, p):
    """Pure-JAX f32 reference with identical semantics (for correctness check)."""
    emb = jnp.take(p["embedding"], src, axis=0).astype(jnp.float32)
    T, B, _ = emb.shape
    H = p["whh_f"].shape[1]
    lens = src_len.astype(jnp.int32).reshape(B, 1)

    def run_dir(wih, whh, bih, bhh, reverse):
        h = jnp.zeros((B, H), jnp.float32)
        outs = [None] * T
        order = range(T - 1, -1, -1) if reverse else range(T)
        for t in order:
            gi = emb[t] @ wih.T + bih
            gh = h @ whh.T + bhh
            r = jax.nn.sigmoid(gi[:, :H] + gh[:, :H])
            z = jax.nn.sigmoid(gi[:, H:2 * H] + gh[:, H:2 * H])
            n = jnp.tanh(gi[:, 2 * H:] + r * gh[:, 2 * H:])
            h_new = (1.0 - z) * n + z * h
            m = (lens > t).astype(jnp.float32)
            outs[t] = m * h_new
            h = m * h_new + (1.0 - m) * h
        return jnp.stack(outs, 0), h

    of, hf = run_dir(p["wih_f"], p["whh_f"], p["bih_f"], p["bhh_f"], False)
    ob, hb = run_dir(p["wih_b"], p["whh_b"], p["bih_b"], p["bhh_b"], True)
    outputs = jnp.concatenate([of, ob], -1)
    hidden = jnp.tanh(jnp.concatenate([hf, hb], 1) @ p["wfc"].T + p["bfc"])
    return outputs, hidden


def init_params(key, input_dim, emb_dim, enc_hid, dec_hid):
    ks = jax.random.split(key, 11)
    s = 1.0 / np.sqrt(enc_hid)
    sf = 1.0 / np.sqrt(2 * enc_hid)
    u = lambda k, shape, sc: jax.random.uniform(k, shape, jnp.float32, -sc, sc)
    return dict(
        embedding=u(ks[0], (input_dim, emb_dim), 1.0),
        # PyTorch GRU weight layout: [3H, in], gate order (r, z, n); biases kept as [1, 3H].
        wih_f=u(ks[1], (3 * enc_hid, emb_dim), s),
        whh_f=u(ks[2], (3 * enc_hid, enc_hid), s),
        bih_f=u(ks[3], (1, 3 * enc_hid), s),
        bhh_f=u(ks[4], (1, 3 * enc_hid), s),
        wih_b=u(ks[5], (3 * enc_hid, emb_dim), s),
        whh_b=u(ks[6], (3 * enc_hid, enc_hid), s),
        bih_b=u(ks[7], (1, 3 * enc_hid), s),
        bhh_b=u(ks[8], (1, 3 * enc_hid), s),
        wfc=u(ks[9], (dec_hid, 2 * enc_hid), sf),
        bfc=u(ks[10], (1, dec_hid), sf),
    )


if __name__ == "__main__":
    INPUT_DIM, EMB_DIM, ENC_HID, DEC_HID = 20, 32, 32, 32
    T, B = 8, 2

    key = jax.random.PRNGKey(0)
    kp, ks = jax.random.split(key)
    params = init_params(kp, INPUT_DIM, EMB_DIM, ENC_HID, DEC_HID)

    src = jax.random.randint(ks, (T, B), 0, INPUT_DIM, dtype=jnp.int32)   # [T, B]
    src_len = jnp.array([8, 5], dtype=jnp.int32)                          # sorted desc, max == T

    outputs, hidden = encoder_forward(src, src_len, params)
    jax.block_until_ready((outputs, hidden))

    out_r, hid_r = encoder_reference(src, src_len, params)
    assert outputs.shape == (T, B, 2 * ENC_HID) and hidden.shape == (B, DEC_HID)
    assert np.allclose(np.asarray(outputs), np.asarray(out_r), atol=5e-2, rtol=5e-2)
    assert np.allclose(np.asarray(hidden), np.asarray(hid_r), atol=5e-2, rtol=5e-2)
    print("KERNEL_OK")
</pallas_src>

<mosaic_0001>
module attributes {stable_mosaic.version = 11 : i64} {
  func.func @_encoder_dir_kernel(%arg0: i32, %arg1: memref<128x32xbf16, #tpu.memory_space<vmem>>, %arg2: memref<8x16x1xf32, #tpu.memory_space<vmem>>, %arg3: memref<1x32x384xbf16, #tpu.memory_space<vmem>>, %arg4: memref<1x128x384xbf16, #tpu.memory_space<vmem>>, %arg5: memref<1x1x384xf32, #tpu.memory_space<vmem>>, %arg6: memref<1x1x128xf32, #tpu.memory_space<vmem>>, %arg7: memref<1x8x16x128xf32, #tpu.memory_space<vmem>>, %arg8: memref<1x16x128xf32, #tpu.memory_space<vmem>>, %arg9: memref<8x16x384xbf16, #tpu.memory_space<vmem>>) attributes {dimension_semantics = [#tpu.dimension_semantics<parallel>], iteration_bounds = array<i64: 2>, scalar_prefetch = 0 : i64, scratch_operands = 1 : i64, tpu.core_type = #tpu.core_type<tc>, window_params = [{pipeline_mode = #tpu.pipeline_mode<synchronous>, transform_indices = @transform_0, window_bounds = array<i64: 128, 32>}, {pipeline_mode = #tpu.pipeline_mode<synchronous>, transform_indices = @transform_1, window_bounds = array<i64: 8, 16, 1>}, {transform_indices = @transform_2, window_bounds = array<i64: 1, 32, 384>}, {transform_indices = @transform_3, window_bounds = array<i64: 1, 128, 384>}, {transform_indices = @transform_4, window_bounds = array<i64: 1, 1, 384>}, {transform_indices = @transform_5, window_bounds = array<i64: 1, 1, 128>}, {transform_indices = @transform_6, window_bounds = array<i64: 1, 8, 16, 128>}, {transform_indices = @transform_7, window_bounds = array<i64: 1, 16, 128>}]} {
    %c0 = arith.constant 0 : index
    %c0_0 = arith.constant 0 : index
    %0 = vector.load %arg1[%c0, %c0_0] : memref<128x32xbf16, #tpu.memory_space<vmem>>, vector<128x32xbf16>
    %c0_1 = arith.constant 0 : index
    %c0_2 = arith.constant 0 : index
    %c0_3 = arith.constant 0 : index
    %1 = vector.load %arg3[%c0_1, %c0_2, %c0_3] : memref<1x32x384xbf16, #tpu.memory_space<vmem>>, vector<1x32x384xbf16>
    %2 = vector.shape_cast %1 : vector<1x32x384xbf16> to vector<32x384xbf16>
    %cst = arith.constant dense<0.000000e+00> : vector<128x384xf32>
    %3 = tpu.matmul %0, %2, %cst {dimension_numbers = #tpu.dot_dimension_numbers<[1], [0], [0], [1], [0, 0, 1, 1], [], []>} : vector<128x32xbf16>, vector<32x384xbf16>, vector<128x384xf32> -> vector<128x384xf32>
    %c0_4 = arith.constant 0 : index
    %c0_5 = arith.constant 0 : index
    %c0_6 = arith.constant 0 : index
    %4 = vector.load %arg5[%c0_4, %c0_5, %c0_6] : memref<1x1x384xf32, #tpu.memory_space<vmem>>, vector<1x1x384xf32>
    %5 = vector.shape_cast %4 : vector<1x1x384xf32> to vector<1x384xf32>
    %6 = vector.broadcast %5 : vector<1x384xf32> to vector<128x384xf32>
    %7 = arith.addf %3, %6 : vector<128x384xf32>
    %8 = vector.shape_cast %7 : vector<128x384xf32> to vector<8x16x384xf32>
    %9 = arith.truncf %8 : vector<8x16x384xf32> to vector<8x16x384xbf16>
    %c0_7 = arith.constant 0 : index
    %c0_8 = arith.constant 0 : index
    %c0_9 = arith.constant 0 : index
    %10 = vector.load %arg9[%c0_7, %c0_8, %c0_9] : memref<8x16x384xbf16, #tpu.memory_space<vmem>>, vector<8x16x384xbf16>
    tpu.vector_store %arg9[%c0_7, %c0_8, %c0_9], %9 {strides = array<i32>} : memref<8x16x384xbf16, #tpu.memory_space<vmem>>, vector<8x16x384xbf16>,
    %c0_10 = arith.constant 0 : index
    %c0_11 = arith.constant 0 : index
    %c0_12 = arith.constant 0 : index
    %11 = vector.load %arg4[%c0_10, %c0_11, %c0_12] : memref<1x128x384xbf16, #tpu.memory_space<vmem>>, vector<1x128x384xbf16>
    %12 = vector.shape_cast %11 : vector<1x128x384xbf16> to vector<128x384xbf16>
    %c0_13 = arith.constant 0 : index
    %c0_14 = arith.constant 0 : index
    %c0_15 = arith.constant 0 : index
    %13 = vector.load %arg6[%c0_13, %c0_14, %c0_15] : memref<1x1x128xf32, #tpu.memory_space<vmem>>, vector<1x1x128xf32>
    %14 = vector.shape_cast %13 : vector<1x1x128xf32> to vector<1x128xf32>
    %cst_16 = arith.constant 0.000000e+00 : f32
    %15 = vector.broadcast %cst_16 : f32 to vector<16x128xf32>
    %c0_i32 = arith.constant 0 : i32
    %c0_i32_17 = arith.constant 0 : i32
    %16 = arith.cmpi eq, %arg0, %c0_i32_17 : i32
    %c7_i32 = arith.constant 7 : i32
    %17 = arith.subi %c7_i32, %c0_i32 : i32
    %18 = arith.select %16, %c0_i32, %17 : i32
    %19 = arith.truncf %15 : vector<16x128xf32> to vector<16x128xbf16>
    %cst_18 = arith.constant dense<0.000000e+00> : vector<16x384xf32>
    %20 = tpu.matmul %19, %12, %cst_18 {dimension_numbers = #tpu.dot_dimension_numbers<[1], [0], [0], [1], [0, 0, 1, 1], [], []>} : vector<16x128xbf16>, vector<128x384xbf16>, vector<16x384xf32> -> vector<16x384xf32>
    %21 = arith.index_cast %18 : i32 to index
    %c0_19 = arith.constant 0 : index
    %c0_20 = arith.constant 0 : index
    %22 = vector.load %arg9[%21, %c0_19, %c0_20] : memref<8x16x384xbf16, #tpu.memory_space<vmem>>, vector<1x16x384xbf16>
    %23 = vector.shape_cast %22 : vector<1x16x384xbf16> to vector<16x384xbf16>
    %24 = vector.extract_strided_slice %23 {offsets = [0, 0], sizes = [16, 128], strides = [1, 1]} : vector<16x384xbf16> to vector<16x128xbf16>
    %25 = vector.extract_strided_slice %20 {offsets = [0, 0], sizes = [16, 128], strides = [1, 1]} : vector<16x384xf32> to vector<16x128xf32>
    %26 = arith.extf %24 : vector<16x128xbf16> to vector<16x128xf32>
    %27 = arith.addf %26, %25 : vector<16x128xf32>
    %28 = arith.negf %27 : vector<16x128xf32>
    %29 = math.exp %28 : vector<16x128xf32>
    %cst_21 = arith.constant 1.000000e+00 : f32
    %30 = vector.broadcast %cst_21 : f32 to vector<16x128xf32>
    %31 = arith.addf %30, %29 : vector<16x128xf32>
    %32 = arith.divf %30, %31 : vector<16x128xf32>
    %33 = vector.extract_strided_slice %23 {offsets = [0, 128], sizes = [16, 128], strides = [1, 1]} : vector<16x384xbf16> to vector<16x128xbf16>
    %34 = vector.extract_strided_slice %20 {offsets = [0, 128], sizes = [16, 128], strides = [1, 1]} : vector<16x384xf32> to vector<16x128xf32>
    %35 = arith.extf %33 : vector<16x128xbf16> to vector<16x128xf32>
    %36 = arith.addf %35, %34 : vector<16x128xf32>
    %37 = arith.negf %36 : vector<16x128xf32>
    %38 = math.exp %37 : vector<16x128xf32>
    %cst_22 = arith.constant 1.000000e+00 : f32
    %39 = vector.broadcast %cst_22 : f32 to vector<16x128xf32>
    %40 = arith.addf %39, %38 : vector<16x128xf32>
    %41 = arith.divf %39, %40 : vector<16x128xf32>
    %42 = vector.extract_strided_slice %23 {offsets = [0, 256], sizes = [16, 128], strides = [1, 1]} : vector<16x384xbf16> to vector<16x128xbf16>
    %43 = vector.extract_strided_slice %20 {offsets = [0, 256], sizes = [16, 128], strides = [1, 1]} : vector<16x384xf32> to vector<16x128xf32>
    %44 = vector.broadcast %14 : vector<1x128xf32> to vector<16x128xf32>
    %45 = arith.addf %43, %44 : vector<16x128xf32>
    %46 = arith.mulf %32, %45 : vector<16x128xf32>
    %47 = arith.extf %42 : vector<16x128xbf16> to vector<16x128xf32>
    %48 = arith.addf %47, %46 : vector<16x128xf32>
    %49 = math.tanh %48 : vector<16x128xf32>
    %cst_23 = arith.constant 1.000000e+00 : f32
    %50 = vector.broadcast %cst_23 : f32 to vector<16x128xf32>
    %51 = arith.subf %50, %41 : vector<16x128xf32>
    %52 = arith.mulf %51, %49 : vector<16x128xf32>
    %53 = arith.mulf %41, %15 : vector<16x128xf32>
    %54 = arith.addf %52, %53 : vector<16x128xf32>
    %55 = arith.index_cast %18 : i32 to index
    %c0_24 = arith.constant 0 : index
    %c0_25 = arith.constant 0 : index
    %56 = vector.load %arg2[%55, %c0_24, %c0_25] : memref<8x16x1xf32, #tpu.memory_space<vmem>>, vector<1x16x1xf32>
    %57 = vector.shape_cast %56 : vector<1x16x1xf32> to vector<16x1xf32>
    %58 = vector.broadcast %57 : vector<16x1xf32> to vector<16x128xf32>
    %59 = arith.mulf %58, %54 : vector<16x128xf32>
    %c0_26 = arith.constant 0 : index
    %60 = arith.index_cast %18 : i32 to index
    %c0_27 = arith.constant 0 : index
    %c0_28 = arith.constant 0 : index
    %61 = vector.load %arg7[%c0_26, %60, %c0_27, %c0_28] : memref<1x8x16x128xf32, #tpu.memory_space<vmem>>, vector<1x1x16x128xf32>
    %62 = vector.shape_cast %61 : vector<1x1x16x128xf32> to vector<16x128xf32>
    %63 = vector.shape_cast %59 : vector<16x128xf32> to vector<1x1x16x128xf32>
    tpu.vector_store %arg7[%c0_26, %60, %c0_27, %c0_28], %63 {strides = array<i32>} : memref<1x8x16x128xf32, #tpu.memory_space<vmem>>, vector<1x1x16x128xf32>,
    %cst_29 = arith.constant 1.000000e+00 : f32
    %64 = vector.broadcast %cst_29 : f32 to vector<16x1xf32>
    %65 = arith.subf %64, %57 : vector<16x1xf32>
    %66 = vector.broadcast %65 : vector<16x1xf32> to vector<16x128xf32>
    %67 = arith.mulf %66, %15 : vector<16x128xf32>
    %68 = arith.addf %59, %67 : vector<16x128xf32>
    %c1_i32 = arith.constant 1 : i32
    %c0_i32_30 = arith.constant 0 : i32
    %69 = arith.cmpi eq, %arg0, %c0_i32_30 : i32
    %c7_i32_31 = arith.constant 7 : i32
    %70 = arith.subi %c7_i32_31, %c1_i32 : i32
    %71 = arith.select %69, %c1_i32, %70 : i32
    %72 = arith.truncf %68 : vector<16x128xf32> to vector<16x128xbf16>
    %cst_32 = arith.constant dense<0.000000e+00> : vector<16x384xf32>
    %73 = tpu.matmul %72, %12, %cst_32 {dimension_numbers = #tpu.dot_dimension_numbers<[1], [0], [0], [1], [0, 0, 1, 1], [], []>} : vector<16x128xbf16>, vector<128x384xbf16>, vector<16x384xf32> -> vector<16x384xf32>
    %74 = arith.index_cast %71 : i32 to index
    %c0_33 = arith.constant 0 : index
    %c0_34 = arith.constant 0 : index
    %75 = vector.load %arg9[%74, %c0_33, %c0_34] : memref<8x16x384xbf16, #tpu.memory_space<vmem>>, vector<1x16x384xbf16>
    %76 = vector.shape_cast %75 : vector<1x16x384xbf16> to vector<16x384xbf16>
    %77 = vector.extract_strided_slice %76 {offsets = [0, 0], sizes = [16, 128], strides = [1, 1]} : vector<16x384xbf16> to vector<16x128xbf16>
    %78 = vector.extract_strided_slice %73 {offsets = [0, 0], sizes = [16, 128], strides = [1, 1]} : vector<16x384xf32> to vector<16x128xf32>
    %79 = arith.extf %77 : vector<16x128xbf16> to vector<16x128xf32>
    %80 = arith.addf %79, %78 : vector<16x128xf32>
    %81 = arith.negf %80 : vector<16x128xf32>
    %82 = math.exp %81 : vector<16x128xf32>
    %cst_35 = arith.constant 1.000000e+00 : f32
    %83 = vector.broadcast %cst_35 : f32 to vector<16x128xf32>
    %84 = arith.addf %83, %82 : vector<16x128xf32>
    %85 = arith.divf %83, %84 : vector<16x128xf32>
    %86 = vector.extract_strided_slice %76 {offsets = [0, 128], sizes = [16, 128], strides = [1, 1]} : vector<16x384xbf16> to vector<16x128xbf16>
    %87 = vector.extract_strided_slice %73 {offsets = [0, 128], sizes = [16, 128], strides = [1, 1]} : vector<16x384xf32> to vector<16x128xf32>
    %88 = arith.extf %86 : vector<16x128xbf16> to vector<16x128xf32>
    %89 = arith.addf %88, %87 : vector<16x128xf32>
    %90 = arith.negf %89 : vector<16x128xf32>
    %91 = math.exp %90 : vector<16x128xf32>
    %cst_36 = arith.constant 1.000000e+00 : f32
    %92 = vector.broadcast %cst_36 : f32 to vector<16x128xf32>
    %93 = arith.addf %92, %91 : vector<16x128xf32>
    %94 = arith.divf %92, %93 : vector<16x128xf32>
    %95 = vector.extract_strided_slice %76 {offsets = [0, 256], sizes = [16, 128], strides = [1, 1]} : vector<16x384xbf16> to vector<16x128xbf16>
    %96 = vector.extract_strided_slice %73 {offsets = [0, 256], sizes = [16, 128], strides = [1, 1]} : vector<16x384xf32> to vector<16x128xf32>
    %97 = vector.broadcast %14 : vector<1x128xf32> to vector<16x128xf32>
    %98 = arith.addf %96, %97 : vector<16x128xf32>
    %99 = arith.mulf %85, %98 : vector<16x128xf32>
    %100 = arith.extf %95 : vector<16x128xbf16> to vector<16x128xf32>
    %101 = arith.addf %100, %99 : vector<16x128xf32>
    %102 = math.tanh %101 : vector<16x128xf32>
    %cst_37 = arith.constant 1.000000e+00 : f32
    %103 = vector.broadcast %cst_37 : f32 to vector<16x128xf32>
    %104 = arith.subf %103, %94 : vector<16x128xf32>
    %105 = arith.mulf %104, %102 : vector<16x128xf32>
    %106 = arith.mulf %94, %68 : vector<16x128xf32>
    %107 = arith.addf %105, %106 : vector<16x128xf32>
    %108 = arith.index_cast %71 : i32 to index
    %c0_38 = arith.constant 0 : index
    %c0_39 = arith.constant 0 : index
    %109 = vector.load %arg2[%108, %c0_38, %c0_39] : memref<8x16x1xf32, #tpu.memory_space<vmem>>, vector<1x16x1xf32>
    %110 = vector.shape_cast %109 : vector<1x16x1xf32> to vector<16x1xf32>
    %111 = vector.broadcast %110 : vector<16x1xf32> to vector<16x128xf32>
    %112 = arith.mulf %111, %107 : vector<16x128xf32>
    %c0_40 = arith.constant 0 : index
    %113 = arith.index_cast %71 : i32 to index
    %c0_41 = arith.constant 0 : index
    %c0_42 = arith.constant 0 : index
    %114 = vector.load %arg7[%c0_40, %113, %c0_41, %c0_42] : memref<1x8x16x128xf32, #tpu.memory_space<vmem>>, vector<1x1x16x128xf32>
    %115 = vector.shape_cast %114 : vector<1x1x16x128xf32> to vector<16x128xf32>
    %116 = vector.shape_cast %112 : vector<16x128xf32> to vector<1x1x16x128xf32>
    tpu.vector_store %arg7[%c0_40, %113, %c0_41, %c0_42], %116 {strides = array<i32>} : memref<1x8x16x128xf32, #tpu.memory_space<vmem>>, vector<1x1x16x128xf32>,
    %cst_43 = arith.constant 1.000000e+00 : f32
    %117 = vector.broadcast %cst_43 : f32 to vector<16x1xf32>
    %118 = arith.subf %117, %110 : vector<16x1xf32>
    %119 = vector.broadcast %118 : vector<16x1xf32> to vector<16x128xf32>
    %120 = arith.mulf %119, %68 : vector<16x128xf32>
    %121 = arith.addf %112, %120 : vector<16x128xf32>
    %c2_i32 = arith.constant 2 : i32
    %c0_i32_44 = arith.constant 0 : i32
    %122 = arith.cmpi eq, %arg0, %c0_i32_44 : i32
    %c7_i32_45 = arith.constant 7 : i32
    %123 = arith.subi %c7_i32_45, %c2_i32 : i32
    %124 = arith.select %122, %c2_i32, %123 : i32
    %125 = arith.truncf %121 : vector<16x128xf32> to vector<16x128xbf16>
    %cst_46 = arith.constant dense<0.000000e+00> : vector<16x384xf32>
    %126 = tpu.matmul %125, %12, %cst_46 {dimension_numbers = #tpu.dot_dimension_numbers<[1], [0], [0], [1], [0, 0, 1, 1], [], []>} : vector<16x128xbf16>, vector<128x384xbf16>, vector<16x384xf32> -> vector<16x384xf32>
    %127 = arith.index_cast %124 : i32 to index
    %c0_47 = arith.constant 0 : index
    %c0_48 = arith.constant 0 : index
    %128 = vector.load %arg9[%127, %c0_47, %c0_48] : memref<8x16x384xbf16, #tpu.memory_space<vmem>>, vector<1x16x384xbf16>
    %129 = vector.shape_cast %128 : vector<1x16x384xbf16> to vector<16x384xbf16>
    %130 = vector.extract_strided_slice %129 {offsets = [0, 0], sizes = [16, 128], strides = [1, 1]} : vector<16x384xbf16> to vector<16x128xbf16>
    %131 = vector.extract_strided_slice %126 {offsets = [0, 0], sizes = [16, 128], strides = [1, 1]} : vector<16x384xf32> to vector<16x128xf32>
    %132 = arith.extf %130 : vector<16x128xbf16> to vector<16x128xf32>
    %133 = arith.addf %132, %131 : vector<16x128xf32>
    %134 = arith.negf %133 : vector<16x128xf32>
    %135 = math.exp %134 : vector<16x128xf32>
    %cst_49 = arith.constant 1.000000e+00 : f32
    %136 = vector.broadcast %cst_49 : f32 to vector<16x128xf32>
    %137 = arith.addf %136, %135 : vector<16x128xf32>
    %138 = arith.divf %136, %137 : vector<16x128xf32>
    %139 = vector.extract_strided_slice %129 {offsets = [0, 128], sizes = [16, 128], strides = [1, 1]} : vector<16x384xbf16> to vector<16x128xbf16>
    %140 = vector.extract_strided_slice %126 {offsets = [0, 128], sizes = [16, 128], strides = [1, 1]} : vector<16x384xf32> to vector<16x128xf32>
    %141 = arith.extf %139 : vector<16x128xbf16> to vector<16x128xf32>
    %142 = arith.addf %141, %140 : vector<16x128xf32>
    %143 = arith.negf %142 : vector<16x128xf32>
    %144 = math.exp %143 : vector<16x128xf32>
    %cst_50 = arith.constant 1.000000e+00 : f32
    %145 = vector.broadcast %cst_50 : f32 to vector<16x128xf32>
    %146 = arith.addf %145, %144 : vector<16x128xf32>
    %147 = arith.divf %145, %146 : vector<16x128xf32>
    %148 = vector.extract_strided_slice %129 {offsets = [0, 256], sizes = [16, 128], strides = [1, 1]} : vector<16x384xbf16> to vector<16x128xbf16>
    %149 = vector.extract_strided_slice %126 {offsets = [0, 256], sizes = [16, 128], strides = [1, 1]} : vector<16x384xf32> to vector<16x128xf32>
    %150 = vector.broadcast %14 : vector<1x128xf32> to vector<16x128xf32>
    %151 = arith.addf %149, %150 : vector<16x128xf32>
    %152 = arith.mulf %138, %151 : vector<16x128xf32>
    %153 = arith.extf %148 : vector<16x128xbf16> to vector<16x128xf32>
    %154 = arith.addf %153, %152 : vector<16x128xf32>
    %155 = math.tanh %154 : vector<16x128xf32>
    %cst_51 = arith.constant 1.000000e+00 : f32
    %156 = vector.broadcast %cst_51 : f32 to vector<16x128xf32>
    %157 = arith.subf %156, %147 : vector<16x128xf32>
    %158 = arith.mulf %157, %155 : vector<16x128xf32>
    %159 = arith.mulf %147, %121 : vector<16x128xf32>
    %160 = arith.addf %158, %159 : vector<16x128xf32>
    %161 = arith.index_cast %124 : i32 to index
    %c0_52 = arith.constant 0 : index
    %c0_53 = arith.constant 0 : index
    %162 = vector.load %arg2[%161, %c0_52, %c0_53] : memref<8x16x1xf32, #tpu.memory_space<vmem>>, vector<1x16x1xf32>
    %163 = vector.shape_cast %162 : vector<1x16x1xf32> to vector<16x1xf32>
    %164 = vector.broadcast %163 : vector<16x1xf32> to vector<16x128xf32>
    %165 = arith.mulf %164, %160 : vector<16x128xf32>
    %c0_54 = arith.constant 0 : index
    %166 = arith.index_cast %124 : i32 to index
    %c0_55 = arith.constant 0 : index
    %c0_56 = arith.constant 0 : index
    %167 = vector.load %arg7[%c0_54, %166, %c0_55, %c0_56] : memref<1x8x16x128xf32, #tpu.memory_space<vmem>>, vector<1x1x16x128xf32>
    %168 = vector.shape_cast %167 : vector<1x1x16x128xf32> to vector<16x128xf32>
    %169 = vector.shape_cast %165 : vector<16x128xf32> to vector<1x1x16x128xf32>
    tpu.vector_store %arg7[%c0_54, %166, %c0_55, %c0_56], %169 {strides = array<i32>} : memref<1x8x16x128xf32, #tpu.memory_space<vmem>>, vector<1x1x16x128xf32>,
    %cst_57 = arith.constant 1.000000e+00 : f32
    %170 = vector.broadcast %cst_57 : f32 to vector<16x1xf32>
    %171 = arith.subf %170, %163 : vector<16x1xf32>
    %172 = vector.broadcast %171 : vector<16x1xf32> to vector<16x128xf32>
    %173 = arith.mulf %172, %121 : vector<16x128xf32>
    %174 = arith.addf %165, %173 : vector<16x128xf32>
    %c3_i32 = arith.constant 3 : i32
    %c0_i32_58 = arith.constant 0 : i32
    %175 = arith.cmpi eq, %arg0, %c0_i32_58 : i32
    %c7_i32_59 = arith.constant 7 : i32
    %176 = arith.subi %c7_i32_59, %c3_i32 : i32
    %177 = arith.select %175, %c3_i32, %176 : i32
    %178 = arith.truncf %174 : vector<16x128xf32> to vector<16x128xbf16>
    %cst_60 = arith.constant dense<0.000000e+00> : vector<16x384xf32>
    %179 = tpu.matmul %178, %12, %cst_60 {dimension_numbers = #tpu.dot_dimension_numbers<[1], [0], [0], [1], [0, 0, 1, 1], [], []>} : vector<16x128xbf16>, vector<128x384xbf16>, vector<16x384xf32> -> vector<16x384xf32>
    %180 = arith.index_cast %177 : i32 to index
    %c0_61 = arith.constant 0 : index
    %c0_62 = arith.constant 0 : index
    %181 = vector.load %arg9[%180, %c0_61, %c0_62] : memref<8x16x384xbf16, #tpu.memory_space<vmem>>, vector<1x16x384xbf16>
    %182 = vector.shape_cast %181 : vector<1x16x384xbf16> to vector<16x384xbf16>
    %183 = vector.extract_strided_slice %182 {offsets = [0, 0], sizes = [16, 128], strides = [1, 1]} : vector<16x384xbf16> to vector<16x128xbf16>
    %184 = vector.extract_strided_slice %179 {offsets = [0, 0], sizes = [16, 128], strides = [1, 1]} : vector<16x384xf32> to vector<16x128xf32>
    %185 = arith.extf %183 : vector<16x128xbf16> to vector<16x128xf32>
    %186 = arith.addf %185, %184 : vector<16x128xf32>
    %187 = arith.negf %186 : vector<16x128xf32>
    %188 = math.exp %187 : vector<16x128xf32>
    %cst_63 = arith.constant 1.000000e+00 : f32
    %189 = vector.broadcast %cst_63 : f32 to vector<16x128xf32>
    %190 = arith.addf %189, %188 : vector<16x128xf32>
    %191 = arith.divf %189, %190 : vector<16x128xf32>
    %192 = vector.extract_strided_slice %182 {offsets = [0, 128], sizes = [16, 128], strides = [1, 1]} : vector<16x384xbf16> to vector<16x128xbf16>
    %193 = vector.extract_strided_slice %179 {offsets = [0, 128], sizes = [16, 128], strides = [1, 1]} : vector<16x384xf32> to vector<16x128xf32>
    %194 = arith.extf %192 : vector<16x128xbf16> to vector<16x128xf32>
    %195 = arith.addf %194, %193 : vector<16x128xf32>
    %196 = arith.negf %195 : vector<16x128xf32>
    %197 = math.exp %196 : vector<16x128xf32>
    %cst_64 = arith.constant 1.000000e+00 : f32
    %198 = vector.broadcast %cst_64 : f32 to vector<16x128xf32>
    %199 = arith.addf %198, %197 : vector<16x128xf32>
    %200 = arith.divf %198, %199 : vector<16x128xf32>
    %201 = vector.extract_strided_slice %182 {offsets = [0, 256], sizes = [16, 128], strides = [1, 1]} : vector<16x384xbf16> to vector<16x128xbf16>
    %202 = vector.extract_strided_slice %179 {offsets = [0, 256], sizes = [16, 128], strides = [1, 1]} : vector<16x384xf32> to vector<16x128xf32>
    %203 = vector.broadcast %14 : vector<1x128xf32> to vector<16x128xf32>
    %204 = arith.addf %202, %203 : vector<16x128xf32>
    %205 = arith.mulf %191, %204 : vector<16x128xf32>
    %206 = arith.extf %201 : vector<16x128xbf16> to vector<16x128xf32>
    %207 = arith.addf %206, %205 : vector<16x128xf32>
    %208 = math.tanh %207 : vector<16x128xf32>
    %cst_65 = arith.constant 1.000000e+00 : f32
    %209 = vector.broadcast %cst_65 : f32 to vector<16x128xf32>
    %210 = arith.subf %209, %200 : vector<16x128xf32>
    %211 = arith.mulf %210, %208 : vector<16x128xf32>
    %212 = arith.mulf %200, %174 : vector<16x128xf32>
    %213 = arith.addf %211, %212 : vector<16x128xf32>
    %214 = arith.index_cast %177 : i32 to index
    %c0_66 = arith.constant 0 : index
    %c0_67 = arith.constant 0 : index
    %215 = vector.load %arg2[%214, %c0_66, %c0_67] : memref<8x16x1xf32, #tpu.memory_space<vmem>>, vector<1x16x1xf32>
    %216 = vector.shape_cast %215 : vector<1x16x1xf32> to vector<16x1xf32>
    %217 = vector.broadcast %216 : vector<16x1xf32> to vector<16x128xf32>
    %218 = arith.mulf %217, %213 : vector<16x128xf32>
    %c0_68 = arith.constant 0 : index
    %219 = arith.index_cast %177 : i32 to index
    %c0_69 = arith.constant 0 : index
    %c0_70 = arith.constant 0 : index
    %220 = vector.load %arg7[%c0_68, %219, %c0_69, %c0_70] : memref<1x8x16x128xf32, #tpu.memory_space<vmem>>, vector<1x1x16x128xf32>
    %221 = vector.shape_cast %220 : vector<1x1x16x128xf32> to vector<16x128xf32>
    %222 = vector.shape_cast %218 : vector<16x128xf32> to vector<1x1x16x128xf32>
    tpu.vector_store %arg7[%c0_68, %219, %c0_69, %c0_70], %222 {strides = array<i32>} : memref<1x8x16x128xf32, #tpu.memory_space<vmem>>, vector<1x1x16x128xf32>,
    %cst_71 = arith.constant 1.000000e+00 : f32
    %223 = vector.broadcast %cst_71 : f32 to vector<16x1xf32>
    %224 = arith.subf %223, %216 : vector<16x1xf32>
    %225 = vector.broadcast %224 : vector<16x1xf32> to vector<16x128xf32>
    %226 = arith.mulf %225, %174 : vector<16x128xf32>
    %227 = arith.addf %218, %226 : vector<16x128xf32>
    %c4_i32 = arith.constant 4 : i32
    %c0_i32_72 = arith.constant 0 : i32
    %228 = arith.cmpi eq, %arg0, %c0_i32_72 : i32
    %c7_i32_73 = arith.constant 7 : i32
    %229 = arith.subi %c7_i32_73, %c4_i32 : i32
    %230 = arith.select %228, %c4_i32, %229 : i32
    %231 = arith.truncf %227 : vector<16x128xf32> to vector<16x128xbf16>
    %cst_74 = arith.constant dense<0.000000e+00> : vector<16x384xf32>
    %232 = tpu.matmul %231, %12, %cst_74 {dimension_numbers = #tpu.dot_dimension_numbers<[1], [0], [0], [1], [0, 0, 1, 1], [], []>} : vector<16x128xbf16>, vector<128x384xbf16>, vector<16x384xf32> -> vector<16x384xf32>
    %233 = arith.index_cast %230 : i32 to index
    %c0_75 = arith.constant 0 : index
    %c0_76 = arith.constant 0 : index
    %234 = vector.load %arg9[%233, %c0_75, %c0_76] : memref<8x16x384xbf16, #tpu.memory_space<vmem>>, vector<1x16x384xbf16>
    %235 = vector.shape_cast %234 : vector<1x16x384xbf16> to vector<16x384xbf16>
    %236 = vector.extract_strided_slice %235 {offsets = [0, 0], sizes = [16, 128], strides = [1, 1]} : vector<16x384xbf16> to vector<16x128xbf16>
    %237 = vector.extract_strided_slice %232 {offsets = [0, 0], sizes = [16, 128], strides = [1, 1]} : vector<16x384xf32> to vector<16x128xf32>
    %238 = arith.extf %236 : vector<16x128xbf16> to vector<16x128xf32>
    %239 = arith.addf %238, %237 : vector<16x128xf32>
    %240 = arith.negf %239 : vector<16x128xf32>
    %241 = math.exp %240 : vector<16x128xf32>
    %cst_77 = arith.constant 1.000000e+00 : f32
    %242 = vector.broadcast %cst_77 : f32 to vector<16x128xf32>
    %243 = arith.addf %242, %241 : vector<16x128xf32>
    %244 = arith.divf %242, %243 : vector<16x128xf32>
    %245 = vector.extract_strided_slice %235 {offsets = [0, 128], sizes = [16, 128], strides = [1, 1]} : vector<16x384xbf16> to vector<16x128xbf16>
    %246 = vector.extract_strided_slice %232 {offsets = [0, 128], sizes = [16, 128], strides = [1, 1]} : vector<16x384xf32> to vector<16x128xf32>
    %247 = arith.extf %245 : vector<16x128xbf16> to vector<16x128xf32>
    %248 = arith.addf %247, %246 : vector<16x128xf32>
    %249 = arith.negf %248 : vector<16x128xf32>
    %250 = math.exp %249 : vector<16x128xf32>
    %cst_78 = arith.constant 1.000000e+00 : f32
    %251 = vector.broadcast %cst_78 : f32 to vector<16x128xf32>
    %252 = arith.addf %251, %250 : vector<16x128xf32>
    %253 = arith.divf %251, %252 : vector<16x128xf32>
    %254 = vector.extract_strided_slice %235 {offsets = [0, 256], sizes = [16, 128], strides = [1, 1]} : vector<16x384xbf16> to vector<16x128xbf16>
    %255 = vector.extract_strided_slice %232 {offsets = [0, 256], sizes = [16, 128], strides = [1, 1]} : vector<16x384xf32> to vector<16x128xf32>
    %256 = vector.broadcast %14 : vector<1x128xf32> to vector<16x128xf32>
    %257 = arith.addf %255, %256 : vector<16x128xf32>
    %258 = arith.mulf %244, %257 : vector<16x128xf32>
    %259 = arith.extf %254 : vector<16x128xbf16> to vector<16x128xf32>
    %260 = arith.addf %259, %258 : vector<16x128xf32>
    %261 = math.tanh %260 : vector<16x128xf32>
    %cst_79 = arith.constant 1.000000e+00 : f32
    %262 = vector.broadcast %cst_79 : f32 to vector<16x128xf32>
    %263 = arith.subf %262, %253 : vector<16x128xf32>
    %264 = arith.mulf %263, %261 : vector<16x128xf32>
    %265 = arith.mulf %253, %227 : vector<16x128xf32>
    %266 = arith.addf %264, %265 : vector<16x128xf32>
    %267 = arith.index_cast %230 : i32 to index
    %c0_80 = arith.constant 0 : index
    %c0_81 = arith.constant 0 : index
    %268 = vector.load %arg2[%267, %c0_80, %c0_81] : memref<8x16x1xf32, #tpu.memory_space<vmem>>, vector<1x16x1xf32>
    %269 = vector.shape_cast %268 : vector<1x16x1xf32> to vector<16x1xf32>
    %270 = vector.broadcast %269 : vector<16x1xf32> to vector<16x128xf32>
    %271 = arith.mulf %270, %266 : vector<16x128xf32>
    %c0_82 = arith.constant 0 : index
    %272 = arith.index_cast %230 : i32 to index
    %c0_83 = arith.constant 0 : index
    %c0_84 = arith.constant 0 : index
    %273 = vector.load %arg7[%c0_82, %272, %c0_83, %c0_84] : memref<1x8x16x128xf32, #tpu.memory_space<vmem>>, vector<1x1x16x128xf32>
    %274 = vector.shape_cast %273 : vector<1x1x16x128xf32> to vector<16x128xf32>
    %275 = vector.shape_cast %271 : vector<16x128xf32> to vector<1x1x16x128xf32>
    tpu.vector_store %arg7[%c0_82, %272, %c0_83, %c0_84], %275 {strides = array<i32>} : memref<1x8x16x128xf32, #tpu.memory_space<vmem>>, vector<1x1x16x128xf32>,
    %cst_85 = arith.constant 1.000000e+00 : f32
    %276 = vector.broadcast %cst_85 : f32 to vector<16x1xf32>
    %277 = arith.subf %276, %269 : vector<16x1xf32>
    %278 = vector.broadcast %277 : vector<16x1xf32> to vector<16x128xf32>
    %279 = arith.mulf %278, %227 : vector<16x128xf32>
    %280 = arith.addf %271, %279 : vector<16x128xf32>
    %c5_i32 = arith.constant 5 : i32
    %c0_i32_86 = arith.constant 0 : i32
    %281 = arith.cmpi eq, %arg0, %c0_i32_86 : i32
    %c7_i32_87 = arith.constant 7 : i32
    %282 = arith.subi %c7_i32_87, %c5_i32 : i32
    %283 = arith.select %281, %c5_i32, %282 : i32
    %284 = arith.truncf %280 : vector<16x128xf32> to vector<16x128xbf16>
    %cst_88 = arith.constant dense<0.000000e+00> : vector<16x384xf32>
    %285 = tpu.matmul %284, %12, %cst_88 {dimension_numbers = #tpu.dot_dimension_numbers<[1], [0], [0], [1], [0, 0, 1, 1], [], []>} : vector<16x128xbf16>, vector<128x384xbf16>, vector<16x384xf32> -> vector<16x384xf32>
    %286 = arith.index_cast %283 : i32 to index
    %c0_89 = arith.constant 0 : index
    %c0_90 = arith.constant 0 : index
    %287 = vector.load %arg9[%286, %c0_89, %c0_90] : memref<8x16x384xbf16, #tpu.memory_space<vmem>>, vector<1x16x384xbf16>
    %288 = vector.shape_cast %287 : vector<1x16x384xbf16> to vector<16x384xbf16>
    %289 = vector.extract_strided_slice %288 {offsets = [0, 0], sizes = [16, 128], strides = [1, 1]} : vector<16x384xbf16> to vector<16x128xbf16>
    %290 = vector.extract_strided_slice %285 {offsets = [0, 0], sizes = [16, 128], strides = [1, 1]} : vector<16x384xf32> to vector<16x128xf32>
    %291 = arith.extf %289 : vector<16x128xbf16> to vector<16x128xf32>
    %292 = arith.addf %291, %290 : vector<16x128xf32>
    %293 = arith.negf %292 : vector<16x128xf32>
    %294 = math.exp %293 : vector<16x128xf32>
    %cst_91 = arith.constant 1.000000e+00 : f32
    %295 = vector.broadcast %cst_91 : f32 to vector<16x128xf32>
    %296 = arith.addf %295, %294 : vector<16x128xf32>
    %297 = arith.divf %295, %296 : vector<16x128xf32>
    %298 = vector.extract_strided_slice %288 {offsets = [0, 128], sizes = [16, 128], strides = [1, 1]} : vector<16x384xbf16> to vector<16x128xbf16>
    %299 = vector.extract_strided_slice %285 {offsets = [0, 128], sizes = [16, 128], strides = [1, 1]} : vector<16x384xf32> to vector<16x128xf32>
    %300 = arith.extf %298 : vector<16x128xbf16> to vector<16x128xf32>
    %301 = arith.addf %300, %299 : vector<16x128xf32>
    %302 = arith.negf %301 : vector<16x128xf32>
    %303 = math.exp %302 : vector<16x128xf32>
    %cst_92 = arith.constant 1.000000e+00 : f32
    %304 = vector.broadcast %cst_92 : f32 to vector<16x128xf32>
    %305 = arith.addf %304, %303 : vector<16x128xf32>
    %306 = arith.divf %304, %305 : vector<16x128xf32>
    %307 = vector.extract_strided_slice %288 {offsets = [0, 256], sizes = [16, 128], strides = [1, 1]} : vector<16x384xbf16> to vector<16x128xbf16>
    %308 = vector.extract_strided_slice %285 {offsets = [0, 256], sizes = [16, 128], strides = [1, 1]} : vector<16x384xf32> to vector<16x128xf32>
    %309 = vector.broadcast %14 : vector<1x128xf32> to vector<16x128xf32>
    %310 = arith.addf %308, %309 : vector<16x128xf32>
    %311 = arith.mulf %297, %310 : vector<16x128xf32>
    %312 = arith.extf %307 : vector<16x128xbf16> to vector<16x128xf32>
    %313 = arith.addf %312, %311 : vector<16x128xf32>
    %314 = math.tanh %313 : vector<16x128xf32>
    %cst_93 = arith.constant 1.000000e+00 : f32
    %315 = vector.broadcast %cst_93 : f32 to vector<16x128xf32>
    %316 = arith.subf %315, %306 : vector<16x128xf32>
    %317 = arith.mulf %316, %314 : vector<16x128xf32>
    %318 = arith.mulf %306, %280 : vector<16x128xf32>
    %319 = arith.addf %317, %318 : vector<16x128xf32>
    %320 = arith.index_cast %283 : i32 to index
    %c0_94 = arith.constant 0 : index
    %c0_95 = arith.constant 0 : index
    %321 = vector.load %arg2[%320, %c0_94, %c0_95] : memref<8x16x1xf32, #tpu.memory_space<vmem>>, vector<1x16x1xf32>
    %322 = vector.shape_cast %321 : vector<1x16x1xf32> to vector<16x1xf32>
    %323 = vector.broadcast %322 : vector<16x1xf32> to vector<16x128xf32>
    %324 = arith.mulf %323, %319 : vector<16x128xf32>
    %c0_96 = arith.constant 0 : index
    %325 = arith.index_cast %283 : i32 to index
    %c0_97 = arith.constant 0 : index
    %c0_98 = arith.constant 0 : index
    %326 = vector.load %arg7[%c0_96, %325, %c0_97, %c0_98] : memref<1x8x16x128xf32, #tpu.memory_space<vmem>>, vector<1x1x16x128xf32>
    %327 = vector.shape_cast %326 : vector<1x1x16x128xf32> to vector<16x128xf32>
    %328 = vector.shape_cast %324 : vector<16x128xf32> to vector<1x1x16x128xf32>
    tpu.vector_store %arg7[%c0_96, %325, %c0_97, %c0_98], %328 {strides = array<i32>} : memref<1x8x16x128xf32, #tpu.memory_space<vmem>>, vector<1x1x16x128xf32>,
    %cst_99 = arith.constant 1.000000e+00 : f32
    %329 = vector.broadcast %cst_99 : f32 to vector<16x1xf32>
    %330 = arith.subf %329, %322 : vector<16x1xf32>
    %331 = vector.broadcast %330 : vector<16x1xf32> to vector<16x128xf32>
    %332 = arith.mulf %331, %280 : vector<16x128xf32>
    %333 = arith.addf %324, %332 : vector<16x128xf32>
    %c6_i32 = arith.constant 6 : i32
    %c0_i32_100 = arith.constant 0 : i32
    %334 = arith.cmpi eq, %arg0, %c0_i32_100 : i32
    %c7_i32_101 = arith.constant 7 : i32
    %335 = arith.subi %c7_i32_101, %c6_i32 : i32
    %336 = arith.select %334, %c6_i32, %335 : i32
    %337 = arith.truncf %333 : vector<16x128xf32> to vector<16x128xbf16>
    %cst_102 = arith.constant dense<0.000000e+00> : vector<16x384xf32>
    %338 = tpu.matmul %337, %12, %cst_102 {dimension_numbers = #tpu.dot_dimension_numbers<[1], [0], [0], [1], [0, 0, 1, 1], [], []>} : vector<16x128xbf16>, vector<128x384xbf16>, vector<16x384xf32> -> vector<16x384xf32>
    %339 = arith.index_cast %336 : i32 to index
    %c0_103 = arith.constant 0 : index
    %c0_104 = arith.constant 0 : index
    %340 = vector.load %arg9[%339, %c0_103, %c0_104] : memref<8x16x384xbf16, #tpu.memory_space<vmem>>, vector<1x16x384xbf16>
    %341 = vector.shape_cast %340 : vector<1x16x384xbf16> to vector<16x384xbf16>
    %342 = vector.extract_strided_slice %341 {offsets = [0, 0], sizes = [16, 128], strides = [1, 1]} : vector<16x384xbf16> to vector<16x128xbf16>
    %343 = vector.extract_strided_slice %338 {offsets = [0, 0], sizes = [16, 128], strides = [1, 1]} : vector<16x384xf32> to vector<16x128xf32>
    %344 = arith.extf %342 : vector<16x128xbf16> to vector<16x128xf32>
    %345 = arith.addf %344, %343 : vector<16x128xf32>
    %346 = arith.negf %345 : vector<16x128xf32>
    %347 = math.exp %346 : vector<16x128xf32>
    %cst_105 = arith.constant 1.000000e+00 : f32
    %348 = vector.broadcast %cst_105 : f32 to vector<16x128xf32>
    %349 = arith.addf %348, %347 : vector<16x128xf32>
    %350 = arith.divf %348, %349 : vector<16x128xf32>
    %351 = vector.extract_strided_slice %341 {offsets = [0, 128], sizes = [16, 128], strides = [1, 1]} : vector<16x384xbf16> to vector<16x128xbf16>
    %352 = vector.extract_strided_slice %338 {offsets = [0, 128], sizes = [16, 128], strides = [1, 1]} : vector<16x384xf32> to vector<16x128xf32>
    %353 = arith.extf %351 : vector<16x128xbf16> to vector<16x128xf32>
    %354 = arith.addf %353, %352 : vector<16x128xf32>
    %355 = arith.negf %354 : vector<16x128xf32>
    %356 = math.exp %355 : vector<16x128xf32>
    %cst_106 = arith.constant 1.000000e+00 : f32
    %357 = vector.broadcast %cst_106 : f32 to vector<16x128xf32>
    %358 = arith.addf %357, %356 : vector<16x128xf32>
    %359 = arith.divf %357, %358 : vector<16x128xf32>
    %360 = vector.extract_strided_slice %341 {offsets = [0, 256], sizes = [16, 128], strides = [1, 1]} : vector<16x384xbf16> to vector<16x128xbf16>
    %361 = vector.extract_strided_slice %338 {offsets = [0, 256], sizes = [16, 128], strides = [1, 1]} : vector<16x384xf32> to vector<16x128xf32>
    %362 = vector.broadcast %14 : vector<1x128xf32> to vector<16x128xf32>
    %363 = arith.addf %361, %362 : vector<16x128xf32>
    %364 = arith.mulf %350, %363 : vector<16x128xf32>
    %365 = arith.extf %360 : vector<16x128xbf16> to vector<16x128xf32>
    %366 = arith.addf %365, %364 : vector<16x128xf32>
    %367 = math.tanh %366 : vector<16x128xf32>
    %cst_107 = arith.constant 1.000000e+00 : f32
    %368 = vector.broadcast %cst_107 : f32 to vector<16x128xf32>
    %369 = arith.subf %368, %359 : vector<16x128xf32>
    %370 = arith.mulf %369, %367 : vector<16x128xf32>
    %371 = arith.mulf %359, %333 : vector<16x128xf32>
    %372 = arith.addf %370, %371 : vector<16x128xf32>
    %373 = arith.index_cast %336 : i32 to index
    %c0_108 = arith.constant 0 : index
    %c0_109 = arith.constant 0 : index
    %374 = vector.load %arg2[%373, %c0_108, %c0_109] : memref<8x16x1xf32, #tpu.memory_space<vmem>>, vector<1x16x1xf32>
    %375 = vector.shape_cast %374 : vector<1x16x1xf32> to vector<16x1xf32>
    %376 = vector.broadcast %375 : vector<16x1xf32> to vector<16x128xf32>
    %377 = arith.mulf %376, %372 : vector<16x128xf32>
    %c0_110 = arith.constant 0 : index
    %378 = arith.index_cast %336 : i32 to index
    %c0_111 = arith.constant 0 : index
    %c0_112 = arith.constant 0 : index
    %379 = vector.load %arg7[%c0_110, %378, %c0_111, %c0_112] : memref<1x8x16x128xf32, #tpu.memory_space<vmem>>, vector<1x1x16x128xf32>
    %380 = vector.shape_cast %379 : vector<1x1x16x128xf32> to vector<16x128xf32>
    %381 = vector.shape_cast %377 : vector<16x128xf32> to vector<1x1x16x128xf32>
    tpu.vector_store %arg7[%c0_110, %378, %c0_111, %c0_112], %381 {strides = array<i32>} : memref<1x8x16x128xf32, #tpu.memory_space<vmem>>, vector<1x1x16x128xf32>,
    %cst_113 = arith.constant 1.000000e+00 : f32
    %382 = vector.broadcast %cst_113 : f32 to vector<16x1xf32>
    %383 = arith.subf %382, %375 : vector<16x1xf32>
    %384 = vector.broadcast %383 : vector<16x1xf32> to vector<16x128xf32>
    %385 = arith.mulf %384, %333 : vector<16x128xf32>
    %386 = arith.addf %377, %385 : vector<16x128xf32>
    %c7_i32_114 = arith.constant 7 : i32
    %c0_i32_115 = arith.constant 0 : i32
    %387 = arith.cmpi eq, %arg0, %c0_i32_115 : i32
    %c7_i32_116 = arith.constant 7 : i32
    %388 = arith.subi %c7_i32_116, %c7_i32_114 : i32
    %389 = arith.select %387, %c7_i32_114, %388 : i32
    %390 = arith.truncf %386 : vector<16x128xf32> to vector<16x128xbf16>
    %cst_117 = arith.constant dense<0.000000e+00> : vector<16x384xf32>
    %391 = tpu.matmul %390, %12, %cst_117 {dimension_numbers = #tpu.dot_dimension_numbers<[1], [0], [0], [1], [0, 0, 1, 1], [], []>} : vector<16x128xbf16>, vector<128x384xbf16>, vector<16x384xf32> -> vector<16x384xf32>
    %392 = arith.index_cast %389 : i32 to index
    %c0_118 = arith.constant 0 : index
    %c0_119 = arith.constant 0 : index
    %393 = vector.load %arg9[%392, %c0_118, %c0_119] : memref<8x16x384xbf16, #tpu.memory_space<vmem>>, vector<1x16x384xbf16>
    %394 = vector.shape_cast %393 : vector<1x16x384xbf16> to vector<16x384xbf16>
    %395 = vector.extract_strided_slice %394 {offsets = [0, 0], sizes = [16, 128], strides = [1, 1]} : vector<16x384xbf16> to vector<16x128xbf16>
    %396 = vector.extract_strided_slice %391 {offsets = [0, 0], sizes = [16, 128], strides = [1, 1]} : vector<16x384xf32> to vector<16x128xf32>
    %397 = arith.extf %395 : vector<16x128xbf16> to vector<16x128xf32>
    %398 = arith.addf %397, %396 : vector<16x128xf32>
    %399 = arith.negf %398 : vector<16x128xf32>
    %400 = math.exp %399 : vector<16x128xf32>
    %cst_120 = arith.constant 1.000000e+00 : f32
    %401 = vector.broadcast %cst_120 : f32 to vector<16x128xf32>
    %402 = arith.addf %401, %400 : vector<16x128xf32>
    %403 = arith.divf %401, %402 : vector<16x128xf32>
    %404 = vector.extract_strided_slice %394 {offsets = [0, 128], sizes = [16, 128], strides = [1, 1]} : vector<16x384xbf16> to vector<16x128xbf16>
    %405 = vector.extract_strided_slice %391 {offsets = [0, 128], sizes = [16, 128], strides = [1, 1]} : vector<16x384xf32> to vector<16x128xf32>
    %406 = arith.extf %404 : vector<16x128xbf16> to vector<16x128xf32>
    %407 = arith.addf %406, %405 : vector<16x128xf32>
    %408 = arith.negf %407 : vector<16x128xf32>
    %409 = math.exp %408 : vector<16x128xf32>
    %cst_121 = arith.constant 1.000000e+00 : f32
    %410 = vector.broadcast %cst_121 : f32 to vector<16x128xf32>
    %411 = arith.addf %410, %409 : vector<16x128xf32>
    %412 = arith.divf %410, %411 : vector<16x128xf32>
    %413 = vector.extract_strided_slice %394 {offsets = [0, 256], sizes = [16, 128], strides = [1, 1]} : vector<16x384xbf16> to vector<16x128xbf16>
    %414 = vector.extract_strided_slice %391 {offsets = [0, 256], sizes = [16, 128], strides = [1, 1]} : vector<16x384xf32> to vector<16x128xf32>
    %415 = vector.broadcast %14 : vector<1x128xf32> to vector<16x128xf32>
    %416 = arith.addf %414, %415 : vector<16x128xf32>
    %417 = arith.mulf %403, %416 : vector<16x128xf32>
    %418 = arith.extf %413 : vector<16x128xbf16> to vector<16x128xf32>
    %419 = arith.addf %418, %417 : vector<16x128xf32>
    %420 = math.tanh %419 : vector<16x128xf32>
    %cst_122 = arith.constant 1.000000e+00 : f32
    %421 = vector.broadcast %cst_122 : f32 to vector<16x128xf32>
    %422 = arith.subf %421, %412 : vector<16x128xf32>
    %423 = arith.mulf %422, %420 : vector<16x128xf32>
    %424 = arith.mulf %412, %386 : vector<16x128xf32>
    %425 = arith.addf %423, %424 : vector<16x128xf32>
    %426 = arith.index_cast %389 : i32 to index
    %c0_123 = arith.constant 0 : index
    %c0_124 = arith.constant 0 : index
    %427 = vector.load %arg2[%426, %c0_123, %c0_124] : memref<8x16x1xf32, #tpu.memory_space<vmem>>, vector<1x16x1xf32>
    %428 = vector.shape_cast %427 : vector<1x16x1xf32> to vector<16x1xf32>
    %429 = vector.broadcast %428 : vector<16x1xf32> to vector<16x128xf32>
    %430 = arith.mulf %429, %425 : vector<16x128xf32>
    %c0_125 = arith.constant 0 : index
    %431 = arith.index_cast %389 : i32 to index
    %c0_126 = arith.constant 0 : index
    %c0_127 = arith.constant 0 : index
    %432 = vector.load %arg7[%c0_125, %431, %c0_126, %c0_127] : memref<1x8x16x128xf32, #tpu.memory_space<vmem>>, vector<1x1x16x128xf32>
    %433 = vector.shape_cast %432 : vector<1x1x16x128xf32> to vector<16x128xf32>
    %434 = vector.shape_cast %430 : vector<16x128xf32> to vector<1x1x16x128xf32>
    tpu.vector_store %arg7[%c0_125, %431, %c0_126, %c0_127], %434 {strides = array<i32>} : memref<1x8x16x128xf32, #tpu.memory_space<vmem>>, vector<1x1x16x128xf32>,
    %cst_128 = arith.constant 1.000000e+00 : f32
    %435 = vector.broadcast %cst_128 : f32 to vector<16x1xf32>
    %436 = arith.subf %435, %428 : vector<16x1xf32>
    %437 = vector.broadcast %436 : vector<16x1xf32> to vector<16x128xf32>
    %438 = arith.mulf %437, %386 : vector<16x128xf32>
    %439 = arith.addf %430, %438 : vector<16x128xf32>
    %c8_i32 = arith.constant 8 : i32
    %c0_129 = arith.constant 0 : index
    %c0_130 = arith.constant 0 : index
    %c0_131 = arith.constant 0 : index
    %440 = vector.load %arg8[%c0_129, %c0_130, %c0_131] : memref<1x16x128xf32, #tpu.memory_space<vmem>>, vector<1x16x128xf32>
    %441 = vector.shape_cast %440 : vector<1x16x128xf32> to vector<16x128xf32>
    %442 = vector.shape_cast %439 : vector<16x128xf32> to vector<1x16x128xf32>
    tpu.vector_store %arg8[%c0_129, %c0_130, %c0_131], %442 {strides = array<i32>} : memref<1x16x128xf32, #tpu.memory_space<vmem>>, vector<1x16x128xf32>,
    return
  }
  func.func @transform_0(%arg0: i32) -> (i32, i32) {
    %c0_i32 = arith.constant 0 : i32
    %c0_i32_0 = arith.constant 0 : i32
    %c0_i32_1 = arith.constant 0 : i32
    return %c0_i32, %c0_i32_0 : i32, i32
  }
  func.func @transform_1(%arg0: i32) -> (i32, i32, i32) {
    %c0_i32 = arith.constant 0 : i32
    %c0_i32_0 = arith.constant 0 : i32
    %c0_i32_1 = arith.constant 0 : i32
    %c0_i32_2 = arith.constant 0 : i32
    return %c0_i32, %c0_i32_0, %c0_i32_1 : i32, i32, i32
  }
  func.func @transform_2(%arg0: i32) -> (i32, i32, i32) {
    %c0_i32 = arith.constant 0 : i32
    %c0_i32_0 = arith.constant 0 : i32
    %c0_i32_1 = arith.constant 0 : i32
    return %arg0, %c0_i32, %c0_i32_0 : i32, i32, i32
  }
  func.func @transform_3(%arg0: i32) -> (i32, i32, i32) {
    %c0_i32 = arith.constant 0 : i32
    %c0_i32_0 = arith.constant 0 : i32
    %c0_i32_1 = arith.constant 0 : i32
    return %arg0, %c0_i32, %c0_i32_0 : i32, i32, i32
  }
  func.func @transform_4(%arg0: i32) -> (i32, i32, i32) {
    %c0_i32 = arith.constant 0 : i32
    %c0_i32_0 = arith.constant 0 : i32
    %c0_i32_1 = arith.constant 0 : i32
    return %arg0, %c0_i32, %c0_i32_0 : i32, i32, i32
  }
  func.func @transform_5(%arg0: i32) -> (i32, i32, i32) {
    %c0_i32 = arith.constant 0 : i32
    %c0_i32_0 = arith.constant 0 : i32
    %c0_i32_1 = arith.constant 0 : i32
    return %arg0, %c0_i32, %c0_i32_0 : i32, i32, i32
  }
  func.func @transform_6(%arg0: i32) -> (i32, i32, i32, i32) {
    %c0_i32 = arith.constant 0 : i32
    %c0_i32_0 = arith.constant 0 : i32
    %c0_i32_1 = arith.constant 0 : i32
    %c0_i32_2 = arith.constant 0 : i32
    return %arg0, %c0_i32, %c0_i32_0, %c0_i32_1 : i32, i32, i32, i32
  }
  func.func @transform_7(%arg0: i32) -> (i32, i32, i32) {
    %c0_i32 = arith.constant 0 : i32
    %c0_i32_0 = arith.constant 0 : i32
    %c0_i32_1 = arith.constant 0 : i32
    return %arg0, %c0_i32, %c0_i32_0 : i32, i32, i32
  }
}

</mosaic_0001>

<bundles_post_ra>
// kernel: tpu_custom_call.1
= control target key start
LH: loop header
LB: loop body
LE: loop exit
PB: predicated region body
PF: predicated region fallthrough
CT: control target
= control target key end

     0   :  { %s4304_s0 = inlined_call_operand.vmem [shape: bf16[128,32], index: 0, kind: input, shape index: {}]   ;;  %s4305_s1 = inlined_call_operand.vmem [shape: f32[8,16,1], index: 1, kind: input, shape index: {}]   ;;  %s4306_s2 = inlined_call_operand.vmem [shape: bf16[2,32,384], index: 2, kind: input, shape index: {}]   ;;  %s4307_s3 = inlined_call_operand.hbm [shape: bf16[2,128,384], index: 3, kind: input, shape index: {}]   ;;  %s4308_s4 = inlined_call_operand.vmem [shape: f32[2,1,384], index: 4, kind: input, shape index: {}]   ;;  %s4309_s5 = inlined_call_operand.vmem [shape: f32[2,1,128], index: 5, kind: input, shape index: {}]   ;;  %s4310_s6 = inlined_call_operand.hbm [shape: f32[2,8,16,128], index: 6, kind: output, shape index: {0}]   ;;  %s4311_s7 = inlined_call_operand.hbm [shape: f32[2,16,128], index: 7, kind: output, shape index: {1}]  }
   0x1   :  { %4330 = sst [smem:[#allocation20_spill]] %s4306_s2 }
   0x2   :  { %4331 = sst [smem:[#allocation21_spill]] %s4307_s3 }
   0x3   :  { %4332 = sst [smem:[#allocation22_spill]] %s4309_s5 }
   0x4   :  { %4333 = sst [smem:[#allocation23_spill]] %s4311_s7 }
   0x5   :  { %13 = vsyncpa [#allocation4], 0 }
   0x6   :  { %15 = vsyncpa [#allocation4 + $0x1], 0 }
   0x7   :  { %16 = vsyncpa [#allocation5], 0 }
   0x8   :  { %18 = vsyncpa [#allocation5 + $0x1], 0 }
   0x9   :  { %19 = vsyncpa [#allocation8], 0 }
   0xa   :  { %21 = vsyncpa [#allocation8 + $0x1], 0  ;;  %s3335_s24 = smov 0   ;;  %s3337_s25 = smov 0  }
   0xb   :  { %s3339_s26 = smov 0   ;;  %s3341_s27 = smov 0  }
   0xc LB: > { %4334 = sst [smem:[#allocation12_spill]] %s3276_s24  ;;  %s3356_s28 = sadd.s32 4294967295, %s3288_s27   ;;  %s3288_s27 = sphi %s3341_s27, %s4374_s27   ;;  %s3284_s26 = sphi %s3339_s26, %s4377_s26   ;;  %s3280_s25 = sphi %s3337_s25, %s4376_s25   ;;  %s3276_s24 = sphi %s3335_s24, %s4375_s24  }
   0xd   : > { %4335 = sst [smem:[#allocation13_spill]] %s3280_s25  ;;  %s2645_s29 = sadd.s32 4294967294, %s3288_s27  }
   0xe   : > { %4336 = sst [smem:[#allocation14_spill]] %s3284_s26  ;;  %s3360_s30 = sadd.s32 1, %s3288_s27  }
   0xf   : > { %4337 = sst [smem:[#allocation15_spill]] %s3288_s27  ;;  %s102_s8 = sadd.s32 1, %s3284_s26 }
  0x10   : > { %4338 = sst [smem:[#allocation16_spill]] %s3360_s30  ;;  %s99_s9 = ssub.s32 %s3288_s27, %s3360_s30 }
  0x11   : > { %p109_p0 = scmp.ne.s32.totalorder %s3284_s26, %s3280_s25  ;;  %p100_p1 = scmp.eq.s32.totalorder %s99_s9, 0 }
  0x12   : > { %p110_p2 = scmp.eq.s32.totalorder %s3288_s27, 0  ;;  %p115_p3 = scmp.ne.s32.totalorder %s3280_s25, %s3276_s24 }
  0x13   : > { %p116_p4 = scmp.eq.s32.totalorder %s3356_s28, 0  ;;  %p191_p7 = scmp.eq.s32.totalorder %s3356_s28, 1 }
  0x14   : > { %s3372_s10 = scalar_select %p100_p1, %s3284_s26, %s102_s8  }
  0x15   : > { %p111_p5 = por %p110_p2, %p109_p0  ;;  %p3376_p6 = por %p116_p4, %p115_p3 }
  0x16   : > { %4339 = sst [smem:[#allocation17_spill]] %s3372_s10  ;;  %p197_p8 = scmp.eq.s32.totalorder %s2645_s29, 1 }
  0x17   : > { %p2647_p9 = scmp.ge.s32.totalorder %s3288_s27, 2  ;;  %p2955_p10 = scmp.lt.s32.totalorder %s3288_s27, 2 }
  0x18   : > { %p3383_p11 = por %p191_p7, %p109_p0  ;;  %p3387_p12 = por %p197_p8, %p115_p3 }
  0x19   : > { %s257_s14 = sand.u32 1, %s3284_s26   ;;  %s2934_s15 = smul.u32 192, %s3288_s27 }
  0x1a   : > { %s4341_s12 = scalar_select %p3383_p11, 1, 0 }
  0x1b   : > { %s4343_s13 = scalar_select %p3387_p12, 1, 0 }
  0x1c   : > { %4342 = sst [smem:[#allocation18_spill]] %s4341_s12  ;;  %s2933_s16 = smul.u32 192, %s257_s14 }
  0x1d   : > { %4344 = sst [smem:[#allocation19_spill]] %s4343_s13  ;;  %p3396_p13 = pnand %p2955_p10, %p111_p5 }
  0x1e   : > { %s4345_s3 = sld [smem:[#allocation21_spill]]  ;;  %s261_s22 = scalar_lea.vmem [#allocation3], %s2933_s16 }
  0x1f   : > { %s269_s23 = sshll.u32 %s261_s22, 4  ;;  %s258_s29 = scalar_lea.sflag [#allocation4], %s257_s14  ;;  %s270_s23 = int_to_ptr.vmem [resolvable:$true] %s269_s23 }
  0x20   : > { %p3164_p1 = pneg %p3396_p13 }
  0x24   : > { %s266_s19 = scalar_lea.hbm %s4345_s3, %s2934_s15  ;;  %s3167_s18 = scalar_lea.hbm %s4345_s3, 384 }
  0x25   : > { %s267_s21 = sshll.u32 %s266_s19, 4  ;;  %s268_s21 = int_to_ptr.hbm [resolvable:$true] %s267_s21 }
  0x26   : > { %s3160_s8 = sshra.s32 %s268_s21, 4  ;;  %s3161_s8 = int_to_ptr.hbm [resolvable:$true] %s3160_s8 }
  0x27   : > { %s3162_s9 = scalar_lea.hbm %s3161_s8, 192  ;;  %p3168_p5 = scmp.lt.s32.totalorder %s3161_s8, %s4345_s3 }
  0x28   : > { %p3163_p0 = scmp.ne.s32.totalorder %s3161_s8, %s3162_s9  ;;  %p3169_p7 = scmp.lt.s32.totalorder %s3167_s18, %s3162_s9 }
  0x2a   : > { %p3165_p2 = pnand %p3164_p1, %p3163_p0  ;;  %p3170_p8 = por %p3169_p7, %p3168_p5 }
  0x2c   : > { %p3166_p3 = pneg %p3165_p2 }
  0x2e   : > { %p3171_p10 = pnand %p3170_p8, %p3166_p3 }
  0x30   : > { %3174 = shalt.err (!%p3171_p10)
}
  0x31   : > { %s3290_s14 = smov 192   ;;  %s3291_s16 = smov 12  }
  0x32   : > { %2947 = dma.hbm_to_vmem [thread:$0]  (!%p3396_p13), %s268_s21, 3072, %s270_s23, %s258_s29, %s3290_s14, %s3290_s14, %s3291_s16  }
  0x33   : > { %p2649_p0 = scmp.ge.s32.totalorder %s3288_s27, 1  ;;  %p290_p1 = scmp.lt.s32.totalorder %s3288_s27, 3 }
  0x35   : > { %p291_p2 = pnand %p2649_p0, %p290_p1 }
  0x36   : > { %s3413_s19 = sand.u32 (!%p291_p2), 1, %s3280_s25  }
  0x37   : > { %294 = sbr.rel (%p291_p2) target bundleno = 1728 (0x6c0), region = 44  ;;  %s297_s10 = scalar_lea.sflag (!%p291_p2), [#allocation4], %s3413_s19 }
  0x38   : > { %s2935_s26 = smul.u32 (!%p291_p2), 192, %s3413_s19 }
  0x3a   : > { %s3417_s22 = scalar_lea.vmem (!%p291_p2), [#allocation3], %s2935_s26 }
  0x3c   : > { %3263 = dma.done.wait (%p3376_p6), %s297_s10, 3072  }
  0x3d   : > { %3265 = vsyncadd (%p3376_p6), %s297_s10, 4294964224  ;;  %p349_p13 = scmp.lt.s32.totalorder %s3356_s28, 1  ;;  %s4347_s2 = sld [smem:[#allocation20_spill]]  ;;  %v2885_v18 = vld [vmem:[%s4304_s0] sm:$0xff]  ;;  %vm466_vm0 = vcmask 261120   ;;  %v2886_v19 = vld [vmem:[%s4304_s0 + $0x8] sm:$0xff] }
  0x3e   : > { %s4348_s5 = sld [smem:[#allocation22_spill]]  ;;  %s2650_s14 = sshll.u32 %s3413_s19, 7  ;;  %v2819_v20 = vld [vmem:[%s3417_s22 + $0xa8] sm:$0xf]  ;;  %v2921_v21 = vld [vmem:[%s3417_s22 + $0xb0] sm:$0xf0] }
  0x3f   : > { %s3425_s20 = scalar_select %p349_p13, %s3356_s28, 1  ;;  %v2807_v22 = vld [vmem:[%s3417_s22 + $0x90] sm:$0xf]  ;;  %v3490_v23 = vor.u32 %v2921_v21, %v2819_v20  ;;  %v2918_v24 = vld [vmem:[%s3417_s22 + $0x98] sm:$0xf0]  ;;  %v2889_v58 = vld [vmem:[%s4304_s0 + $0x20] sm:$0xff] }
  0x40   : > { %s3443_s16 = scalar_select %p116_p4, 1, 6  ;;  %v3499_v25 = vor.u32 %v2918_v24, %v2807_v22  ;;  %v2795_v26 = vld [vmem:[%s3417_s22 + $0x78] sm:$0xf]  ;;  %v2915_v27 = vld [vmem:[%s3417_s22 + $0x80] sm:$0xf0] }
  0x41   : > { %s2936_s21 = smul.u32 48, %s3425_s20  ;;  %865 = vmatpush.bf16.msra.mxu3 %v3490_v23  ;;  %v3505_v28 = vor.u32 %v2915_v27, %v2795_v26  ;;  %v2783_v29 = vld [vmem:[%s3417_s22 + $0x60] sm:$0xf]  ;;  %v2912_v30 = vld [vmem:[%s3417_s22 + $0x68] sm:$0xf0]  ;;  %v2887_v31 = vld [vmem:[%s4304_s0 + $0x10] sm:$0xff] }
  0x42   : > { %s3447_s26 = scalar_select %p116_p4, 2, 5  ;;  %v3514_v32 = vor.u32 %v2912_v30, %v2783_v29  ;;  %v2771_v33 = vld [vmem:[%s3417_s22 + $0x48] sm:$0xf]  ;;  %v2909_v34 = vld [vmem:[%s3417_s22 + $0x50] sm:$0xf0] }
  0x43   : > { %s353_s8 = scalar_lea.vmem %s4347_s2, %s2936_s21  ;;  %s4313_s10 = sshll.u32 %s3443_s16, 4  ;;  %v2759_v35 = vld [vmem:[%s3417_s22 + $0x30] sm:$0xf]  ;;  %v3529_v36 = vor.u32 %v2909_v34, %v2771_v33  ;;  %v2906_v37 = vld [vmem:[%s3417_s22 + $0x38] sm:$0xf0] }
  0x44   : > { %s3435_s17 = scalar_lea.vmem %s4348_s5, %s3425_s20  ;;  %v2699_v0 = vld [vmem:[%s353_s8 + $0x18] sm:$0xf]  ;;  %v2897_v1 = vld [vmem:[%s353_s8 + $0x20] sm:$0xf0]  ;;  %v2896_v3 = vld [vmem:[%s353_s8 + $0x1c] sm:$0xf]  ;;  %v3539_v38 = vor.u32 %v2906_v37, %v2759_v35 }
  0x45   : > { %v2700_v2 = vor.u32 %v2897_v1, %v2699_v0  ;;  %v2701_v4 = vld [vmem:[%s353_s8 + $0x24] sm:$0xf0]  ;;  %v2707_v6 = vld [vmem:[%s353_s8 + $0x20] sm:$0xf]  ;;  %v2898_v7 = vld [vmem:[%s353_s8 + $0x28] sm:$0xf0]  ;;  %866 = vmatpush.bf16.msra.mxu3 %v3499_v25 }
  0x46   : > { %v2704_v5 = vor.u32 %v2896_v3, %v2701_v4  ;;  %v2687_v8 = vld [vmem:[%s353_s8] sm:$0xf]  ;;  %v2708_v9 = vor.u32 %v2898_v7, %v2707_v6  ;;  %v2894_v10 = vld [vmem:[%s353_s8 + $0x8] sm:$0xf0]  ;;  %v2893_v11 = vld [vmem:[%s353_s8 + $0x4] sm:$0xf] }
  0x47   : > { %497 = vmatpush.bf16.msra.mxu0 %v2700_v2  ;;  %v2689_v12 = vld [vmem:[%s353_s8 + $0xc] sm:$0xf0]  ;;  %v2688_v13 = vor.u32 %v2894_v10, %v2687_v8  ;;  %v2695_v15 = vld [vmem:[%s353_s8 + $0x8] sm:$0xf]  ;;  %v2895_v16 = vld [vmem:[%s353_s8 + $0x10] sm:$0xf0] }
  0x48   : > { %546 = vmatpush.bf16.msra.mxu1 %v2704_v5  ;;  %v2692_v14 = vor.u32 %v2893_v11, %v2689_v12  ;;  %595 = vmatpush.bf16.msra.mxu2 %v2708_v9  ;;  %v2696_v17 = vor.u32 %v2895_v16, %v2695_v15  ;;  %s3451_s21 = scalar_lea.vmem [#allocation6], %s2650_s14  ;;  %s4314_s29 = sshll.u32 %s3447_s26, 4  ;;  %v2747_v39 = vld [vmem:[%s3417_s22 + $0x18] sm:$0xf]  ;;  %v2903_v40 = vld [vmem:[%s3417_s22 + $0x20] sm:$0xf0] }
  0x49   : > { %s3456_s23 = scalar_lea.vmem %s3451_s21, %s4313_s10 [#allocation6]  ;;  %s3464_s8 = scalar_lea.vmem %s3451_s21, %s4314_s29 [#allocation6]  ;;  %867 = vmatpush.bf16.msra.mxu3 %v3505_v28  ;;  %v3549_v41 = vor.u32 %v2903_v40, %v2747_v39  ;;  %v2735_v42 = vld [vmem:[%s3417_s22] sm:$0xf]  ;;  %v2900_v43 = vld [vmem:[%s3417_s22 + $0x8] sm:$0xf0]  ;;  %v2888_v44 = vld [vmem:[%s4304_s0 + $0x18] sm:$0xff]  ;;  %v3292_v2 = vmov 0  }
  0x4a   : > { %s3468_s9 = scalar_select %p116_p4, 3, 4  ;;  %v3564_v45 = vor.u32 %v2900_v43, %v2735_v42  ;;  %v2920_v46 = vld [vmem:[%s3417_s22 + $0xac] sm:$0xf]  ;;  %v2821_v47 = vld [vmem:[%s3417_s22 + $0xb4] sm:$0xf0]  ;;  %2995 = vset.pattern.permute.xlu1 %v3292_v2  ;;  %2994 = vset.pattern.permute.xlu0 %v3292_v2 }
  0x4b   : > { %498 = vmatpush.bf16.msra.mxu0 %v2688_v13  ;;  %s3481_s10 = scalar_select %p116_p4, 4, 3  ;;  %v3574_v48 = vor.u32 %v2920_v46, %v2821_v47  ;;  %v2917_v49 = vld [vmem:[%s3417_s22 + $0x94] sm:$0xf]  ;;  %v2809_v50 = vld [vmem:[%s3417_s22 + $0x9c] sm:$0xf0]  ;;  %2996 = vset.pattern.permute.xlu2 %v3292_v2 }
  0x4c   : > { %547 = vmatpush.bf16.msra.mxu1 %v2692_v14  ;;  %596 = vmatpush.bf16.msra.mxu2 %v2696_v17  ;;  %s4316_s15 = sshll.u32 %s3468_s9, 4  ;;  %v3583_v51 = vor.u32 %v2917_v49, %v2809_v50  ;;  %v2914_v52 = vld [vmem:[%s3417_s22 + $0x7c] sm:$0xf]  ;;  %v2797_v53 = vld [vmem:[%s3417_s22 + $0x84] sm:$0xf0]  ;;  %v2891_v33 = vld [vmem:[%s4304_s0 + $0x30] sm:$0xff] }
  0x4d   : > { %s3477_s14 = scalar_lea.vmem %s3451_s21, %s4316_s15 [#allocation6]  ;;  %s4315_s29 = sshll.u32 %s3481_s10, 4  ;;  %868 = vmatpush.bf16.msra.mxu3 %v3514_v32  ;;  %v3596_v54 = vor.u32 %v2914_v52, %v2797_v53  ;;  %v2911_v55 = vld [vmem:[%s3417_s22 + $0x64] sm:$0xf]  ;;  %v2785_v56 = vld [vmem:[%s3417_s22 + $0x6c] sm:$0xf0]  ;;  %v2890_v15 = vld [vmem:[%s4304_s0 + $0x28] sm:$0xff] }
  0x4e   : > { %2709 = vmatmul.msk.bf16.vlgmr.msra.gmra.mxu0 %vm466_vm0, %v2885_v18  ;;  %s3496_s11 = scalar_lea.vmem %s3451_s21, %s4315_s29 [#allocation6]  ;;  %v3607_v57 = vor.u32 %v2911_v55, %v2785_v56  ;;  %v2908_v59 = vld [vmem:[%s3417_s22 + $0x4c] sm:$0xf]  ;;  %v2773_v60 = vld [vmem:[%s3417_s22 + $0x54] sm:$0xf0]  ;;  %v2905_v62 = vld [vmem:[%s3417_s22 + $0x34] sm:$0xf] }
  0x4f   : > { %2717 = vmatmul.msk.bf16.vlgmr.msra.gmra.mxu1 %vm466_vm0, %v2885_v18  ;;  %2725 = vmatmul.msk.bf16.vlgmr.msra.gmra.mxu2 %vm466_vm0, %v2885_v18  ;;  %s3518_s15 = scalar_select %p116_p4, 5, 2  ;;  %v3624_v61 = vor.u32 %v2908_v59, %v2773_v60  ;;  %v2761_v63 = vld [vmem:[%s3417_s22 + $0x3c] sm:$0xf0]  ;;  %v2902_v4 = vld [vmem:[%s3417_s22 + $0x1c] sm:$0xf] }
  0x50   : > { %1256 = vmatpush.bf16.msrb.mxu2 %v3490_v23  ;;  %s3545_s2 = scalar_select %p116_p4, 6, 1  ;;  %1076 = vmatpush.bf16.msrb.mxu0 %v3574_v48  ;;  %v3633_v1 = vor.u32 %v2905_v62, %v2761_v63  ;;  %v2749_v5 = vld [vmem:[%s3417_s22 + $0x24] sm:$0xf0]  ;;  %v2827_v6 = vld [vmem:[%s3417_s22 + $0xb0] sm:$0xf] }
  0x51   : > { %s4317_s29 = sshll.u32 %s3518_s15, 4  ;;  %869 = vmatpush.bf16.msra.mxu3 %v3529_v36  ;;  %v2922_v7 = vld [vmem:[%s3417_s22 + $0xb8] sm:$0xf0]  ;;  %v3644_v8 = vor.u32 %v2902_v4, %v2749_v5  ;;  %v2899_v11 = vld [vmem:[%s3417_s22 + $0x4] sm:$0xf]  ;;  %s4351_s7 = sshll.u32 %s3468_s9, 4 }
  0x52   : > { %s3535_s18 = scalar_lea.vmem %s3451_s21, %s4317_s29 [#allocation6]  ;;  %s4321_s29 = sshll.u32 %s3545_s2, 4  ;;  %v3646_v9 = vor.u32 %v2922_v7, %v2827_v6  ;;  %v2737_v12 = vld [vmem:[%s3417_s22 + $0xc] sm:$0xf0]  ;;  %v2815_v16 = vld [vmem:[%s3417_s22 + $0x98] sm:$0xf] }
  0x53   : > { %s3560_s25 = scalar_lea.vmem %s3451_s21, %s4321_s29 [#allocation6]  ;;  %v3655_v14 = vor.u32 %v2899_v11, %v2737_v12  ;;  %v2919_v17 = vld [vmem:[%s3417_s22 + $0xa0] sm:$0xf0]  ;;  %v2916_v20 = vld [vmem:[%s3417_s22 + $0x88] sm:$0xf0]  ;;  %v2791_v29 = vld [vmem:[%s3417_s22 + $0x68] sm:$0xf] }
  0x54   : > { %1257 = vmatpush.bf16.msrb.mxu2 %v3499_v25  ;;  %s3568_s30 = scalar_select %p116_p4, 7, 0  ;;  %1077 = vmatpush.bf16.msrb.mxu0 %v3583_v51  ;;  %v3674_v18 = vor.u32 %v2919_v17, %v2815_v16  ;;  %v2913_v30 = vld [vmem:[%s3417_s22 + $0x70] sm:$0xf0]  ;;  %v2779_v34 = vld [vmem:[%s3417_s22 + $0x50] sm:$0xf] }
  0x55   : > { %870 = vmatpush.bf16.msra.mxu3 %v3539_v38  ;;  %s3603_s29 = scalar_select %p116_p4, 0, 7  ;;  %1090 = vmatpush.bf16.msrb.mxu1 %v3646_v9  ;;  %v2910_v35 = vld [vmem:[%s3417_s22 + $0x58] sm:$0xf0]  ;;  %v2767_v43 = vld [vmem:[%s3417_s22 + $0x38] sm:$0xf] }
  0x56   : > { %s4322_s3 = sshll.u32 %s3568_s30, 4  ;;  %v3707_v37 = vor.u32 %v2910_v35, %v2779_v34  ;;  %v2755_v47 = vld [vmem:[%s3417_s22 + $0x20] sm:$0xf]  ;;  %v2904_v49 = vld [vmem:[%s3417_s22 + $0x28] sm:$0xf0]  ;;  %v2892_v60 = vld [vmem:[%s4304_s0 + $0x38] sm:$0xff] }
  0x57   : > { %s3590_s5 = scalar_lea.vmem %s3451_s21, %s4322_s3 [#allocation6]  ;;  %s4328_s13 = sshll.u32 %s3603_s29, 4  ;;  %v3728_v50 = vor.u32 %v2904_v49, %v2755_v47  ;;  %v2743_v56 = vld [vmem:[%s3417_s22 + $0x8] sm:$0xf] }
  0x58   : > { %1258 = vmatpush.bf16.msrb.mxu2 %v3505_v28  ;;  %1078 = vmatpush.bf16.msrb.mxu0 %v3596_v54  ;;  %s1026_s27 = scalar_lea.vmem %s4305_s1, %s4328_s13  ;;  %s4349_s3 = sshll.u32 %s3443_s16, 4 }
  0x59   : > { %871 = vmatpush.bf16.msra.mxu3 %v3549_v41  ;;  %v1027_v0 = vld [vmem:[%s1026_s27] sm:$0xff]  ;;  %v1028_v10 = vld [vmem:[%s1026_s27 + $0x8] sm:$0xff]  ;;  %s1220_s24 = scalar_lea.vmem %s4305_s1, %s4349_s3  ;;  %1091 = vmatpush.bf16.msrb.mxu1 %v3674_v18  ;;  %s4350_s13 = sshll.u32 %s3447_s26, 4 }
  0x5a   : > { %v1044_v3 = vsub.f32 1.0, %v1027_v0  ;;  %1031 = vperm.xlu0 %2994, %v1027_v0   ;;  %v1045_v13 = vsub.f32 1.0, %v1028_v10  ;;  %v1221_v21 = vld [vmem:[%s1220_s24] sm:$0xff]  ;;  %v1222_v26 = vld [vmem:[%s1220_s24 + $0x8] sm:$0xff]  ;;  %s1414_s27 = scalar_lea.vmem %s4305_s1, %s4350_s13  ;;  %s1608_s3 = scalar_lea.vmem %s4305_s1, %s4351_s7 }
  0x5b   : > { %v1238_v24 = vsub.f32 1.0, %v1221_v21  ;;  %v1239_v27 = vsub.f32 1.0, %v1222_v26  ;;  %1225 = vperm.xlu2 %2996, %v1221_v21   ;;  %v1415_v39 = vld [vmem:[%s1414_s27] sm:$0xff]  ;;  %v1416_v42 = vld [vmem:[%s1414_s27 + $0x8] sm:$0xff]  ;;  %s4352_s7 = sshll.u32 %s3481_s10, 4  ;;  %s4358_s24 = sshll.u32 %s3603_s29, 4 }
  0x5c   : > { %1259 = vmatpush.bf16.msrb.mxu2 %v3514_v32  ;;  %1079 = vmatpush.bf16.msrb.mxu0 %v3607_v57  ;;  %v1432_v40 = vsub.f32 1.0, %v1415_v39  ;;  %v1609_v52 = vld [vmem:[%s1608_s3] sm:$0xff]  ;;  %v1610_v53 = vld [vmem:[%s1608_s3 + $0x8] sm:$0xff]  ;;  %v1433_v55 = vsub.f32 1.0, %v1416_v42  ;;  %s1802_s3 = scalar_lea.vmem %s4305_s1, %s4352_s7  ;;  %s4353_s7 = sshll.u32 %s3518_s15, 4 }
  0x5d   : > { %872 = vmatpush.bf16.msra.mxu3 %v3564_v45  ;;  %1048 = vperm.xlu1 %2995, %v1044_v3   ;;  %v1627_v62 = vsub.f32 1.0, %v1610_v53  ;;  %v1803_v63 = vld [vmem:[%s1802_s3] sm:$0xff]  ;;  %v1626_v0 = vsub.f32 1.0, %v1609_v52  ;;  %s2438_s12 = sshll.u32 %s3451_s21, 4  ;;  %s4250_s12 = int_to_ptr.vmem [resolvable:$true] %s2438_s12 }
  0x5e   : > { %2710 = vmatmul.msk.bf16.gmra.mxu0 %vm466_vm0, %v2886_v19  ;;  %v1820_v3 = vsub.f32 1.0, %v1803_v63 }
  0x5f   : > { %2718 = vmatmul.msk.bf16.gmra.mxu1 %vm466_vm0, %v2886_v19  ;;  %2726 = vmatmul.msk.bf16.gmra.mxu2 %vm466_vm0, %v2886_v19  ;;  %v2803_v19 = vld [vmem:[%s3417_s22 + $0x80] sm:$0xf] }
  0x60   : > { %1260 = vmatpush.bf16.msrb.mxu2 %v3529_v36  ;;  %873 = vmatmul.bf16.vlgmr.msra.gmra.mxu3 %v3292_v2  ;;  %v3682_v22 = vor.u32 %v2916_v20, %v2803_v19 }
  0x61   : > { %879 = vmatpush.bf16.msrb.mxu3 %v3574_v48  ;;  %1080 = vmatpush.bf16.msrb.mxu0 %v3624_v61 }
  0x62   : > { %1036 = vperm.xlu0 %2994, %v1028_v10   ;;  %1092 = vmatpush.bf16.msrb.mxu1 %v3682_v22 }
  0x63   : > { %1230 = vperm.xlu2 %2996, %v1222_v26  }
  0x64   : > { %1261 = vmatpush.bf16.msrb.mxu2 %v3539_v38 }
  0x65   : > { %880 = vmatpush.bf16.msrb.mxu3 %v3583_v51  ;;  %1081 = vmatpush.bf16.msrb.mxu0 %v3633_v1 }
  0x66   : > { %1053 = vperm.xlu1 %2995, %v1045_v13  }
  0x68   : > { %1262 = vmatpush.bf16.msrb.mxu2 %v3549_v41 }
  0x69   : > { %881 = vmatpush.bf16.msrb.mxu3 %v3596_v54  ;;  %1082 = vmatpush.bf16.msrb.mxu0 %v3644_v8 }
  0x6a   : > { %1242 = vperm.xlu0 %2994, %v1238_v24  }
  0x6b   : > { %1419 = vperm.xlu2 %2996, %v1415_v39  }
  0x6c   : > { %1263 = vmatpush.bf16.msrb.mxu2 %v3564_v45 }
  0x6d   : > { %882 = vmatpush.bf16.msrb.mxu3 %v3607_v57  ;;  %1083 = vmatpush.bf16.msrb.mxu0 %v3655_v14 }
  0x6e   : > { %2711 = vmatmul.msk.bf16.gmra.mxu0 %vm466_vm0, %v2887_v31  ;;  %1247 = vperm.xlu1 %2995, %v1239_v27  }
  0x6f   : > { %2719 = vmatmul.msk.bf16.gmra.mxu1 %vm466_vm0, %v2887_v31  ;;  %2727 = vmatmul.msk.bf16.gmra.mxu2 %vm466_vm0, %v2887_v31  ;;  %v3691_v31 = vor.u32 %v2913_v30, %v2791_v29 }
  0x70   : > { %1464 = vmatpush.bf16.msra.mxu2 %v3574_v48 }
  0x71   : > { %883 = vmatpush.bf16.msrb.mxu3 %v3624_v61  ;;  %1284 = vmatpush.bf16.msra.mxu0 %v3646_v9 }
  0x72   : > { %1093 = vmatpush.bf16.msrb.mxu1 %v3691_v31  ;;  %1424 = vperm.xlu0 %2994, %v1416_v42  }
  0x73   : > { %1441 = vperm.xlu2 %2996, %v1433_v55  }
  0x74   : > { %1465 = vmatpush.bf16.msra.mxu2 %v3583_v51 }
  0x75   : > { %884 = vmatpush.bf16.msrb.mxu3 %v3633_v1  ;;  %1285 = vmatpush.bf16.msra.mxu0 %v3674_v18 }
  0x76   : > { %1436 = vperm.xlu1 %2995, %v1432_v40   ;;  %1094 = vmatpush.bf16.msrb.mxu1 %v3707_v37 }
  0x78   : > { %1466 = vmatpush.bf16.msra.mxu2 %v3596_v54 }
  0x79   : > { %885 = vmatpush.bf16.msrb.mxu3 %v3644_v8  ;;  %1286 = vmatpush.bf16.msra.mxu0 %v3682_v22 }
  0x7a   : > { %1613 = vperm.xlu0 %2994, %v1609_v52  }
  0x7b   : > { %1630 = vperm.xlu2 %2996, %v1626_v0  }
  0x7c   : > { %1467 = vmatpush.bf16.msra.mxu2 %v3607_v57 }
  0x7d   : > { %886 = vmatpush.bf16.msrb.mxu3 %v3655_v14  ;;  %1287 = vmatpush.bf16.msra.mxu0 %v3691_v31 }
  0x7e   : > { %2712 = vmatmul.msk.bf16.gmra.mxu0 %vm466_vm0, %v2888_v44  ;;  %1618 = vperm.xlu1 %2995, %v1610_v53  }
  0x7f   : > { %2720 = vmatmul.msk.bf16.gmra.mxu1 %vm466_vm0, %v2888_v44  ;;  %2728 = vmatmul.msk.bf16.gmra.mxu2 %vm466_vm0, %v2888_v44  ;;  %v2907_v44 = vld [vmem:[%s3417_s22 + $0x40] sm:$0xf0] }
  0x80   : > { %1468 = vmatpush.bf16.msra.mxu2 %v3624_v61  ;;  %887 = vmatmul.bf16.vlgmr.msrb.gmra.mxu3 %v3292_v2  ;;  %v3715_v46 = vor.u32 %v2907_v44, %v2767_v43 }
  0x81   : > { %893 = vmatpush.bf16.msra.mxu3 %v3646_v9  ;;  %1288 = vmatpush.bf16.msra.mxu0 %v3707_v37 }
  0x82   : > { %1095 = vmatpush.bf16.msrb.mxu1 %v3715_v46  ;;  %1635 = vperm.xlu0 %2994, %v1627_v62  }
  0x84   : > { %1469 = vmatpush.bf16.msra.mxu2 %v3633_v1 }
  0x85   : > { %894 = vmatpush.bf16.msra.mxu3 %v3674_v18  ;;  %1289 = vmatpush.bf16.msra.mxu0 %v3715_v46 }
  0x86   : > { %1096 = vmatpush.bf16.msrb.mxu1 %v3728_v50  ;;  %1807 = vperm.xlu1 %2995, %v1803_v63  }
  0x88   : > { %1470 = vmatpush.bf16.msra.mxu2 %v3644_v8 }
  0x89   : > { %895 = vmatpush.bf16.msra.mxu3 %v3682_v22  ;;  %1290 = vmatpush.bf16.msra.mxu0 %v3728_v50 }
  0x8a   : > { %1824 = vperm.xlu0 %2994, %v1820_v3  }
  0x8c   : > { %1471 = vmatpush.bf16.msra.mxu2 %v3655_v14 }
  0x8d   : > { %896 = vmatpush.bf16.msra.mxu3 %v3691_v31 }
  0x8e   : > { %2713 = vmatmul.msk.bf16.gmra.mxu0 %vm466_vm0, %v2889_v58 }
  0x8f   : > { %2721 = vmatmul.msk.bf16.gmra.mxu1 %vm466_vm0, %v2889_v58  ;;  %2729 = vmatmul.msk.bf16.gmra.mxu2 %vm466_vm0, %v2889_v58  ;;  %v2901_v58 = vld [vmem:[%s3417_s22 + $0x10] sm:$0xf0]  ;;  %s2937_s22 = smul.u32 3, %s3425_s20 }
  0x90   : > { %v3735_v59 = vor.u32 %v2901_v58, %v2743_v56 }
  0x91   : > { %897 = vmatpush.bf16.msra.mxu3 %v3707_v37  ;;  %s357_s20 = scalar_lea.vmem %s4308_s4, %s2937_s22  ;;  %s4354_s22 = sshll.u32 %s3545_s2, 4 }
  0x92   : > { %1097 = vmatpush.bf16.msrb.mxu1 %v3735_v59  ;;  %1291 = vmatpush.bf16.msra.mxu0 %v3735_v59  ;;  %v386_v4 = vld [vmem:[%s357_s20] sm:$0x7]  ;;  %s2190_s20 = scalar_lea.vmem %s4305_s1, %s4354_s22  ;;  %s2923_s22 = smul.u32 24, %s3603_s29 }
  0x93   : > { %v3764_v6 = vperm.slane %v386_v4, 0  ;;  %v3772_v7 = vperm.slane %v386_v4, 1  ;;  %v3780_v20 = vperm.slane %v386_v4, 2  ;;  %v2192_v34 = vld [vmem:[%s2190_s20 + $0x8] sm:$0xff]  ;;  %s2924_s29 = smul.u32 24, %s3443_s16 }
  0x94   : > { %v2209_v43 = vsub.f32 1.0, %v2192_v34  ;;  %s3851_s27 = scalar_lea.vmem [#allocation2], %s2923_s22  ;;  %s2925_s16 = smul.u32 24, %s3447_s26 }
  0x95   : > { %898 = vmatpush.bf16.msra.mxu3 %v3715_v46  ;;  %s2926_s26 = smul.u32 24, %s3468_s9 }
  0x96   : > { %1450 = vmatpush.bf16.msra.mxu1 %v3490_v23  ;;  %s2927_s9 = smul.u32 24, %s3481_s10 }
  0x97   : > { %s2928_s10 = smul.u32 24, %s3518_s15 }
  0x98   : > { %s2929_s15 = smul.u32 24, %s3545_s2 }
  0x99   : > { %899 = vmatpush.bf16.msra.mxu3 %v3728_v50  ;;  %s2930_s2 = smul.u32 24, %s3568_s30 }
  0x9a   : > { %1451 = vmatpush.bf16.msra.mxu1 %v3499_v25  ;;  %s4185_s13 = scalar_lea.vmem [#allocation2], %s2929_s15  ;;  %s3210_s15 = scalar_lea.hbm %s4310_s6, 256 }
  0x9d   : > { %900 = vmatpush.bf16.msra.mxu3 %v3735_v59 }
  0x9e   : > { %2714 = vmatmul.msk.bf16.gmra.mxu0 %vm466_vm0, %v2890_v15  ;;  %1452 = vmatpush.bf16.msra.mxu1 %v3505_v28 }
  0x9f   : > { %2722 = vmatmul.msk.bf16.gmra.mxu1 %vm466_vm0, %v2890_v15  ;;  %2730 = vmatmul.msk.bf16.gmra.mxu2 %vm466_vm0, %v2890_v15 }
  0xa0   : > { %901 = vmatmul.bf16.vlgmr.msra.gmra.mxu3 %v3292_v2  ;;  %v1804_v2 = vld [vmem:[%s1802_s3 + $0x8] sm:$0xff]  ;;  %s1996_s3 = scalar_lea.vmem %s4305_s1, %s4353_s7  ;;  %s4355_s7 = sshll.u32 %s3568_s30, 4 }
  0xa1   : > { %1062 = vmatpush.bf16.msrb.mxu3 %v3490_v23  ;;  %v1821_v5 = vsub.f32 1.0, %v1804_v2  ;;  %1812 = vperm.xlu2 %2996, %v1804_v2   ;;  %v1997_v12 = vld [vmem:[%s1996_s3] sm:$0xff]  ;;  %v1998_v17 = vld [vmem:[%s1996_s3 + $0x8] sm:$0xff]  ;;  %s2384_s3 = scalar_lea.vmem %s4305_s1, %s4355_s7  ;;  %s3910_s7 = scalar_lea.vmem [#allocation2], %s2924_s29 }
  0xa2   : > { %1453 = vmatpush.bf16.msra.mxu1 %v3514_v32  ;;  %v2014_v15 = vsub.f32 1.0, %v1997_v12  ;;  %2006 = vperm.xlu0 %2994, %v1998_v17   ;;  %v2015_v39 = vsub.f32 1.0, %v1998_v17  ;;  %v2385_v55 = vld [vmem:[%s2384_s3] sm:$0xff]  ;;  %v2386_v62 = vld [vmem:[%s2384_s3 + $0x8] sm:$0xff]  ;;  %s2931_s30 = sshll.u32 %s3356_s28, 7 }
  0xa3   : > { %1829 = vperm.xlu1 %2995, %v1821_v5   ;;  %v2402_v0 = vsub.f32 1.0, %v2385_v55 }
  0xa5   : > { %1063 = vmatpush.bf16.msrb.mxu3 %v3499_v25 }
  0xa6   : > { %1454 = vmatpush.bf16.msra.mxu1 %v3529_v36 }
  0xa9   : > { %1064 = vmatpush.bf16.msrb.mxu3 %v3505_v28  ;;  %2001 = vperm.xlu2 %2996, %v1997_v12  }
  0xaa   : > { %1455 = vmatpush.bf16.msra.mxu1 %v3539_v38 }
  0xab   : > { %2018 = vperm.xlu1 %2995, %v2014_v15  }
  0xad   : > { %1065 = vmatpush.bf16.msrb.mxu3 %v3514_v32 }
  0xae   : > { %2715 = vmatmul.msk.bf16.gmra.mxu0 %vm466_vm0, %v2891_v33  ;;  %1456 = vmatpush.bf16.msra.mxu1 %v3549_v41 }
  0xaf   : > { %2723 = vmatmul.msk.bf16.gmra.mxu1 %vm466_vm0, %v2891_v33  ;;  %2731 = vmatmul.msk.bf16.gmra.mxu2 %vm466_vm0, %v2891_v33  ;;  %v2191_v33 = vld [vmem:[%s2190_s20] sm:$0xff]  ;;  %s1041_s20 = scalar_lea.vmem %s3451_s21, %s4358_s24 [#allocation6] }
  0xb0   : > { %2195 = vperm.xlu0 %2994, %v2191_v33   ;;  %v2208_v58 = vsub.f32 1.0, %v2191_v33 }
  0xb1   : > { %1066 = vmatpush.bf16.msrb.mxu3 %v3529_v36  ;;  %2023 = vperm.xlu2 %2996, %v2015_v39  }
  0xb2   : > { %1457 = vmatpush.bf16.msra.mxu1 %v3564_v45 }
  0xb3   : > { %2200 = vperm.xlu1 %2995, %v2192_v34  }
  0xb5   : > { %1067 = vmatpush.bf16.msrb.mxu3 %v3539_v38 }
  0xb8   : > { %2217 = vperm.xlu0 %2994, %v2209_v43  }
  0xb9   : > { %1068 = vmatpush.bf16.msrb.mxu3 %v3549_v41  ;;  %2212 = vperm.xlu2 %2996, %v2208_v58  }
  0xbb   : > { %2389 = vperm.xlu1 %2995, %v2385_v55  }
  0xbd   : > { %1069 = vmatpush.bf16.msrb.mxu3 %v3564_v45 }
  0xbe   : > { %2716 = vmatmul.msk.bf16.gmra.mxu0 %vm466_vm0, %v2892_v60 }
  0xbf   : > { %2724 = vmatmul.msk.bf16.gmra.mxu1 %vm466_vm0, %v2892_v60  ;;  %2732 = vmatmul.msk.bf16.gmra.mxu2 %vm466_vm0, %v2892_v60 }
  0xc0   : > { %2406 = vperm.xlu0 %2994, %v2402_v0  }
  0xc1   : > { %1270 = vmatpush.bf16.msra.mxu3 %v3574_v48  ;;  %2394 = vperm.xlu2 %2996, %v2386_v62  }
  0xc5   : > { %1271 = vmatpush.bf16.msra.mxu3 %v3583_v51 }
  0xc9   : > { %1272 = vmatpush.bf16.msra.mxu3 %v3596_v54 }
  0xcb   : > { %v500_v10 = vpop.f32.mrf.mxu0 }
  0xcc   : > { %v501_v11 = vadd.f32 %v500_v10, %v3764_v6  ;;  %v549_v13 = vpop.f32.mrf.mxu1  ;;  %v2403_v10 = vsub.f32 1.0, %v2386_v62 }
  0xcd   : > { %v550_v16 = vadd.f32 %v549_v13, %v3772_v7  ;;  %1273 = vmatpush.bf16.msra.mxu3 %v3607_v57 }
  0xce   : > { %2411 = vperm.xlu1 %2995, %v2403_v10  }
  0xcf   : > { %v638_v19 = vpack.c.bf16 %v550_v16, %v501_v11 }
  0xd1   : > { %670 = vst [vmem:[#allocation2] sm:$0xff] %v638_v19  ;;  %1274 = vmatpush.bf16.msra.mxu3 %v3624_v61 }
  0xd2   : > { %v598_v24 = vpop.f32.mrf.mxu2 }
  0xd3   : > { %v502_v21 = vpop.f32.mrf.mxu0  ;;  %v599_v27 = vadd.f32 %v598_v24, %v3780_v20 }
  0xd4   : > { %v503_v26 = vadd.f32 %v502_v21, %v3764_v6  ;;  %v551_v29 = vpop.f32.mrf.mxu1 }
  0xd5   : > { %v552_v30 = vadd.f32 %v551_v29, %v3772_v7  ;;  %v639_v35 = vpack.c.bf16 %v599_v27, %v599_v27  ;;  %1275 = vmatpush.bf16.msra.mxu3 %v3633_v1 }
  0xd7   : > { %v640_v40 = vpack.c.bf16 %v552_v30, %v503_v26  ;;  %671 = vst [vmem:[#allocation2 + $0x8] sm:$0xf] %v639_v35 }
  0xd9   : > { %672 = vst [vmem:[#allocation2 + $0xc] sm:$0xff] %v640_v40  ;;  %1276 = vmatpush.bf16.msra.mxu3 %v3644_v8 }
  0xda   : > { %v600_v44 = vpop.f32.mrf.mxu2 }
  0xdb   : > { %v505_v42 = vpop.f32.mrf.mxu0  ;;  %v601_v49 = vadd.f32 %v600_v44, %v3780_v20 }
  0xdc   : > { %v506_v47 = vadd.f32 %v505_v42, %v3764_v6  ;;  %v554_v52 = vpop.f32.mrf.mxu1 }
  0xdd   : > { %v555_v53 = vadd.f32 %v554_v52, %v3772_v7  ;;  %v641_v56 = vpack.c.bf16 %v601_v49, %v601_v49  ;;  %1277 = vmatpush.bf16.msra.mxu3 %v3655_v14 }
  0xdf   : > { %v642_v60 = vpack.c.bf16 %v555_v53, %v506_v47  ;;  %673 = vst [vmem:[#allocation2 + $0x14] sm:$0xf] %v641_v56 }
  0xe1   : > { %674 = vst [vmem:[#allocation2 + $0x18] sm:$0xff] %v642_v60 }
  0xe2   : > { %v603_v2 = vpop.f32.mrf.mxu2 }
  0xe3   : > { %v507_v63 = vpop.f32.mrf.mxu0  ;;  %v604_v4 = vadd.f32 %v603_v2, %v3780_v20 }
  0xe4   : > { %v508_v3 = vadd.f32 %v507_v63, %v3764_v6  ;;  %v556_v5 = vpop.f32.mrf.mxu1 }
  0xe5   : > { %v557_v11 = vadd.f32 %v556_v5, %v3772_v7  ;;  %v643_v12 = vpack.c.bf16 %v604_v4, %v604_v4 }
  0xe7   : > { %v644_v13 = vpack.c.bf16 %v557_v11, %v508_v3  ;;  %675 = vst [vmem:[#allocation2 + $0x20] sm:$0xf] %v643_v12 }
  0xe9   : > { %676 = vst [vmem:[#allocation2 + $0x24] sm:$0xff] %v644_v13 }
  0xea   : > { %v605_v16 = vpop.f32.mrf.mxu2 }
  0xeb   : > { %v510_v15 = vpop.f32.mrf.mxu0  ;;  %v606_v19 = vadd.f32 %v605_v16, %v3780_v20 }
  0xec   : > { %v511_v17 = vadd.f32 %v510_v15, %v3764_v6  ;;  %v559_v21 = vpop.f32.mrf.mxu1 }
  0xed   : > { %v560_v24 = vadd.f32 %v559_v21, %v3772_v7  ;;  %v645_v26 = vpack.c.bf16 %v606_v19, %v606_v19 }
  0xef   : > { %v646_v27 = vpack.c.bf16 %v560_v24, %v511_v17  ;;  %677 = vst [vmem:[#allocation2 + $0x2c] sm:$0xf] %v645_v26 }
  0xf1   : > { %678 = vst [vmem:[#allocation2 + $0x30] sm:$0xff] %v646_v27 }
  0xf2   : > { %v608_v30 = vpop.f32.mrf.mxu2 }
  0xf3   : > { %v512_v29 = vpop.f32.mrf.mxu0  ;;  %v609_v34 = vadd.f32 %v608_v30, %v3780_v20 }
  0xf4   : > { %v513_v33 = vadd.f32 %v512_v29, %v3764_v6  ;;  %v561_v35 = vpop.f32.mrf.mxu1 }
  0xf5   : > { %v562_v39 = vadd.f32 %v561_v35, %v3772_v7  ;;  %v647_v40 = vpack.c.bf16 %v609_v34, %v609_v34 }
  0xf7   : > { %v648_v42 = vpack.c.bf16 %v562_v39, %v513_v33  ;;  %679 = vst [vmem:[#allocation2 + $0x38] sm:$0xf] %v647_v40 }
  0xf9   : > { %680 = vst [vmem:[#allocation2 + $0x3c] sm:$0xff] %v648_v42 }
  0xfa   : > { %v610_v44 = vpop.f32.mrf.mxu2 }
  0xfb   : > { %v515_v43 = vpop.f32.mrf.mxu0  ;;  %v611_v49 = vadd.f32 %v610_v44, %v3780_v20 }
  0xfc   : > { %v516_v47 = vadd.f32 %v515_v43, %v3764_v6  ;;  %v564_v52 = vpop.f32.mrf.mxu1 }
  0xfd   : > { %v565_v53 = vadd.f32 %v564_v52, %v3772_v7  ;;  %v649_v55 = vpack.c.bf16 %v611_v49, %v611_v49 }
  0xff   : > { %v650_v56 = vpack.c.bf16 %v565_v53, %v516_v47  ;;  %681 = vst [vmem:[#allocation2 + $0x44] sm:$0xf] %v649_v55 }
 0x101   : > { %682 = vst [vmem:[#allocation2 + $0x48] sm:$0xff] %v650_v56 }
 0x102   : > { %v613_v60 = vpop.f32.mrf.mxu2 }
 0x103   : > { %v517_v58 = vpop.f32.mrf.mxu0  ;;  %v614_v63 = vadd.f32 %v613_v60, %v3780_v20 }
 0x104   : > { %v518_v62 = vadd.f32 %v517_v58, %v3764_v6  ;;  %v566_v0 = vpop.f32.mrf.mxu1 }
 0x105   : > { %v567_v2 = vadd.f32 %v566_v0, %v3772_v7  ;;  %v651_v3 = vpack.c.bf16 %v614_v63, %v614_v63 }
 0x107   : > { %v652_v4 = vpack.c.bf16 %v567_v2, %v518_v62  ;;  %683 = vst [vmem:[#allocation2 + $0x50] sm:$0xf] %v651_v3 }
 0x109   : > { %684 = vst [vmem:[#allocation2 + $0x54] sm:$0xff] %v652_v4 }
 0x10a   : > { %v615_v10 = vpop.f32.mrf.mxu2 }
 0x10b   : > { %v520_v5 = vpop.f32.mrf.mxu0  ;;  %v616_v12 = vadd.f32 %v615_v10, %v3780_v20 }
 0x10c   : > { %v521_v11 = vadd.f32 %v520_v5, %v3764_v6  ;;  %v569_v13 = vpop.f32.mrf.mxu1 }
 0x10d   : > { %v570_v15 = vadd.f32 %v569_v13, %v3772_v7  ;;  %v653_v16 = vpack.c.bf16 %v616_v12, %v616_v12 }
 0x10f   : > { %v654_v17 = vpack.c.bf16 %v570_v15, %v521_v11  ;;  %685 = vst [vmem:[#allocation2 + $0x5c] sm:$0xf] %v653_v16 }
 0x111   : > { %686 = vst [vmem:[#allocation2 + $0x60] sm:$0xff] %v654_v17 }
 0x112   : > { %v618_v21 = vpop.f32.mrf.mxu2 }
 0x113   : > { %v522_v19 = vpop.f32.mrf.mxu0  ;;  %v619_v26 = vadd.f32 %v618_v21, %v3780_v20 }
 0x114   : > { %v523_v24 = vadd.f32 %v522_v19, %v3764_v6  ;;  %v571_v27 = vpop.f32.mrf.mxu1  ;;  %v874_v19 = vpop.f32.mrf.mxu3 }
 0x115   : > { %v572_v29 = vadd.f32 %v571_v27, %v3772_v7  ;;  %v655_v30 = vpack.c.bf16 %v619_v26, %v619_v26 }
 0x117   : > { %v656_v33 = vpack.c.bf16 %v572_v29, %v523_v24  ;;  %687 = vst [vmem:[#allocation2 + $0x68] sm:$0xf] %v655_v30 }
 0x119   : > { %688 = vst [vmem:[#allocation2 + $0x6c] sm:$0xff] %v656_v33 }
 0x11a   : > { %v620_v35 = vpop.f32.mrf.mxu2 }
 0x11b   : > { %v525_v34 = vpop.f32.mrf.mxu0  ;;  %v621_v40 = vadd.f32 %v620_v35, %v3780_v20 }
 0x11c   : > { %v526_v39 = vadd.f32 %v525_v34, %v3764_v6  ;;  %v574_v42 = vpop.f32.mrf.mxu1 }
 0x11d   : > { %v575_v43 = vadd.f32 %v574_v42, %v3772_v7  ;;  %v657_v44 = vpack.c.bf16 %v621_v40, %v621_v40  ;;  %v876_v40 = vpop.f32.mrf.mxu3 }
 0x11f   : > { %v658_v47 = vpack.c.bf16 %v575_v43, %v526_v39  ;;  %689 = vst [vmem:[#allocation2 + $0x74] sm:$0xf] %v657_v44 }
 0x121   : > { %690 = vst [vmem:[#allocation2 + $0x78] sm:$0xff] %v658_v47 }
 0x122   : > { %v623_v52 = vpop.f32.mrf.mxu2 }
 0x123   : > { %v527_v49 = vpop.f32.mrf.mxu0  ;;  %v624_v55 = vadd.f32 %v623_v52, %v3780_v20 }
 0x124   : > { %v528_v53 = vadd.f32 %v527_v49, %v3764_v6  ;;  %v576_v56 = vpop.f32.mrf.mxu1 }
 0x125   : > { %v577_v58 = vadd.f32 %v576_v56, %v3772_v7  ;;  %v659_v60 = vpack.c.bf16 %v624_v55, %v624_v55 }
 0x127   : > { %v660_v62 = vpack.c.bf16 %v577_v58, %v528_v53  ;;  %691 = vst [vmem:[#allocation2 + $0x80] sm:$0xf] %v659_v60  ;;  %v888_v58 = vpop.f32.mrf.mxu3 }
 0x129   : > { %692 = vst [vmem:[#allocation2 + $0x84] sm:$0xff] %v660_v62 }
 0x12a   : > { %v625_v0 = vpop.f32.mrf.mxu2 }
 0x12b   : > { %v530_v63 = vpop.f32.mrf.mxu0  ;;  %v626_v3 = vadd.f32 %v625_v0, %v3780_v20 }
 0x12c   : > { %v531_v2 = vadd.f32 %v530_v63, %v3764_v6  ;;  %v579_v4 = vpop.f32.mrf.mxu1 }
 0x12d   : > { %v580_v5 = vadd.f32 %v579_v4, %v3772_v7  ;;  %v661_v10 = vpack.c.bf16 %v626_v3, %v626_v3 }
 0x12f   : > { %v662_v11 = vpack.c.bf16 %v580_v5, %v531_v2  ;;  %693 = vst [vmem:[#allocation2 + $0x8c] sm:$0xf] %v661_v10 }
 0x131   : > { %694 = vst [vmem:[#allocation2 + $0x90] sm:$0xff] %v662_v11 }
 0x132   : > { %v628_v13 = vpop.f32.mrf.mxu2 }
 0x133   : > { %v532_v12 = vpop.f32.mrf.mxu0  ;;  %v629_v16 = vadd.f32 %v628_v13, %v3780_v20 }
 0x134   : > { %v533_v15 = vadd.f32 %v532_v12, %v3764_v6  ;;  %v581_v17 = vpop.f32.mrf.mxu1 }
 0x135   : > { %v582_v21 = vadd.f32 %v581_v17, %v3772_v7  ;;  %v663_v24 = vpack.c.bf16 %v629_v16, %v629_v16 }
 0x137   : > { %v664_v26 = vpack.c.bf16 %v582_v21, %v533_v15  ;;  %695 = vst [vmem:[#allocation2 + $0x98] sm:$0xf] %v663_v24  ;;  %v890_v15 = vpop.f32.mrf.mxu3 }
 0x139   : > { %696 = vst [vmem:[#allocation2 + $0x9c] sm:$0xff] %v664_v26 }
 0x13a   : > { %v630_v29 = vpop.f32.mrf.mxu2 }
 0x13b   : > { %v535_v27 = vpop.f32.mrf.mxu0  ;;  %v631_v33 = vadd.f32 %v630_v29, %v3780_v20 }
 0x13c   : > { %v536_v30 = vadd.f32 %v535_v27, %v3764_v6  ;;  %v584_v34 = vpop.f32.mrf.mxu1 }
 0x13d   : > { %v585_v35 = vadd.f32 %v584_v34, %v3772_v7  ;;  %v665_v39 = vpack.c.bf16 %v631_v33, %v631_v33 }
 0x13f   : > { %v666_v42 = vpack.c.bf16 %v585_v35, %v536_v30  ;;  %697 = vst [vmem:[#allocation2 + $0xa4] sm:$0xf] %v665_v39 }
 0x141   : > { %698 = vst [vmem:[#allocation2 + $0xa8] sm:$0xff] %v666_v42 }
 0x142   : > { %v633_v44 = vpop.f32.mrf.mxu2 }
 0x143   : > { %v537_v43 = vpop.f32.mrf.mxu0  ;;  %v634_v49 = vadd.f32 %v633_v44, %v3780_v20 }
 0x144   : > { %v538_v47 = vadd.f32 %v537_v43, %v3764_v6  ;;  %v586_v52 = vpop.f32.mrf.mxu1  ;;  %v3859_v43 = vld [vmem:[%s3435_s17] ss:$0 sm:$0xff] }
 0x145   : > { %v587_v53 = vadd.f32 %v586_v52, %v3772_v7  ;;  %v667_v55 = vpack.c.bf16 %v634_v49, %v634_v49 }
 0x147   : > { %v668_v56 = vpack.c.bf16 %v587_v53, %v538_v47  ;;  %699 = vst [vmem:[#allocation2 + $0xb0] sm:$0xf] %v667_v55  ;;  %v902_v53 = vpop.f32.mrf.mxu3 }
 0x14a   : > { %v635_v0 = vpop.f32.mrf.mxu2 }
 0x14b   : > { %v636_v3 = vadd.f32 %v635_v0, %v3780_v20 }
 0x14d   : > { %v669_v7 = vpack.c.bf16 %v636_v3, %v636_v3 }
 0x14e   : > { %v910_v60 = vld [vmem:[%s3851_s27] sm:$0xff] }
 0x14f   : > { %700 = vst [vmem:[#allocation2 + $0xb4] sm:$0xff] %v668_v56  ;;  %v914_v62 = vunpack.c.l.bf16 %v910_v60  ;;  %v958_v63 = vrot.slane %v910_v60, 4 }
 0x150   : > { %701 = vst [vmem:[#allocation2 + $0xbc] sm:$0xf] %v669_v7 }
 0x151   : > { %v916_v2 = vadd.f32 %v914_v62, %v874_v19  ;;  %v962_v6 = vunpack.c.l.bf16 %v958_v63  ;;  %v1007_v62 = vadd.f32 %v3859_v43, %v902_v53 }
 0x153   : > { %v2830_v4 = vmul.f32 -1.442695, %v916_v2  ;;  %v964_v5 = vadd.f32 %v962_v6, %v888_v58 }
 0x155   : > { %2998 = vpow2.f32 %v2830_v4  ;;  %v2832_v10 = vmul.f32 -1.442695, %v964_v5 }
 0x157   : > { %v912_v11 = vld [vmem:[%s3851_s27 + $0xc] sm:$0xff]  ;;  %3000 = vpow2.f32 %v2832_v10  ;;  %v911_v0 = vld [vmem:[%s3851_s27 + $0x8] sm:$0xf] }
 0x158   : > { %v915_v12 = vunpack.c.l.bf16 %v912_v11  ;;  %v959_v13 = vrot.slane %v912_v11, 4 }
 0x15a   : > { %v917_v16 = vadd.f32 %v915_v12, %v876_v40  ;;  %v963_v17 = vunpack.c.l.bf16 %v959_v13  ;;  %v1011_v13 = vunpack.c.l.bf16 %v911_v0 }
 0x15b   : > { %v2999_v21 = vpop.eup %2998 }
 0x15c   : > { %v2831_v24 = vmul.f32 -1.442695, %v917_v16  ;;  %v965_v26 = vadd.f32 %v963_v17, %v890_v15  ;;  %v924_v19 = vadd.f32 1.0, %v2999_v21 }
 0x15d   : > { %v3001_v27 = vpop.eup %3000 }
 0x15e   : > { %3002 = vpow2.f32 %v2831_v24  ;;  %v2833_v20 = vmul.f32 -1.442695, %v965_v26  ;;  %v972_v29 = vadd.f32 1.0, %v3001_v27  ;;  %v937_v49 = vand.u32 2147483648, %v924_v19 }
 0x15f   : > { %3004 = vrcp.f32 %v924_v19  ;;  %v935_v56 = vand.u32 2147483647, %v924_v19  ;;  %vm931_vm2 = vweird.f32 %v924_v19 }
 0x160   : > { %3006 = vpow2.f32 %v2833_v20  ;;  %v938_v2 = vor.u32 1.1754944e-38, %v937_v49  ;;  %v985_v10 = vand.u32 2147483648, %v972_v29  ;;  %vm979_vm6 = vweird.f32 %v972_v29 }
 0x161   : > { %3008 = vrcp.f32 %v972_v29  ;;  %vm936_vm4 = vcmp.eq.f32.partialorder %v935_v56, 8.507059e+37  ;;  %v983_v15 = vand.u32 2147483647, %v972_v29 }
 0x163   : > { %vm984_vm9 = vcmp.eq.f32.partialorder %v983_v15, 8.507059e+37 }
 0x164   : > { %v3003_v30 = vpop.eup %3002 }
 0x165   : > { %v3005_v33 = vpop.eup %3004  ;;  %v925_v34 = vadd.f32 1.0, %v3003_v30  ;;  %v986_v30 = vor.u32 1.1754944e-38, %v985_v10 }
 0x166   : > { %v3007_v35 = vpop.eup %3006  ;;  %v927_v39 = vmul.f32 %v3005_v33, %v924_v19  ;;  %vm932_vm1 = vweird.f32 %v3005_v33 }
 0x167   : > { %v3009_v42 = vpop.eup %3008  ;;  %3010 = vrcp.f32 %v925_v34  ;;  %v3856_v40 = vadd.f32 1.0, %v3007_v35  ;;  %vm933_vm3 = vmor %vm931_vm2, %vm932_vm1  ;;  %v952_v26 = vand.u32 2147483648, %v925_v34  ;;  %v950_v20 = vand.u32 2147483647, %v925_v34  ;;  %v904_v35 = vpop.f32.mrf.mxu3 }
 0x168   : > { %v975_v44 = vmul.f32 %v3009_v42, %v972_v29  ;;  %v928_v47 = vsub.f32 1.0, %v927_v39  ;;  %vm980_vm5 = vweird.f32 %v3009_v42  ;;  %vm946_vm10 = vweird.f32 %v925_v34 }
 0x169   : > { %3012 = vrcp.f32 %v3856_v40  ;;  %vm3865_vm7 = vmor %vm979_vm6, %vm980_vm5  ;;  %vm951_vm12 = vcmp.eq.f32.partialorder %v950_v20, 8.507059e+37  ;;  %vm994_vm14 = vweird.f32 %v3856_v40 }
 0x16a   : > { %v976_v52 = vsub.f32 1.0, %v975_v44  ;;  %v929_v55 = vmul.f32 %v3005_v33, %v928_v47  ;;  %v913_v44 = vld [vmem:[%s3851_s27 + $0x14] sm:$0xf]  ;;  %v953_v47 = vor.u32 1.1754944e-38, %v952_v26  ;;  %s2437_s27 = scalar_lea.hbm %s4310_s6, %s2931_s30 }
 0x16b   : > { %s2440_s21 = sshll.u32 %s2437_s27, 4  ;;  %s2441_s21 = int_to_ptr.hbm [resolvable:$true] %s2440_s21 }
 0x16c   : > { %v977_v58 = vmul.f32 %v3009_v42, %v976_v52  ;;  %v930_v60 = vadd.f32 %v3005_v33, %v929_v55  ;;  %v1008_v52 = vadd.f32 %v3859_v43, %v904_v35  ;;  %v1000_v55 = vand.u32 2147483648, %v3856_v40 }
 0x16d   : > { %v3011_v63 = vpop.eup %3010 }
 0x16e   : > { %v934_v6 = vsel %vm933_vm3, %v3005_v33, %v930_v60  ;;  %v942_v3 = vmul.f32 %v3011_v63, %v925_v34  ;;  %v978_v5 = vadd.f32 %v3009_v42, %v977_v58  ;;  %vm947_vm8 = vweird.f32 %v3011_v63 }
 0x16f   : > { %v3013_v4 = vpop.eup %3012  ;;  %v939_v7 = vsel %vm936_vm4, %v938_v2, %v934_v6  ;;  %vm948_vm11 = vmor %vm946_vm10, %vm947_vm8  ;;  %v1012_v60 = vunpack.c.l.bf16 %v913_v44  ;;  %v998_v34 = vand.u32 2147483647, %v3856_v40  ;;  %v1109_v44 = vld [vmem:[%s3910_s7 + $0xc] sm:$0xff] }
 0x170   : > { %v990_v11 = vmul.f32 %v3013_v4, %v3856_v40  ;;  %v1009_v12 = vmul.f32 %v1007_v62, %v939_v7  ;;  %v943_v16 = vsub.f32 1.0, %v942_v3  ;;  %v982_v19 = vsel %vm3865_vm7, %v3009_v42, %v978_v5  ;;  %v1032_v3 = vpop.permute.xlu0 %1031  ;;  %v1049_v5 = vpop.permute.xlu1 %1048 }
 0x171   : > { %v987_v39 = vsel %vm984_vm9, %v986_v30, %v982_v19  ;;  %vm995_vm13 = vweird.f32 %v3013_v4  ;;  %v1001_v7 = vor.u32 1.1754944e-38, %v1000_v55  ;;  %vm999_vm0 = vcmp.eq.f32.partialorder %v998_v34, 8.507059e+37 }
 0x172   : > { %v991_v21 = vsub.f32 1.0, %v990_v11  ;;  %v1013_v24 = vadd.f32 %v1011_v13, %v1009_v12  ;;  %v944_v27 = vmul.f32 %v3011_v63, %v943_v16  ;;  %v1017_v56 = vsub.f32 1.0, %v987_v39  ;;  %vm996_vm15 = vmor %vm994_vm14, %vm995_vm13 }
 0x173   : > { %v1021_v0 = vmul.f32 0.0, %v987_v39  ;;  %v1056_v17 = vmul.f32 0.0, %v1049_v5 }
 0x174   : > { %v992_v33 = vmul.f32 %v3013_v4, %v991_v21  ;;  %3014 = vtanh.f32 %v1013_v24  ;;  %v945_v29 = vadd.f32 %v3011_v63, %v944_v27 }
 0x176   : > { %v949_v49 = vsel %vm948_vm11, %v3011_v63, %v945_v29  ;;  %v993_v53 = vadd.f32 %v3013_v4, %v992_v33  ;;  %v1107_v33 = vld [vmem:[%s3910_s7] sm:$0xff] }
 0x177   : > { %v954_v42 = vsel %vm951_vm12, %v953_v47, %v949_v49  ;;  %v1155_v35 = vrot.slane %v1107_v33, 4 }
 0x178   : > { %v1010_v58 = vmul.f32 %v1008_v52, %v954_v42  ;;  %v997_v6 = vsel %vm996_vm15, %v3013_v4, %v993_v53  ;;  %v1037_v24 = vpop.permute.xlu0 %1036  ;;  %v1054_v26 = vpop.permute.xlu1 %1053  ;;  %v1156_v52 = vrot.slane %v1109_v44, 4  ;;  %v1111_v53 = vunpack.c.l.bf16 %v1107_v33 }
 0x179   : > { %v1002_v11 = vsel %vm999_vm0, %v1001_v7, %v997_v6  ;;  %v1057_v4 = vmul.f32 0.0, %v1054_v26  ;;  %v1159_v29 = vunpack.c.l.bf16 %v1155_v35 }
 0x17a   : > { %v3015_v62 = vpop.eup %3014  ;;  %v1014_v2 = vadd.f32 %v1012_v60, %v1010_v58  ;;  %v1018_v13 = vsub.f32 1.0, %v1002_v11  ;;  %v1022_v40 = vmul.f32 0.0, %v1002_v11 }
 0x17b   : > { %v1019_v63 = vmul.f32 %v3015_v62, %v1017_v56  ;;  %v1160_v56 = vunpack.c.l.bf16 %v1156_v52 }
 0x17c   : > { %3016 = vtanh.f32 %v1014_v2  ;;  %v1112_v2 = vunpack.c.l.bf16 %v1109_v44 }
 0x17d   : > { %v1023_v10 = vadd.f32 %v1021_v0, %v1019_v63 }
 0x17f   : > { %v1039_v12 = vmul.f32 %v1032_v3, %v1023_v10 }
 0x181   : > { %1042 = vst [vmem:[%s1041_s20] sm:$0xff] %v1039_v12  ;;  %v3879_v27 = vadd.f32 %v1056_v17, %v1039_v12 }
 0x182   : > { %v3017_v15 = vpop.eup %3016 }
 0x183   : > { %v1020_v16 = vmul.f32 %v3017_v15, %v1018_v13 }
 0x185   : > { %v1024_v21 = vadd.f32 %v1022_v40, %v1020_v16 }
 0x187   : > { %v1040_v19 = vmul.f32 %v1037_v24, %v1024_v21 }
 0x189   : > { %1043 = vst [vmem:[%s1041_s20 + $0x8] sm:$0xff] %v1040_v19  ;;  %v3881_v20 = vadd.f32 %v1057_v4, %v1040_v19 }
 0x18b   : > { %v1061_v30 = vpack.c.bf16 %v3881_v20, %v3879_v27 }
 0x18d   : > { %1070 = vmatmul.bf16.vlgmr.msrb.gmra.mxu3 %v1061_v30  ;;  %1084 = vmatmul.bf16.vlgmr.msrb.gmra.mxu0 %v1061_v30 }
 0x18e   : > { %1098 = vmatmul.bf16.vlgmr.msrb.gmra.mxu1 %v1061_v30  ;;  %1478 = vmatpush.bf16.msrb.mxu3 %v3646_v9 }
 0x18f   : > { %1644 = vmatpush.bf16.msrb.mxu0 %v3490_v23  ;;  %1658 = vmatpush.bf16.msrb.mxu1 %v3574_v48 }
 0x192   : > { %1479 = vmatpush.bf16.msrb.mxu3 %v3674_v18 }
 0x193   : > { %1645 = vmatpush.bf16.msrb.mxu0 %v3499_v25  ;;  %1659 = vmatpush.bf16.msrb.mxu1 %v3583_v51 }
 0x196   : > { %1480 = vmatpush.bf16.msrb.mxu3 %v3682_v22 }
 0x197   : > { %1646 = vmatpush.bf16.msrb.mxu0 %v3505_v28  ;;  %1660 = vmatpush.bf16.msrb.mxu1 %v3596_v54 }
 0x19a   : > { %1481 = vmatpush.bf16.msrb.mxu3 %v3691_v31 }
 0x19b   : > { %1647 = vmatpush.bf16.msrb.mxu0 %v3514_v32  ;;  %1661 = vmatpush.bf16.msrb.mxu1 %v3607_v57 }
 0x19e   : > { %1482 = vmatpush.bf16.msrb.mxu3 %v3707_v37 }
 0x19f   : > { %1648 = vmatpush.bf16.msrb.mxu0 %v3529_v36  ;;  %1662 = vmatpush.bf16.msrb.mxu1 %v3624_v61 }
 0x1a2   : > { %1483 = vmatpush.bf16.msrb.mxu3 %v3715_v46 }
 0x1a3   : > { %1649 = vmatpush.bf16.msrb.mxu0 %v3539_v38  ;;  %1663 = vmatpush.bf16.msrb.mxu1 %v3633_v1 }
 0x1a6   : > { %1484 = vmatpush.bf16.msrb.mxu3 %v3728_v50 }
 0x1a7   : > { %1650 = vmatpush.bf16.msrb.mxu0 %v3549_v41  ;;  %1664 = vmatpush.bf16.msrb.mxu1 %v3644_v8 }
 0x1aa   : > { %1485 = vmatpush.bf16.msrb.mxu3 %v3735_v59 }
 0x1ab   : > { %1651 = vmatpush.bf16.msrb.mxu0 %v3564_v45  ;;  %1665 = vmatpush.bf16.msrb.mxu1 %v3655_v14 }
 0x20a   : > { %v1085_v39 = vpop.f32.mrf.mxu0 }
 0x20b   : > { %v1161_v47 = vadd.f32 %v1159_v29, %v1085_v39  ;;  %v1099_v19 = vpop.f32.mrf.mxu1 }
 0x20d   : > { %v2838_v49 = vmul.f32 -1.442695, %v1161_v47 }
 0x20f   : > { %3018 = vpow2.f32 %v2838_v49  ;;  %v1108_v49 = vld [vmem:[%s3910_s7 + $0x8] sm:$0xf] }
 0x210   : > { %v1071_v42 = vpop.f32.mrf.mxu3 }
 0x211   : > { %v1113_v55 = vadd.f32 %v1111_v53, %v1071_v42  ;;  %v1201_v53 = vadd.f32 %v3859_v43, %v1099_v19 }
 0x212   : > { %v1087_v58 = vpop.f32.mrf.mxu0 }
 0x213   : > { %v2836_v60 = vmul.f32 -1.442695, %v1113_v55  ;;  %v1162_v62 = vadd.f32 %v1160_v56, %v1087_v58 }
 0x215   : > { %v3019_v34 = vpop.eup %3018  ;;  %3020 = vpow2.f32 %v2836_v60  ;;  %v2839_v63 = vmul.f32 -1.442695, %v1162_v62 }
 0x216   : > { %v3914_v0 = vadd.f32 1.0, %v3019_v34  ;;  %v1205_v34 = vunpack.c.l.bf16 %v1108_v49 }
 0x217   : > { %3022 = vpow2.f32 %v2839_v63 }
 0x218   : > { %v1073_v6 = vpop.f32.mrf.mxu3  ;;  %3024 = vrcp.f32 %v3914_v0  ;;  %v1182_v62 = vand.u32 2147483648, %v3914_v0  ;;  %vm1176_vm6 = vweird.f32 %v3914_v0 }
 0x219   : > { %v1114_v3 = vadd.f32 %v1112_v2, %v1073_v6  ;;  %v1180_v6 = vand.u32 2147483647, %v3914_v0 }
 0x21b   : > { %v3021_v5 = vpop.eup %3020  ;;  %v2837_v7 = vmul.f32 -1.442695, %v1114_v3  ;;  %vm1181_vm10 = vcmp.eq.f32.partialorder %v1180_v6, 8.507059e+37 }
 0x21c   : > { %v1121_v10 = vadd.f32 1.0, %v3021_v5 }
 0x21d   : > { %v3023_v11 = vpop.eup %3022  ;;  %3026 = vpow2.f32 %v2837_v7 }
 0x21e   : > { %3028 = vrcp.f32 %v1121_v10  ;;  %v3025_v12 = vpop.eup %3024  ;;  %v3917_v13 = vadd.f32 1.0, %v3023_v11  ;;  %v1134_v30 = vand.u32 2147483648, %v1121_v10  ;;  %v1132_v35 = vand.u32 2147483647, %v1121_v10 }
 0x21f   : > { %v1172_v15 = vmul.f32 %v3025_v12, %v3914_v0  ;;  %vm1128_vm2 = vweird.f32 %v1121_v10  ;;  %vm1177_vm5 = vweird.f32 %v3025_v12  ;;  %v1110_v0 = vld [vmem:[%s3910_s7 + $0x14] sm:$0xf]  ;;  %s4369_s7 = sld [smem:[#allocation23_spill]] }
 0x220   : > { %3030 = vrcp.f32 %v3917_v13  ;;  %v1135_v52 = vor.u32 1.1754944e-38, %v1134_v30  ;;  %vm1133_vm4 = vcmp.eq.f32.partialorder %v1132_v35, 8.507059e+37  ;;  %vm3930_vm7 = vmor %vm1176_vm6, %vm1177_vm5  ;;  %vm1191_vm14 = vweird.f32 %v3917_v13 }
 0x221   : > { %v1173_v24 = vsub.f32 1.0, %v1172_v15 }
 0x223   : > { %v3027_v16 = vpop.eup %3026  ;;  %v1174_v29 = vmul.f32 %v3025_v12, %v1173_v24 }
 0x224   : > { %v3029_v40 = vpop.eup %3028  ;;  %v1122_v17 = vadd.f32 1.0, %v3027_v16  ;;  %v1101_v16 = vpop.f32.mrf.mxu1 }
 0x225   : > { %v1124_v21 = vmul.f32 %v3029_v40, %v1121_v10  ;;  %vm1129_vm1 = vweird.f32 %v3029_v40  ;;  %v1175_v56 = vadd.f32 %v3025_v12, %v1174_v29  ;;  %v1202_v19 = vadd.f32 %v3859_v43, %v1101_v16 }
 0x226   : > { %3032 = vrcp.f32 %v1122_v17  ;;  %v3921_v26 = vpop.eup %3030  ;;  %vm1130_vm3 = vmor %vm1128_vm2, %vm1129_vm1  ;;  %v1149_v3 = vand.u32 2147483648, %v1122_v17  ;;  %v1147_v11 = vand.u32 2147483647, %v1122_v17  ;;  %vm1143_vm9 = vweird.f32 %v1122_v17 }
 0x227   : > { %v1125_v4 = vsub.f32 1.0, %v1124_v21  ;;  %v1187_v39 = vmul.f32 %v3921_v26, %v3917_v13  ;;  %v1183_v21 = vor.u32 1.1754944e-38, %v1182_v62  ;;  %vm1192_vm13 = vweird.f32 %v3921_v26 }
 0x228   : > { %vm1148_vm12 = vcmp.eq.f32.partialorder %v1147_v11, 8.507059e+37  ;;  %vm1193_vm15 = vmor %vm1191_vm14, %vm1192_vm13 }
 0x229   : > { %v1126_v33 = vmul.f32 %v3029_v40, %v1125_v4  ;;  %v1188_v60 = vsub.f32 1.0, %v1187_v39  ;;  %v1150_v4 = vor.u32 1.1754944e-38, %v1149_v3  ;;  %v1206_v39 = vunpack.c.l.bf16 %v1110_v0  ;;  %v1243_v3 = vpop.permute.xlu0 %1242 }
 0x22a   : > { %v1250_v11 = vmul.f32 %v1243_v3, %v3879_v27 }
 0x22b   : > { %v1127_v44 = vadd.f32 %v3029_v40, %v1126_v33  ;;  %v1189_v15 = vmul.f32 %v3921_v26, %v1188_v60 }
 0x22c   : > { %v3033_v47 = vpop.eup %3032 }
 0x22d   : > { %v1131_v42 = vsel %vm1130_vm3, %v3029_v40, %v1127_v44  ;;  %v1139_v55 = vmul.f32 %v3033_v47, %v1122_v17  ;;  %vm1144_vm8 = vweird.f32 %v3033_v47  ;;  %v1179_v40 = vsel %vm3930_vm7, %v3025_v12, %v1175_v56  ;;  %v1226_v56 = vpop.permute.xlu2 %1225 }
 0x22e   : > { %v1136_v58 = vsel %vm1133_vm4, %v1135_v52, %v1131_v42  ;;  %vm1145_vm11 = vmor %vm1143_vm9, %vm1144_vm8  ;;  %v1184_v33 = vsel %vm1181_vm10, %v1183_v21, %v1179_v40  ;;  %v1190_v35 = vadd.f32 %v3921_v26, %v1189_v15  ;;  %v1197_v12 = vand.u32 2147483648, %v3917_v13 }
 0x22f   : > { %v1203_v63 = vmul.f32 %v1201_v53, %v1136_v58  ;;  %v1140_v2 = vsub.f32 1.0, %v1139_v55  ;;  %v1195_v17 = vand.u32 2147483647, %v3917_v13  ;;  %v1211_v49 = vsub.f32 1.0, %v1184_v33 }
 0x230   : > { %v1194_v53 = vsel %vm1193_vm15, %v3921_v26, %v1190_v35  ;;  %v1215_v55 = vmul.f32 %v1184_v33, %v3879_v27  ;;  %v1198_v58 = vor.u32 1.1754944e-38, %v1197_v12  ;;  %v1248_v26 = vpop.permute.xlu1 %1247 }
 0x231   : > { %v1207_v7 = vadd.f32 %v1205_v34, %v1203_v63  ;;  %v1141_v10 = vmul.f32 %v3033_v47, %v1140_v2  ;;  %vm1196_vm0 = vcmp.eq.f32.partialorder %v1195_v17, 8.507059e+37  ;;  %v1251_v15 = vmul.f32 %v1248_v26, %v3881_v20 }
 0x232   : > { %v1199_v62 = vsel %vm1196_vm0, %v1198_v58, %v1194_v53 }
 0x233   : > { %v1142_v24 = vadd.f32 %v3033_v47, %v1141_v10  ;;  %3034 = vtanh.f32 %v1207_v7  ;;  %v1212_v63 = vsub.f32 1.0, %v1199_v62  ;;  %v1216_v6 = vmul.f32 %v1199_v62, %v3881_v20 }
 0x235   : > { %v1146_v30 = vsel %vm1145_vm11, %v3033_v47, %v1142_v24  ;;  %v1231_v7 = vpop.permute.xlu2 %1230 }
 0x236   : > { %v1151_v29 = vsel %vm1148_vm12, %v1150_v4, %v1146_v30 }
 0x237   : > { %v1204_v44 = vmul.f32 %v1202_v19, %v1151_v29 }
 0x239   : > { %v3035_v52 = vpop.eup %3034  ;;  %v1208_v47 = vadd.f32 %v1206_v39, %v1204_v44 }
 0x23a   : > { %v1213_v42 = vmul.f32 %v3035_v52, %v1211_v49 }
 0x23b   : > { %3036 = vtanh.f32 %v1208_v47 }
 0x23c   : > { %v1217_v60 = vadd.f32 %v1215_v55, %v1213_v42 }
 0x23e   : > { %v1233_v34 = vmul.f32 %v1226_v56, %v1217_v60 }
 0x240   : > { %1236 = vst [vmem:[%s3456_s23] sm:$0xff] %v1233_v34  ;;  %v3951_v16 = vadd.f32 %v1250_v11, %v1233_v34 }
 0x241   : > { %v3037_v13 = vpop.eup %3036 }
 0x242   : > { %v1214_v2 = vmul.f32 %v3037_v13, %v1212_v63 }
 0x244   : > { %v1218_v5 = vadd.f32 %v1216_v6, %v1214_v2 }
 0x246   : > { %v1234_v10 = vmul.f32 %v1231_v7, %v1218_v5 }
 0x248   : > { %1237 = vst [vmem:[%s3456_s23 + $0x8] sm:$0xff] %v1234_v10  ;;  %v3953_v40 = vadd.f32 %v1251_v15, %v1234_v10  ;;  %s3982_s23 = scalar_lea.vmem [#allocation2], %s2925_s16 }
 0x249   : > { %v1301_v27 = vld [vmem:[%s3982_s23] sm:$0xff]  ;;  %v1303_v30 = vld [vmem:[%s3982_s23 + $0xc] sm:$0xff] }
 0x24a   : > { %v1255_v21 = vpack.c.bf16 %v3953_v40, %v3951_v16  ;;  %v1349_v20 = vrot.slane %v1301_v27, 4  ;;  %v1305_v24 = vunpack.c.l.bf16 %v1301_v27  ;;  %v1350_v12 = vrot.slane %v1303_v30, 4 }
 0x24b   : > { %v1306_v44 = vunpack.c.l.bf16 %v1303_v30 }
 0x24c   : > { %1264 = vmatmul.bf16.vlgmr.msrb.gmra.mxu2 %v1255_v21  ;;  %1278 = vmatmul.bf16.vlgmr.msra.gmra.mxu3 %v1255_v21  ;;  %v1353_v0 = vunpack.c.l.bf16 %v1349_v20  ;;  %v1354_v17 = vunpack.c.l.bf16 %v1350_v12 }
 0x24d   : > { %1292 = vmatmul.bf16.vlgmr.msra.gmra.mxu0 %v1255_v21  ;;  %1672 = vmatpush.bf16.msrb.mxu2 %v3646_v9 }
 0x24e   : > { %1838 = vmatpush.bf16.msra.mxu3 %v3490_v23  ;;  %1852 = vmatpush.bf16.msra.mxu0 %v3574_v48 }
 0x251   : > { %1673 = vmatpush.bf16.msrb.mxu2 %v3674_v18 }
 0x252   : > { %1839 = vmatpush.bf16.msra.mxu3 %v3499_v25  ;;  %1853 = vmatpush.bf16.msra.mxu0 %v3583_v51 }
 0x255   : > { %1674 = vmatpush.bf16.msrb.mxu2 %v3682_v22 }
 0x256   : > { %1840 = vmatpush.bf16.msra.mxu3 %v3505_v28  ;;  %1854 = vmatpush.bf16.msra.mxu0 %v3596_v54 }
 0x259   : > { %1675 = vmatpush.bf16.msrb.mxu2 %v3691_v31 }
 0x25a   : > { %1841 = vmatpush.bf16.msra.mxu3 %v3514_v32  ;;  %1855 = vmatpush.bf16.msra.mxu0 %v3607_v57 }
 0x25d   : > { %1676 = vmatpush.bf16.msrb.mxu2 %v3707_v37 }
 0x25e   : > { %1842 = vmatpush.bf16.msra.mxu3 %v3529_v36  ;;  %1856 = vmatpush.bf16.msra.mxu0 %v3624_v61 }
 0x261   : > { %1677 = vmatpush.bf16.msrb.mxu2 %v3715_v46 }
 0x262   : > { %1843 = vmatpush.bf16.msra.mxu3 %v3539_v38  ;;  %1857 = vmatpush.bf16.msra.mxu0 %v3633_v1 }
 0x265   : > { %1678 = vmatpush.bf16.msrb.mxu2 %v3728_v50 }
 0x266   : > { %1844 = vmatpush.bf16.msra.mxu3 %v3549_v41  ;;  %1858 = vmatpush.bf16.msra.mxu0 %v3644_v8 }
 0x269   : > { %1679 = vmatpush.bf16.msrb.mxu2 %v3735_v59 }
 0x26a   : > { %1845 = vmatpush.bf16.msra.mxu3 %v3564_v45  ;;  %1859 = vmatpush.bf16.msra.mxu0 %v3655_v14 }
 0x2ca   : > { %v1293_v10 = vpop.f32.mrf.mxu0 }
 0x2cb   : > { %v1395_v30 = vadd.f32 %v3859_v43, %v1293_v10 }
 0x2cf   : > { %v1265_v4 = vpop.f32.mrf.mxu2  ;;  %v1279_v19 = vpop.f32.mrf.mxu3 }
 0x2d0   : > { %v1307_v33 = vadd.f32 %v1305_v24, %v1265_v4  ;;  %v1355_v35 = vadd.f32 %v1353_v0, %v1279_v19  ;;  %v1302_v4 = vld [vmem:[%s3982_s23 + $0x8] sm:$0xf] }
 0x2d2   : > { %v2842_v29 = vmul.f32 -1.442695, %v1307_v33  ;;  %v2844_v39 = vmul.f32 -1.442695, %v1355_v35 }
 0x2d4   : > { %3038 = vpow2.f32 %v2842_v29 }
 0x2d5   : > { %3040 = vpow2.f32 %v2844_v39 }
 0x2d7   : > { %v1267_v49 = vpop.f32.mrf.mxu2  ;;  %v1281_v52 = vpop.f32.mrf.mxu3 }
 0x2d8   : > { %v1308_v47 = vadd.f32 %v1306_v44, %v1267_v49  ;;  %v1356_v53 = vadd.f32 %v1354_v17, %v1281_v52  ;;  %v1399_v17 = vunpack.c.l.bf16 %v1302_v4 }
 0x2da   : > { %v3039_v42 = vpop.eup %3038  ;;  %v2843_v55 = vmul.f32 -1.442695, %v1308_v47  ;;  %v2845_v60 = vmul.f32 -1.442695, %v1356_v53 }
 0x2db   : > { %v3041_v56 = vpop.eup %3040  ;;  %v1315_v58 = vadd.f32 1.0, %v3039_v42 }
 0x2dc   : > { %v1363_v62 = vadd.f32 1.0, %v3041_v56  ;;  %3042 = vpow2.f32 %v2843_v55 }
 0x2dd   : > { %3044 = vrcp.f32 %v1315_v58  ;;  %v1328_v11 = vand.u32 2147483648, %v1315_v58  ;;  %v1326_v27 = vand.u32 2147483647, %v1315_v58  ;;  %vm1322_vm2 = vweird.f32 %v1315_v58 }
 0x2de   : > { %3046 = vrcp.f32 %v1363_v62  ;;  %v1376_v49 = vand.u32 2147483648, %v1363_v62  ;;  %vm1370_vm6 = vweird.f32 %v1363_v62  ;;  %v1374_v47 = vand.u32 2147483647, %v1363_v62 }
 0x2df   : > { %3048 = vpow2.f32 %v2845_v60  ;;  %v1329_v19 = vor.u32 1.1754944e-38, %v1328_v11  ;;  %vm1327_vm4 = vcmp.eq.f32.partialorder %v1326_v27, 8.507059e+37 }
 0x2e0   : > { %vm1375_vm10 = vcmp.eq.f32.partialorder %v1374_v47, 8.507059e+37 }
 0x2e2   : > { %v3043_v34 = vpop.eup %3042 }
 0x2e3   : > { %v3045_v63 = vpop.eup %3044  ;;  %v1316_v13 = vadd.f32 1.0, %v3043_v34 }
 0x2e4   : > { %v3047_v2 = vpop.eup %3046  ;;  %v1318_v6 = vmul.f32 %v3045_v63, %v1315_v58  ;;  %vm1323_vm1 = vweird.f32 %v3045_v63 }
 0x2e5   : > { %v3049_v3 = vpop.eup %3048  ;;  %v1366_v5 = vmul.f32 %v3047_v2, %v1363_v62  ;;  %3050 = vrcp.f32 %v1316_v13  ;;  %vm1324_vm3 = vmor %vm1322_vm2, %vm1323_vm1  ;;  %vm1371_vm5 = vweird.f32 %v3047_v2  ;;  %v1343_v53 = vand.u32 2147483648, %v1316_v13  ;;  %v1304_v62 = vld [vmem:[%s3982_s23 + $0x14] sm:$0xf] }
 0x2e6   : > { %v1319_v26 = vsub.f32 1.0, %v1318_v6  ;;  %v3986_v7 = vadd.f32 1.0, %v3049_v3  ;;  %vm3992_vm7 = vmor %vm1370_vm6, %vm1371_vm5  ;;  %v1341_v60 = vand.u32 2147483647, %v1316_v13  ;;  %v1377_v3 = vor.u32 1.1754944e-38, %v1376_v49 }
 0x2e7   : > { %v1367_v15 = vsub.f32 1.0, %v1366_v5  ;;  %vm1337_vm9 = vweird.f32 %v1316_v13 }
 0x2e8   : > { %v1320_v21 = vmul.f32 %v3045_v63, %v1319_v26  ;;  %3052 = vrcp.f32 %v3986_v7  ;;  %v1344_v26 = vor.u32 1.1754944e-38, %v1343_v53  ;;  %vm1342_vm12 = vcmp.eq.f32.partialorder %v1341_v60, 8.507059e+37 }
 0x2e9   : > { %v1368_v20 = vmul.f32 %v3047_v2, %v1367_v15  ;;  %v1391_v4 = vand.u32 2147483648, %v3986_v7  ;;  %vm1385_vm14 = vweird.f32 %v3986_v7 }
 0x2ea   : > { %v1321_v24 = vadd.f32 %v3045_v63, %v1320_v21 }
 0x2eb   : > { %v3051_v0 = vpop.eup %3050  ;;  %v1369_v39 = vadd.f32 %v3047_v2, %v1368_v20 }
 0x2ec   : > { %v1325_v33 = vsel %vm1324_vm3, %v3045_v63, %v1321_v24  ;;  %v1333_v35 = vmul.f32 %v3051_v0, %v1316_v13  ;;  %vm1338_vm8 = vweird.f32 %v3051_v0  ;;  %v1295_v63 = vpop.f32.mrf.mxu0  ;;  %v1389_v13 = vand.u32 2147483647, %v3986_v7 }
 0x2ed   : > { %v1330_v29 = vsel %vm1327_vm4, %v1329_v19, %v1325_v33  ;;  %v1373_v34 = vsel %vm3992_vm7, %v3047_v2, %v1369_v39  ;;  %vm1339_vm11 = vmor %vm1337_vm9, %vm1338_vm8  ;;  %v1396_v15 = vadd.f32 %v3859_v43, %v1295_v63  ;;  %v1400_v2 = vunpack.c.l.bf16 %v1304_v62  ;;  %v1420_v39 = vpop.permute.xlu2 %1419 }
 0x2ee   : > { %v3053_v12 = vpop.eup %3052  ;;  %v1397_v44 = vmul.f32 %v1395_v30, %v1330_v29  ;;  %v1334_v52 = vsub.f32 1.0, %v1333_v35  ;;  %v1378_v11 = vsel %vm1375_vm10, %v1377_v3, %v1373_v34  ;;  %vm1390_vm0 = vcmp.eq.f32.partialorder %v1389_v13, 8.507059e+37 }
 0x2ef   : > { %v1381_v42 = vmul.f32 %v3053_v12, %v3986_v7  ;;  %vm1386_vm13 = vweird.f32 %v3053_v12  ;;  %v1405_v19 = vsub.f32 1.0, %v1378_v11 }
 0x2f0   : > { %v1401_v55 = vadd.f32 %v1399_v17, %v1397_v44  ;;  %v1335_v58 = vmul.f32 %v3051_v0, %v1334_v52  ;;  %vm1387_vm15 = vmor %vm1385_vm14, %vm1386_vm13  ;;  %v1392_v44 = vor.u32 1.1754944e-38, %v1391_v4 }
 0x2f1   : > { %v1382_v6 = vsub.f32 1.0, %v1381_v42 }
 0x2f2   : > { %3054 = vtanh.f32 %v1401_v55  ;;  %v1336_v5 = vadd.f32 %v3051_v0, %v1335_v58  ;;  %v1425_v55 = vpop.permute.xlu0 %1424 }
 0x2f3   : > { %v1383_v10 = vmul.f32 %v3053_v12, %v1382_v6 }
 0x2f4   : > { %v1340_v21 = vsel %vm1339_vm11, %v3051_v0, %v1336_v5  ;;  %v1409_v0 = vmul.f32 %v1378_v11, %v3951_v16 }
 0x2f5   : > { %v1345_v27 = vsel %vm1342_vm12, %v1344_v26, %v1340_v21  ;;  %v1384_v20 = vadd.f32 %v3053_v12, %v1383_v10  ;;  %v1442_v58 = vpop.permute.xlu2 %1441 }
 0x2f6   : > { %v1398_v24 = vmul.f32 %v1396_v15, %v1345_v27  ;;  %v1445_v34 = vmul.f32 %v1442_v58, %v3953_v40 }
 0x2f7   : > { %v1388_v35 = vsel %vm1387_vm15, %v3053_v12, %v1384_v20  ;;  %v1437_v12 = vpop.permute.xlu1 %1436 }
 0x2f8   : > { %v3055_v30 = vpop.eup %3054  ;;  %v1402_v33 = vadd.f32 %v1400_v2, %v1398_v24  ;;  %v1393_v49 = vsel %vm1390_vm0, %v1392_v44, %v1388_v35  ;;  %v1444_v60 = vmul.f32 %v1437_v12, %v3951_v16 }
 0x2f9   : > { %v1407_v29 = vmul.f32 %v3055_v30, %v1405_v19  ;;  %v1406_v47 = vsub.f32 1.0, %v1393_v49  ;;  %v1410_v7 = vmul.f32 %v1393_v49, %v3953_v40 }
 0x2fa   : > { %3056 = vtanh.f32 %v1402_v33 }
 0x2fb   : > { %v1411_v17 = vadd.f32 %v1409_v0, %v1407_v29 }
 0x2fd   : > { %v1427_v52 = vmul.f32 %v1420_v39, %v1411_v17 }
 0x2ff   : > { %1430 = vst [vmem:[%s3464_s8] sm:$0xff] %v1427_v52  ;;  %v4009_v6 = vadd.f32 %v1444_v60, %v1427_v52 }
 0x300   : > { %v3057_v53 = vpop.eup %3056 }
 0x301   : > { %v1408_v42 = vmul.f32 %v3057_v53, %v1406_v47 }
 0x303   : > { %v1412_v56 = vadd.f32 %v1410_v7, %v1408_v42 }
 0x305   : > { %v1428_v63 = vmul.f32 %v1425_v55, %v1412_v56 }
 0x307   : > { %1431 = vst [vmem:[%s3464_s8 + $0x8] sm:$0xff] %v1428_v63  ;;  %v4011_v3 = vadd.f32 %v1445_v34, %v1428_v63  ;;  %s4040_s8 = scalar_lea.vmem [#allocation2], %s2926_s26 }
 0x308   : > { %v1495_v16 = vld [vmem:[%s4040_s8] sm:$0xff]  ;;  %v1497_v15 = vld [vmem:[%s4040_s8 + $0xc] sm:$0xff] }
 0x309   : > { %v1449_v5 = vpack.c.bf16 %v4011_v3, %v4009_v6  ;;  %v1499_v40 = vunpack.c.l.bf16 %v1495_v16  ;;  %v1543_v10 = vrot.slane %v1495_v16, 4  ;;  %v1500_v2 = vunpack.c.l.bf16 %v1497_v15  ;;  %v1496_v16 = vld [vmem:[%s4040_s8 + $0x8] sm:$0xf] }
 0x30a   : > { %v1544_v13 = vrot.slane %v1497_v15, 4 }
 0x30b   : > { %1458 = vmatmul.bf16.vlgmr.msra.gmra.mxu1 %v1449_v5  ;;  %1472 = vmatmul.bf16.vlgmr.msra.gmra.mxu2 %v1449_v5  ;;  %v1547_v21 = vunpack.c.l.bf16 %v1543_v10 }
 0x30c   : > { %1486 = vmatmul.bf16.vlgmr.msrb.gmra.mxu3 %v1449_v5  ;;  %1866 = vmatpush.bf16.msra.mxu1 %v3646_v9  ;;  %v1548_v29 = vunpack.c.l.bf16 %v1544_v13 }
 0x30d   : > { %2032 = vmatpush.bf16.msra.mxu2 %v3490_v23  ;;  %2046 = vmatpush.bf16.msrb.mxu3 %v3574_v48 }
 0x310   : > { %1867 = vmatpush.bf16.msra.mxu1 %v3674_v18 }
 0x311   : > { %2033 = vmatpush.bf16.msra.mxu2 %v3499_v25  ;;  %2047 = vmatpush.bf16.msrb.mxu3 %v3583_v51 }
 0x314   : > { %1868 = vmatpush.bf16.msra.mxu1 %v3682_v22 }
 0x315   : > { %2034 = vmatpush.bf16.msra.mxu2 %v3505_v28  ;;  %2048 = vmatpush.bf16.msrb.mxu3 %v3596_v54 }
 0x318   : > { %1869 = vmatpush.bf16.msra.mxu1 %v3691_v31 }
 0x319   : > { %2035 = vmatpush.bf16.msra.mxu2 %v3514_v32  ;;  %2049 = vmatpush.bf16.msrb.mxu3 %v3607_v57 }
 0x31c   : > { %1870 = vmatpush.bf16.msra.mxu1 %v3707_v37 }
 0x31d   : > { %2036 = vmatpush.bf16.msra.mxu2 %v3529_v36  ;;  %2050 = vmatpush.bf16.msrb.mxu3 %v3624_v61 }
 0x320   : > { %1871 = vmatpush.bf16.msra.mxu1 %v3715_v46 }
 0x321   : > { %2037 = vmatpush.bf16.msra.mxu2 %v3539_v38  ;;  %2051 = vmatpush.bf16.msrb.mxu3 %v3633_v1 }
 0x324   : > { %1872 = vmatpush.bf16.msra.mxu1 %v3728_v50 }
 0x325   : > { %2038 = vmatpush.bf16.msra.mxu2 %v3549_v41  ;;  %2052 = vmatpush.bf16.msrb.mxu3 %v3644_v8 }
 0x328   : > { %1873 = vmatpush.bf16.msra.mxu1 %v3735_v59 }
 0x329   : > { %2039 = vmatpush.bf16.msra.mxu2 %v3564_v45  ;;  %2053 = vmatpush.bf16.msrb.mxu3 %v3655_v14 }
 0x388   : > { %v1459_v62 = vpop.f32.mrf.mxu1 }
 0x389   : > { %v1501_v26 = vadd.f32 %v1499_v40, %v1459_v62 }
 0x38b   : > { %v2848_v11 = vmul.f32 -1.442695, %v1501_v26 }
 0x38d   : > { %3058 = vpow2.f32 %v2848_v11 }
 0x38e   : > { %v1473_v27 = vpop.f32.mrf.mxu2 }
 0x38f   : > { %v1549_v20 = vadd.f32 %v1547_v21, %v1473_v27  ;;  %v1487_v12 = vpop.f32.mrf.mxu3  ;;  %v1593_v27 = vunpack.c.l.bf16 %v1496_v16 }
 0x390   : > { %v1461_v24 = vpop.f32.mrf.mxu1  ;;  %v1589_v15 = vadd.f32 %v3859_v43, %v1487_v12  ;;  %v4052_v12 = vld [vmem:[%s3435_s17] ss:$0 sm:$0xff] }
 0x391   : > { %v2850_v4 = vmul.f32 -1.442695, %v1549_v20  ;;  %v1502_v19 = vadd.f32 %v1500_v2, %v1461_v24 }
 0x393   : > { %v3059_v30 = vpop.eup %3058  ;;  %3060 = vpow2.f32 %v2850_v4  ;;  %v2849_v33 = vmul.f32 -1.442695, %v1502_v19 }
 0x394   : > { %v1509_v35 = vadd.f32 1.0, %v3059_v30 }
 0x395   : > { %3062 = vpow2.f32 %v2849_v33 }
 0x396   : > { %3064 = vrcp.f32 %v1509_v35  ;;  %v1475_v0 = vpop.f32.mrf.mxu2  ;;  %v1522_v55 = vand.u32 2147483648, %v1509_v35  ;;  %v1520_v60 = vand.u32 2147483647, %v1509_v35  ;;  %vm1516_vm2 = vweird.f32 %v1509_v35 }
 0x397   : > { %v1550_v39 = vadd.f32 %v1548_v29, %v1475_v0 }
 0x398   : > { %v1523_v62 = vor.u32 1.1754944e-38, %v1522_v55  ;;  %vm1521_vm4 = vcmp.eq.f32.partialorder %v1520_v60, 8.507059e+37 }
 0x399   : > { %v3061_v44 = vpop.eup %3060  ;;  %v2851_v17 = vmul.f32 -1.442695, %v1550_v39 }
 0x39a   : > { %v1557_v49 = vadd.f32 1.0, %v3061_v44 }
 0x39b   : > { %v3063_v52 = vpop.eup %3062  ;;  %3066 = vpow2.f32 %v2851_v17 }
 0x39c   : > { %v3065_v47 = vpop.eup %3064  ;;  %3068 = vrcp.f32 %v1557_v49  ;;  %v1510_v42 = vadd.f32 1.0, %v3063_v52  ;;  %v1570_v24 = vand.u32 2147483648, %v1557_v49  ;;  %v1568_v19 = vand.u32 2147483647, %v1557_v49  ;;  %v1489_v52 = vpop.f32.mrf.mxu3 }
 0x39d   : > { %v1512_v53 = vmul.f32 %v3065_v47, %v1509_v35  ;;  %vm1517_vm1 = vweird.f32 %v3065_v47  ;;  %vm1564_vm6 = vweird.f32 %v1557_v49 }
 0x39e   : > { %3070 = vrcp.f32 %v1510_v42  ;;  %vm1518_vm3 = vmor %vm1516_vm2, %vm1517_vm1  ;;  %v1537_v35 = vand.u32 2147483648, %v1510_v42  ;;  %v1535_v39 = vand.u32 2147483647, %v1510_v42  ;;  %v1571_v43 = vor.u32 1.1754944e-38, %v1570_v24 }
 0x39f   : > { %v1513_v7 = vsub.f32 1.0, %v1512_v53  ;;  %vm1569_vm9 = vcmp.eq.f32.partialorder %v1568_v19, 8.507059e+37  ;;  %vm1531_vm10 = vweird.f32 %v1510_v42 }
 0x3a0   : > { %v1538_v55 = vor.u32 1.1754944e-38, %v1537_v35  ;;  %vm1536_vm12 = vcmp.eq.f32.partialorder %v1535_v39, 8.507059e+37  ;;  %v1619_v35 = vpop.permute.xlu1 %1618 }
 0x3a1   : > { %v3067_v56 = vpop.eup %3066  ;;  %v1514_v58 = vmul.f32 %v3065_v47, %v1513_v7  ;;  %v1498_v7 = vld [vmem:[%s4040_s8 + $0x14] sm:$0xf]  ;;  %s2421_s8 = scalar_lea.sflag [#allocation5], %s3413_s19 }
 0x3a2   : > { %v3069_v34 = vpop.eup %3068  ;;  %v4044_v63 = vadd.f32 1.0, %v3067_v56 }
 0x3a3   : > { %v1560_v5 = vmul.f32 %v3069_v34, %v1557_v49  ;;  %v1515_v40 = vadd.f32 %v3065_v47, %v1514_v58  ;;  %vm1565_vm5 = vweird.f32 %v3069_v34  ;;  %v1590_v58 = vadd.f32 %v4052_v12, %v1489_v52 }
 0x3a4   : > { %3072 = vrcp.f32 %v4044_v63  ;;  %v3071_v26 = vpop.eup %3070  ;;  %vm1566_vm7 = vmor %vm1564_vm6, %vm1565_vm5  ;;  %v1585_v16 = vand.u32 2147483648, %v4044_v63  ;;  %vm1579_vm14 = vweird.f32 %v4044_v63 }
 0x3a5   : > { %v1561_v10 = vsub.f32 1.0, %v1560_v5  ;;  %v1519_v11 = vsel %vm1518_vm3, %v3065_v47, %v1515_v40  ;;  %v1527_v20 = vmul.f32 %v3071_v26, %v1510_v42  ;;  %vm1532_vm8 = vweird.f32 %v3071_v26 }
 0x3a6   : > { %v1524_v21 = vsel %vm1521_vm4, %v1523_v62, %v1519_v11  ;;  %vm1533_vm11 = vmor %vm1531_vm10, %vm1532_vm8  ;;  %v1594_v62 = vunpack.c.l.bf16 %v1498_v7  ;;  %v1586_v24 = vor.u32 1.1754944e-38, %v1585_v16 }
 0x3a7   : > { %v1562_v2 = vmul.f32 %v3069_v34, %v1561_v10  ;;  %v1591_v4 = vmul.f32 %v1589_v15, %v1524_v21  ;;  %v1528_v13 = vsub.f32 1.0, %v1527_v20  ;;  %v1614_v20 = vpop.permute.xlu0 %1613 }
 0x3a9   : > { %v1563_v30 = vadd.f32 %v3069_v34, %v1562_v2  ;;  %v1595_v33 = vadd.f32 %v1593_v27, %v1591_v4  ;;  %v1529_v0 = vmul.f32 %v3071_v26, %v1528_v13 }
 0x3aa   : > { %v3073_v29 = vpop.eup %3072 }
 0x3ab   : > { %v1567_v44 = vsel %vm1566_vm7, %v3069_v34, %v1563_v30  ;;  %3074 = vtanh.f32 %v1595_v33  ;;  %v1575_v17 = vmul.f32 %v3073_v29, %v4044_v63  ;;  %v1530_v47 = vadd.f32 %v3071_v26, %v1529_v0 }
 0x3ac   : > { %v1572_v53 = vsel %vm1569_vm9, %v1571_v43, %v1567_v44  ;;  %vm1580_vm13 = vweird.f32 %v3073_v29  ;;  %v1631_v43 = vpop.permute.xlu2 %1630 }
 0x3ad   : > { %v1576_v49 = vsub.f32 1.0, %v1575_v17  ;;  %v1534_v56 = vsel %vm1533_vm11, %v3071_v26, %v1530_v47  ;;  %v1599_v5 = vsub.f32 1.0, %v1572_v53  ;;  %v1583_v26 = vand.u32 2147483647, %v4044_v63  ;;  %vm1581_vm15 = vmor %vm1579_vm14, %vm1580_vm13 }
 0x3ae   : > { %v1539_v34 = vsel %vm1536_vm12, %v1538_v55, %v1534_v56  ;;  %v1603_v15 = vmul.f32 %v1572_v53, %v4009_v6 }
 0x3af   : > { %v1577_v60 = vmul.f32 %v3073_v29, %v1576_v49  ;;  %v1592_v40 = vmul.f32 %v1590_v58, %v1539_v34  ;;  %vm1584_vm0 = vcmp.eq.f32.partialorder %v1583_v26, 8.507059e+37  ;;  %v1636_v39 = vpop.permute.xlu0 %1635 }
 0x3b0   : > { %v1639_v17 = vmul.f32 %v1636_v39, %v4011_v3 }
 0x3b1   : > { %v3075_v42 = vpop.eup %3074  ;;  %v1578_v10 = vadd.f32 %v3073_v29, %v1577_v60  ;;  %v1596_v21 = vadd.f32 %v1594_v62, %v1592_v40 }
 0x3b2   : > { %v1601_v11 = vmul.f32 %v3075_v42, %v1599_v5 }
 0x3b3   : > { %v1582_v27 = vsel %vm1581_vm15, %v3073_v29, %v1578_v10  ;;  %3076 = vtanh.f32 %v1596_v21  ;;  %v1638_v29 = vmul.f32 %v1631_v43, %v4009_v6 }
 0x3b4   : > { %v1605_v2 = vadd.f32 %v1603_v15, %v1601_v11  ;;  %v1587_v4 = vsel %vm1584_vm0, %v1586_v24, %v1582_v27 }
 0x3b5   : > { %v1600_v13 = vsub.f32 1.0, %v1587_v4  ;;  %v1604_v63 = vmul.f32 %v1587_v4, %v4011_v3 }
 0x3b6   : > { %v1621_v19 = vmul.f32 %v1614_v20, %v1605_v2 }
 0x3b8   : > { %1624 = vst [vmem:[%s3477_s14] sm:$0xff] %v1621_v19  ;;  %v4064_v52 = vadd.f32 %v1638_v29, %v1621_v19 }
 0x3b9   : > { %v3077_v30 = vpop.eup %3076 }
 0x3ba   : > { %v1602_v33 = vmul.f32 %v3077_v30, %v1600_v13 }
 0x3bc   : > { %v1606_v0 = vadd.f32 %v1604_v63, %v1602_v33 }
 0x3be   : > { %v1622_v44 = vmul.f32 %v1619_v35, %v1606_v0 }
 0x3c0   : > { %1625 = vst [vmem:[%s3477_s14 + $0x8] sm:$0xff] %v1622_v44  ;;  %v4066_v47 = vadd.f32 %v1639_v17, %v1622_v44  ;;  %s4095_s14 = scalar_lea.vmem [#allocation2], %s2927_s9  ;;  %s3204_s9 = sshra.s32 %s2441_s21, 4  ;;  %s3205_s9 = int_to_ptr.hbm [resolvable:$true] %s3204_s9 }
 0x3c1   : > { %v1690_v13 = vld [vmem:[%s4095_s14 + $0x8] sm:$0xf]  ;;  %p3211_p5 = scmp.lt.s32.totalorder %s3205_s9, %s4310_s6 }
 0x3c2   : > { %v1643_v53 = vpack.c.bf16 %v4066_v47, %v4064_v52  ;;  %v1787_v17 = vunpack.c.l.bf16 %v1690_v13 }
 0x3c4   : > { %1652 = vmatmul.bf16.vlgmr.msrb.gmra.mxu0 %v1643_v53  ;;  %1666 = vmatmul.bf16.vlgmr.msrb.gmra.mxu1 %v1643_v53 }
 0x3c5   : > { %1680 = vmatmul.bf16.vlgmr.msrb.gmra.mxu2 %v1643_v53  ;;  %2060 = vmatpush.bf16.msrb.mxu0 %v3646_v9 }
 0x3c6   : > { %2226 = vmatpush.bf16.msrb.mxu1 %v3490_v23  ;;  %2240 = vmatpush.bf16.msrb.mxu2 %v3574_v48  ;;  %v1689_v23 = vld [vmem:[%s4095_s14] sm:$0xff] }
 0x3c9   : > { %2061 = vmatpush.bf16.msrb.mxu0 %v3674_v18 }
 0x3ca   : > { %2227 = vmatpush.bf16.msrb.mxu1 %v3499_v25  ;;  %2241 = vmatpush.bf16.msrb.mxu2 %v3583_v51  ;;  %v1737_v25 = vrot.slane %v1689_v23, 4 }
 0x3cd   : > { %2062 = vmatpush.bf16.msrb.mxu0 %v3682_v22 }
 0x3ce   : > { %2228 = vmatpush.bf16.msrb.mxu1 %v3505_v28  ;;  %2242 = vmatpush.bf16.msrb.mxu2 %v3596_v54  ;;  %v1693_v28 = vunpack.c.l.bf16 %v1689_v23 }
 0x3d1   : > { %2063 = vmatpush.bf16.msrb.mxu0 %v3691_v31 }
 0x3d2   : > { %2229 = vmatpush.bf16.msrb.mxu1 %v3514_v32  ;;  %2243 = vmatpush.bf16.msrb.mxu2 %v3607_v57  ;;  %v1741_v32 = vunpack.c.l.bf16 %v1737_v25 }
 0x3d5   : > { %2064 = vmatpush.bf16.msrb.mxu0 %v3707_v37 }
 0x3d6   : > { %2230 = vmatpush.bf16.msrb.mxu1 %v3529_v36  ;;  %2244 = vmatpush.bf16.msrb.mxu2 %v3624_v61 }
 0x3d9   : > { %2065 = vmatpush.bf16.msrb.mxu0 %v3715_v46 }
 0x3da   : > { %2231 = vmatpush.bf16.msrb.mxu1 %v3539_v38  ;;  %2245 = vmatpush.bf16.msrb.mxu2 %v3633_v1 }
 0x3dd   : > { %2066 = vmatpush.bf16.msrb.mxu0 %v3728_v50 }
 0x3de   : > { %2232 = vmatpush.bf16.msrb.mxu1 %v3549_v41  ;;  %2246 = vmatpush.bf16.msrb.mxu2 %v3644_v8  ;;  %v1691_v41 = vld [vmem:[%s4095_s14 + $0xc] sm:$0xff] }
 0x3df   : > { %v1738_v61 = vrot.slane %v1691_v41, 4 }
 0x3e1   : > { %2067 = vmatpush.bf16.msrb.mxu0 %v3735_v59  ;;  %v1742_v1 = vunpack.c.l.bf16 %v1738_v61 }
 0x3e2   : > { %2233 = vmatpush.bf16.msrb.mxu1 %v3564_v45  ;;  %2247 = vmatpush.bf16.msrb.mxu2 %v3655_v14  ;;  %v1694_v45 = vunpack.c.l.bf16 %v1691_v41 }
 0x441   : > { %v1653_v36 = vpop.f32.mrf.mxu0  ;;  %v1667_v38 = vpop.f32.mrf.mxu1 }
 0x442   : > { %v1695_v48 = vadd.f32 %v1693_v28, %v1653_v36  ;;  %v1743_v51 = vadd.f32 %v1741_v32, %v1667_v38 }
 0x444   : > { %v2854_v54 = vmul.f32 -1.442695, %v1695_v48  ;;  %v2856_v57 = vmul.f32 -1.442695, %v1743_v51 }
 0x446   : > { %3078 = vpow2.f32 %v2854_v54 }
 0x447   : > { %3080 = vpow2.f32 %v2856_v57 }
 0x448   : > { %v1681_v21 = vpop.f32.mrf.mxu2 }
 0x449   : > { %v1655_v8 = vpop.f32.mrf.mxu0  ;;  %v1669_v14 = vpop.f32.mrf.mxu1  ;;  %v1783_v63 = vadd.f32 %v4052_v12, %v1681_v21 }
 0x44a   : > { %v1696_v6 = vadd.f32 %v1694_v45, %v1655_v8  ;;  %v1744_v3 = vadd.f32 %v1742_v1, %v1669_v14  ;;  %v1692_v1 = vld [vmem:[%s4095_s14 + $0x14] sm:$0xf]  ;;  %s3206_s14 = scalar_lea.hbm %s3205_s9, 128 }
 0x44b   : > { %p3207_p4 = scmp.ne.s32.totalorder %s3205_s9, %s3206_s14  ;;  %p3212_p7 = scmp.lt.s32.totalorder %s3210_s15, %s3206_s14 }
 0x44c   : > { %v3079_v49 = vpop.eup %3078  ;;  %v2855_v7 = vmul.f32 -1.442695, %v1696_v6  ;;  %v2857_v58 = vmul.f32 -1.442695, %v1744_v3 }
 0x44d   : > { %v3081_v55 = vpop.eup %3080  ;;  %v1703_v56 = vadd.f32 1.0, %v3079_v49  ;;  %p3208_p6 = pnand %p3207_p4, %p3383_p11  ;;  %p3213_p8 = por %p3212_p7, %p3211_p5 }
 0x44e   : > { %v1751_v60 = vadd.f32 1.0, %v3081_v55  ;;  %3082 = vpow2.f32 %v2855_v7 }
 0x44f   : > { %3084 = vrcp.f32 %v1703_v56  ;;  %v1716_v27 = vand.u32 2147483648, %v1703_v56  ;;  %v1714_v2 = vand.u32 2147483647, %v1703_v56  ;;  %vm1710_vm2 = vweird.f32 %v1703_v56  ;;  %p3209_p3 = pneg %p3208_p6 }
 0x450   : > { %3086 = vrcp.f32 %v1751_v60  ;;  %v1764_v44 = vand.u32 2147483648, %v1751_v60  ;;  %vm1758_vm6 = vweird.f32 %v1751_v60  ;;  %v1762_v23 = vand.u32 2147483647, %v1751_v60  ;;  %v1683_v54 = vpop.f32.mrf.mxu2 }
 0x451   : > { %3088 = vpow2.f32 %v2857_v58  ;;  %v1717_v30 = vor.u32 1.1754944e-38, %v1716_v27  ;;  %vm1715_vm4 = vcmp.eq.f32.partialorder %v1714_v2, 8.507059e+37  ;;  %v1784_v3 = vadd.f32 %v4052_v12, %v1683_v54  ;;  %p3214_p10 = pnand %p3213_p8, %p3209_p3 }
 0x452   : > { %v1765_v57 = vor.u32 1.1754944e-38, %v1764_v44  ;;  %vm1763_vm10 = vcmp.eq.f32.partialorder %v1762_v23, 8.507059e+37  ;;  %v1788_v58 = vunpack.c.l.bf16 %v1692_v1 }
 0x454   : > { %v3083_v34 = vpop.eup %3082 }
 0x455   : > { %v3085_v5 = vpop.eup %3084  ;;  %v1704_v16 = vadd.f32 1.0, %v3083_v34 }
 0x456   : > { %v3087_v40 = vpop.eup %3086  ;;  %v1706_v62 = vmul.f32 %v3085_v5, %v1703_v56  ;;  %vm1711_vm1 = vweird.f32 %v3085_v5 }
 0x457   : > { %v3089_v42 = vpop.eup %3088  ;;  %v1754_v10 = vmul.f32 %v3087_v40, %v1751_v60  ;;  %3090 = vrcp.f32 %v1704_v16  ;;  %vm1712_vm3 = vmor %vm1710_vm2, %vm1711_vm1  ;;  %vm1759_vm5 = vweird.f32 %v3087_v40  ;;  %v1731_v28 = vand.u32 2147483648, %v1704_v16 }
 0x458   : > { %v1707_v26 = vsub.f32 1.0, %v1706_v62  ;;  %v4099_v11 = vadd.f32 1.0, %v3089_v42  ;;  %vm4105_vm7 = vmor %vm1758_vm6, %vm1759_vm5  ;;  %v1729_v41 = vand.u32 2147483647, %v1704_v16  ;;  %vm1725_vm9 = vweird.f32 %v1704_v16 }
 0x459   : > { %v1755_v15 = vsub.f32 1.0, %v1754_v10  ;;  %v1732_v8 = vor.u32 1.1754944e-38, %v1731_v28  ;;  %v1808_v10 = vpop.permute.xlu1 %1807 }
 0x45a   : > { %v1708_v20 = vmul.f32 %v3085_v5, %v1707_v26  ;;  %3092 = vrcp.f32 %v4099_v11  ;;  %vm1730_vm12 = vcmp.eq.f32.partialorder %v1729_v41, 8.507059e+37  ;;  %v1779_v55 = vand.u32 2147483648, %v4099_v11 }
 0x45b   : > { %v1756_v24 = vmul.f32 %v3087_v40, %v1755_v15  ;;  %vm1773_vm14 = vweird.f32 %v4099_v11  ;;  %v1777_v34 = vand.u32 2147483647, %v4099_v11 }
 0x45c   : > { %v1709_v4 = vadd.f32 %v3085_v5, %v1708_v20  ;;  %v1780_v26 = vor.u32 1.1754944e-38, %v1779_v55 }
 0x45d   : > { %v3091_v19 = vpop.eup %3090  ;;  %v1757_v0 = vadd.f32 %v3087_v40, %v1756_v24  ;;  %vm1778_vm0 = vcmp.eq.f32.partialorder %v1777_v34, 8.507059e+37 }
 0x45e   : > { %v1713_v33 = vsel %vm1712_vm3, %v3085_v5, %v1709_v4  ;;  %v1721_v35 = vmul.f32 %v3091_v19, %v1704_v16  ;;  %vm1726_vm8 = vweird.f32 %v3091_v19  ;;  %v1825_v4 = vpop.permute.xlu0 %1824 }
 0x45f   : > { %v1718_v39 = vsel %vm1715_vm4, %v1717_v30, %v1713_v33  ;;  %v1761_v48 = vsel %vm4105_vm7, %v3087_v40, %v1757_v0  ;;  %vm1727_vm11 = vmor %vm1725_vm9, %vm1726_vm8  ;;  %v1813_v30 = vpop.permute.xlu2 %1812 }
 0x460   : > { %v3093_v43 = vpop.eup %3092  ;;  %v1785_v29 = vmul.f32 %v1783_v63, %v1718_v39  ;;  %v1722_v53 = vsub.f32 1.0, %v1721_v35  ;;  %v1766_v14 = vsel %vm1763_vm10, %v1765_v57, %v1761_v48  ;;  %v1832_v63 = vmul.f32 %v1825_v4, %v4064_v52 }
 0x461   : > { %v1769_v25 = vmul.f32 %v3093_v43, %v4099_v11  ;;  %vm1774_vm13 = vweird.f32 %v3093_v43  ;;  %v1793_v60 = vsub.f32 1.0, %v1766_v14  ;;  %v1797_v62 = vmul.f32 %v1766_v14, %v4064_v52  ;;  %v1830_v13 = vpop.permute.xlu1 %1829 }
 0x462   : > { %v1789_v36 = vadd.f32 %v1787_v17, %v1785_v29  ;;  %v1723_v38 = vmul.f32 %v3091_v19, %v1722_v53  ;;  %vm1775_vm15 = vmor %vm1773_vm14, %vm1774_vm13  ;;  %v1833_v35 = vmul.f32 %v1830_v13, %v4066_v47 }
 0x463   : > { %v1770_v51 = vsub.f32 1.0, %v1769_v25 }
 0x464   : > { %3094 = vtanh.f32 %v1789_v36  ;;  %v1724_v61 = vadd.f32 %v3091_v19, %v1723_v38 }
 0x465   : > { %v1771_v45 = vmul.f32 %v3093_v43, %v1770_v51 }
 0x466   : > { %v1728_v6 = vsel %vm1727_vm11, %v3091_v19, %v1724_v61 }
 0x467   : > { %v1772_v49 = vadd.f32 %v3093_v43, %v1771_v45  ;;  %v1733_v7 = vsel %vm1730_vm12, %v1732_v8, %v1728_v6 }
 0x468   : > { %v1786_v56 = vmul.f32 %v1784_v3, %v1733_v7 }
 0x469   : > { %v1776_v42 = vsel %vm1775_vm15, %v3093_v43, %v1772_v49 }
 0x46a   : > { %v3095_v5 = vpop.eup %3094  ;;  %v1790_v16 = vadd.f32 %v1788_v58, %v1786_v56  ;;  %v1781_v21 = vsel %vm1778_vm0, %v1780_v26, %v1776_v42 }
 0x46b   : > { %v1795_v40 = vmul.f32 %v3095_v5, %v1793_v60  ;;  %v1794_v20 = vsub.f32 1.0, %v1781_v21  ;;  %v1798_v11 = vmul.f32 %v1781_v21, %v4066_v47 }
 0x46c   : > { %3096 = vtanh.f32 %v1790_v16 }
 0x46d   : > { %v1799_v15 = vadd.f32 %v1797_v62, %v1795_v40 }
 0x46f   : > { %v1815_v27 = vmul.f32 %v1808_v10, %v1799_v15 }
 0x471   : > { %1818 = vst [vmem:[%s3496_s11] sm:$0xff] %v1815_v27  ;;  %v4122_v0 = vadd.f32 %v1832_v63, %v1815_v27 }
 0x472   : > { %v3097_v2 = vpop.eup %3096 }
 0x473   : > { %v1796_v24 = vmul.f32 %v3097_v2, %v1794_v20 }
 0x475   : > { %v1800_v19 = vadd.f32 %v1798_v11, %v1796_v24 }
 0x477   : > { %v1816_v33 = vmul.f32 %v1813_v30, %v1800_v19 }
 0x479   : > { %1819 = vst [vmem:[%s3496_s11 + $0x8] sm:$0xff] %v1816_v33  ;;  %v4124_v39 = vadd.f32 %v1833_v35, %v1816_v33  ;;  %s4137_s11 = scalar_lea.vmem [#allocation2], %s2928_s10 }
 0x47a   : > { %v1884_v42 = vld [vmem:[%s4137_s11 + $0x8] sm:$0xf] }
 0x47b   : > { %v1837_v43 = vpack.c.bf16 %v4124_v39, %v4122_v0  ;;  %v1981_v11 = vunpack.c.l.bf16 %v1884_v42 }
 0x47d   : > { %1846 = vmatmul.bf16.vlgmr.msra.gmra.mxu3 %v1837_v43  ;;  %1860 = vmatmul.bf16.vlgmr.msra.gmra.mxu0 %v1837_v43 }
 0x47e   : > { %1874 = vmatmul.bf16.vlgmr.msra.gmra.mxu1 %v1837_v43  ;;  %2254 = vmatpush.bf16.msra.mxu3 %v3646_v9  ;;  %v1883_v9 = vld [vmem:[%s4137_s11] sm:$0xff] }
 0x47f   : > { %v1931_v52 = vrot.slane %v1883_v9, 4 }
 0x482   : > { %2255 = vmatpush.bf16.msra.mxu3 %v3674_v18  ;;  %v1935_v18 = vunpack.c.l.bf16 %v1931_v52 }
 0x486   : > { %2256 = vmatpush.bf16.msra.mxu3 %v3682_v22  ;;  %v1885_v22 = vld [vmem:[%s4137_s11 + $0xc] sm:$0xff] }
 0x487   : > { %v1932_v29 = vrot.slane %v1885_v22, 4  ;;  %v1888_v36 = vunpack.c.l.bf16 %v1885_v22 }
 0x48a   : > { %2257 = vmatpush.bf16.msra.mxu3 %v3691_v31 }
 0x48e   : > { %2258 = vmatpush.bf16.msra.mxu3 %v3707_v37  ;;  %v1887_v37 = vunpack.c.l.bf16 %v1883_v9 }
 0x492   : > { %2259 = vmatpush.bf16.msra.mxu3 %v3715_v46 }
 0x496   : > { %2260 = vmatpush.bf16.msra.mxu3 %v3728_v50  ;;  %v1936_v50 = vunpack.c.l.bf16 %v1932_v29 }
 0x49a   : > { %2261 = vmatpush.bf16.msra.mxu3 %v3735_v59 }
 0x4fa   : > { %v1861_v47 = vpop.f32.mrf.mxu0 }
 0x4fb   : > { %v1937_v44 = vadd.f32 %v1935_v18, %v1861_v47  ;;  %v1875_v56 = vpop.f32.mrf.mxu1 }
 0x4fc   : > { %v1977_v26 = vadd.f32 %v4052_v12, %v1875_v56 }
 0x4fd   : > { %v2862_v31 = vmul.f32 -1.442695, %v1937_v44  ;;  %v1886_v44 = vld [vmem:[%s4137_s11 + $0x14] sm:$0xf] }
 0x4ff   : > { %3098 = vpow2.f32 %v2862_v31 }
 0x500   : > { %v1847_v46 = vpop.f32.mrf.mxu3 }
 0x501   : > { %v1889_v17 = vadd.f32 %v1887_v37, %v1847_v46 }
 0x502   : > { %v1863_v53 = vpop.f32.mrf.mxu0 }
 0x503   : > { %v2860_v59 = vmul.f32 -1.442695, %v1889_v17  ;;  %v1938_v23 = vadd.f32 %v1936_v50, %v1863_v53  ;;  %v1877_v18 = vpop.f32.mrf.mxu1  ;;  %v1982_v53 = vunpack.c.l.bf16 %v1886_v44 }
 0x504   : > { %v1978_v37 = vadd.f32 %v4052_v12, %v1877_v18 }
 0x505   : > { %v3099_v25 = vpop.eup %3098  ;;  %3100 = vpow2.f32 %v2860_v59  ;;  %v2863_v28 = vmul.f32 -1.442695, %v1938_v23 }
 0x506   : > { %v4141_v32 = vadd.f32 1.0, %v3099_v25 }
 0x507   : > { %3102 = vpow2.f32 %v2863_v28 }
 0x508   : > { %v1849_v38 = vpop.f32.mrf.mxu3  ;;  %3104 = vrcp.f32 %v4141_v32  ;;  %v1958_v24 = vand.u32 2147483648, %v4141_v32  ;;  %vm1952_vm6 = vweird.f32 %v4141_v32  ;;  %v1956_v13 = vand.u32 2147483647, %v4141_v32 }
 0x509   : > { %v1890_v41 = vadd.f32 %v1888_v36, %v1849_v38 }
 0x50a   : > { %v1959_v47 = vor.u32 1.1754944e-38, %v1958_v24  ;;  %vm1957_vm10 = vcmp.eq.f32.partialorder %v1956_v13, 8.507059e+37 }
 0x50b   : > { %v3101_v48 = vpop.eup %3100  ;;  %v2861_v51 = vmul.f32 -1.442695, %v1890_v41 }
 0x50c   : > { %v1897_v54 = vadd.f32 1.0, %v3101_v48 }
 0x50d   : > { %v3103_v57 = vpop.eup %3102  ;;  %3106 = vpow2.f32 %v2861_v51  ;;  %v2002_v51 = vpop.permute.xlu2 %2001 }
 0x50e   : > { %3108 = vrcp.f32 %v1897_v54  ;;  %v3105_v61 = vpop.eup %3104  ;;  %v4144_v45 = vadd.f32 1.0, %v3103_v57  ;;  %v1910_v58 = vand.u32 2147483648, %v1897_v54  ;;  %v1908_v34 = vand.u32 2147483647, %v1897_v54 }
 0x50f   : > { %v1948_v1 = vmul.f32 %v3105_v61, %v4141_v32  ;;  %vm1904_vm2 = vweird.f32 %v1897_v54  ;;  %vm1953_vm5 = vweird.f32 %v3105_v61 }
 0x510   : > { %3110 = vrcp.f32 %v4144_v45  ;;  %v1911_v10 = vor.u32 1.1754944e-38, %v1910_v58  ;;  %vm1909_vm4 = vcmp.eq.f32.partialorder %v1908_v34, 8.507059e+37  ;;  %vm4157_vm7 = vmor %vm1952_vm6, %vm1953_vm5  ;;  %v1973_v59 = vand.u32 2147483648, %v4144_v45 }
 0x511   : > { %v1949_v49 = vsub.f32 1.0, %v1948_v1  ;;  %vm1967_vm14 = vweird.f32 %v4144_v45  ;;  %v1971_v28 = vand.u32 2147483647, %v4144_v45 }
 0x513   : > { %v3107_v8 = vpop.eup %3106  ;;  %v1950_v5 = vmul.f32 %v3105_v61, %v1949_v49  ;;  %vm1972_vm0 = vcmp.eq.f32.partialorder %v1971_v28, 8.507059e+37 }
 0x514   : > { %v3109_v14 = vpop.eup %3108  ;;  %v1898_v6 = vadd.f32 1.0, %v3107_v8 }
 0x515   : > { %v1900_v3 = vmul.f32 %v3109_v14, %v1897_v54  ;;  %vm1905_vm1 = vweird.f32 %v3109_v14  ;;  %v1951_v27 = vadd.f32 %v3105_v61, %v1950_v5  ;;  %v1974_v54 = vor.u32 1.1754944e-38, %v1973_v59 }
 0x516   : > { %3112 = vrcp.f32 %v1898_v6  ;;  %v4148_v7 = vpop.eup %3110  ;;  %vm1906_vm3 = vmor %vm1904_vm2, %vm1905_vm1  ;;  %v1925_v30 = vand.u32 2147483648, %v1898_v6  ;;  %v1923_v43 = vand.u32 2147483647, %v1898_v6  ;;  %vm1919_vm9 = vweird.f32 %v1898_v6 }
 0x517   : > { %v1901_v55 = vsub.f32 1.0, %v1900_v3  ;;  %v1963_v16 = vmul.f32 %v4148_v7, %v4144_v45  ;;  %v1955_v9 = vsel %vm4157_vm7, %v3105_v61, %v1951_v27  ;;  %vm1968_vm13 = vweird.f32 %v4148_v7  ;;  %v2007_v3 = vpop.permute.xlu0 %2006 }
 0x518   : > { %v1926_v31 = vor.u32 1.1754944e-38, %v1925_v30  ;;  %v1960_v29 = vsel %vm1957_vm10, %v1959_v47, %v1955_v9  ;;  %vm1924_vm12 = vcmp.eq.f32.partialorder %v1923_v43, 8.507059e+37  ;;  %vm1969_vm15 = vmor %vm1967_vm14, %vm1968_vm13 }
 0x519   : > { %v1902_v60 = vmul.f32 %v3109_v14, %v1901_v55  ;;  %v1964_v2 = vsub.f32 1.0, %v1963_v16  ;;  %v1987_v25 = vsub.f32 1.0, %v1960_v29  ;;  %v1991_v48 = vmul.f32 %v1960_v29, %v4122_v0  ;;  %v2024_v55 = vpop.permute.xlu2 %2023 }
 0x51b   : > { %v1903_v40 = vadd.f32 %v3109_v14, %v1902_v60  ;;  %v1965_v52 = vmul.f32 %v4148_v7, %v1964_v2  ;;  %v2027_v60 = vmul.f32 %v2024_v55, %v4124_v39 }
 0x51c   : > { %v3113_v62 = vpop.eup %3112 }
 0x51d   : > { %v1907_v15 = vsel %vm1906_vm3, %v3109_v14, %v1903_v40  ;;  %v1915_v21 = vmul.f32 %v3113_v62, %v1898_v6  ;;  %vm1920_vm8 = vweird.f32 %v3113_v62  ;;  %v1966_v17 = vadd.f32 %v4148_v7, %v1965_v52  ;;  %v2077_v40 = vld [vmem:[%s4185_s13] sm:$0xff] }
 0x51e   : > { %v1912_v20 = vsel %vm1909_vm4, %v1911_v10, %v1907_v15  ;;  %vm1921_vm11 = vmor %vm1919_vm9, %vm1920_vm8 }
 0x51f   : > { %v1979_v4 = vmul.f32 %v1977_v26, %v1912_v20  ;;  %v1916_v19 = vsub.f32 1.0, %v1915_v21  ;;  %v1970_v38 = vsel %vm1969_vm15, %v4148_v7, %v1966_v17  ;;  %v2019_v7 = vpop.permute.xlu1 %2018  ;;  %v2079_v26 = vld [vmem:[%s4185_s13 + $0xc] sm:$0xff] }
 0x520   : > { %v1975_v61 = vsel %vm1972_vm0, %v1974_v54, %v1970_v38  ;;  %v2026_v58 = vmul.f32 %v2019_v7, %v4122_v0  ;;  %v2125_v0 = vrot.slane %v2077_v40, 4  ;;  %v2126_v2 = vrot.slane %v2079_v26, 4  ;;  %v2078_v38 = vld [vmem:[%s4185_s13 + $0x8] sm:$0xf] }
 0x521   : > { %v1983_v63 = vadd.f32 %v1981_v11, %v1979_v4  ;;  %v1917_v35 = vmul.f32 %v3113_v62, %v1916_v19  ;;  %v1988_v8 = vsub.f32 1.0, %v1975_v61  ;;  %v1992_v6 = vmul.f32 %v1975_v61, %v4124_v39 }
 0x522   : > { %v2129_v39 = vunpack.c.l.bf16 %v2125_v0  ;;  %v2082_v24 = vunpack.c.l.bf16 %v2079_v26  ;;  %v2130_v11 = vunpack.c.l.bf16 %v2126_v2 }
 0x523   : > { %3114 = vtanh.f32 %v1983_v63  ;;  %v1918_v22 = vadd.f32 %v3113_v62, %v1917_v35 }
 0x525   : > { %v1922_v46 = vsel %vm1921_vm11, %v3113_v62, %v1918_v22  ;;  %v2081_v62 = vunpack.c.l.bf16 %v2077_v40 }
 0x526   : > { %v1927_v50 = vsel %vm1924_vm12, %v1926_v31, %v1922_v46 }
 0x527   : > { %v1980_v23 = vmul.f32 %v1978_v37, %v1927_v50 }
 0x529   : > { %v3115_v32 = vpop.eup %3114  ;;  %v1984_v36 = vadd.f32 %v1982_v53, %v1980_v23 }
 0x52a   : > { %v1989_v41 = vmul.f32 %v3115_v32, %v1987_v25 }
 0x52b   : > { %3116 = vtanh.f32 %v1984_v36 }
 0x52c   : > { %v1993_v57 = vadd.f32 %v1991_v48, %v1989_v41 }
 0x52e   : > { %v2009_v1 = vmul.f32 %v2002_v51, %v1993_v57 }
 0x530   : > { %2012 = vst [vmem:[%s3535_s18] sm:$0xff] %v2009_v1  ;;  %v4178_v34 = vadd.f32 %v2026_v58, %v2009_v1 }
 0x531   : > { %v3117_v14 = vpop.eup %3116 }
 0x532   : > { %v1990_v45 = vmul.f32 %v3117_v14, %v1988_v8  ;;  %v2175_v14 = vunpack.c.l.bf16 %v2078_v38 }
 0x534   : > { %v1994_v49 = vadd.f32 %v1992_v6, %v1990_v45 }
 0x536   : > { %v2010_v56 = vmul.f32 %v2007_v3, %v1994_v49 }
 0x538   : > { %2013 = vst [vmem:[%s3535_s18 + $0x8] sm:$0xff] %v2010_v56  ;;  %v4180_v5 = vadd.f32 %v2027_v60, %v2010_v56  ;;  %s4219_s18 = scalar_lea.vmem [#allocation2], %s2930_s2 }
 0x53a   : > { %v2031_v16 = vpack.c.bf16 %v4180_v5, %v4178_v34 }
 0x53c   : > { %2040 = vmatmul.bf16.vlgmr.msra.gmra.mxu2 %v2031_v16  ;;  %2054 = vmatmul.bf16.vlgmr.msrb.gmra.mxu3 %v2031_v16 }
 0x53d   : > { %2068 = vmatmul.bf16.vlgmr.msrb.gmra.mxu0 %v2031_v16 }
 0x5ba   : > { %v2069_v50 = vpop.f32.mrf.mxu0 }
 0x5bb   : > { %v2171_v48 = vadd.f32 %v4052_v12, %v2069_v50  ;;  %v2213_v50 = vpop.permute.xlu2 %2212 }
 0x5bf   : > { %v2041_v42 = vpop.f32.mrf.mxu2  ;;  %v2055_v10 = vpop.f32.mrf.mxu3 }
 0x5c0   : > { %v2083_v15 = vadd.f32 %v2081_v62, %v2041_v42  ;;  %v2131_v21 = vadd.f32 %v2129_v39, %v2055_v10  ;;  %v2080_v42 = vld [vmem:[%s4185_s13 + $0x14] sm:$0xf] }
 0x5c2   : > { %v2866_v27 = vmul.f32 -1.442695, %v2083_v15  ;;  %v2868_v20 = vmul.f32 -1.442695, %v2131_v21  ;;  %v2071_v40 = vpop.f32.mrf.mxu0 }
 0x5c3   : > { %v2172_v21 = vadd.f32 %v4052_v12, %v2071_v40 }
 0x5c4   : > { %3118 = vpow2.f32 %v2866_v27 }
 0x5c5   : > { %3120 = vpow2.f32 %v2868_v20 }
 0x5c7   : > { %v2043_v4 = vpop.f32.mrf.mxu2  ;;  %v2057_v19 = vpop.f32.mrf.mxu3 }
 0x5c8   : > { %v2084_v13 = vadd.f32 %v2082_v24, %v2043_v4  ;;  %v2132_v30 = vadd.f32 %v2130_v11, %v2057_v19  ;;  %v2176_v24 = vunpack.c.l.bf16 %v2080_v42 }
 0x5ca   : > { %v3119_v33 = vpop.eup %3118  ;;  %v2867_v63 = vmul.f32 -1.442695, %v2084_v13  ;;  %v2869_v9 = vmul.f32 -1.442695, %v2132_v30 }
 0x5cb   : > { %v3121_v35 = vpop.eup %3120  ;;  %v2091_v43 = vadd.f32 1.0, %v3119_v33 }
 0x5cc   : > { %v2139_v52 = vadd.f32 1.0, %v3121_v35  ;;  %3122 = vpow2.f32 %v2867_v63 }
 0x5cd   : > { %3124 = vrcp.f32 %v2091_v43  ;;  %v2104_v53 = vand.u32 2147483648, %v2091_v43  ;;  %v2102_v25 = vand.u32 2147483647, %v2091_v43  ;;  %vm2098_vm2 = vweird.f32 %v2091_v43 }
 0x5ce   : > { %3126 = vrcp.f32 %v2139_v52  ;;  %v2152_v45 = vand.u32 2147483648, %v2139_v52  ;;  %vm2146_vm6 = vweird.f32 %v2139_v52  ;;  %v2150_v3 = vand.u32 2147483647, %v2139_v52 }
 0x5cf   : > { %3128 = vpow2.f32 %v2869_v9  ;;  %v2105_v41 = vor.u32 1.1754944e-38, %v2104_v53  ;;  %vm2103_vm4 = vcmp.eq.f32.partialorder %v2102_v25, 8.507059e+37  ;;  %v2220_v53 = vmul.f32 %v2213_v50, %v4178_v34 }
 0x5d0   : > { %v2153_v62 = vor.u32 1.1754944e-38, %v2152_v45  ;;  %vm2151_vm10 = vcmp.eq.f32.partialorder %v2150_v3, 8.507059e+37 }
 0x5d2   : > { %v3123_v18 = vpop.eup %3122 }
 0x5d3   : > { %v3125_v47 = vpop.eup %3124  ;;  %v2092_v22 = vadd.f32 1.0, %v3123_v18 }
 0x5d4   : > { %v3127_v44 = vpop.eup %3126  ;;  %v2094_v31 = vmul.f32 %v3125_v47, %v2091_v43  ;;  %vm2099_vm1 = vweird.f32 %v3125_v47  ;;  %v2196_v43 = vpop.permute.xlu0 %2195 }
 0x5d5   : > { %v3129_v29 = vpop.eup %3128  ;;  %v2142_v37 = vmul.f32 %v3127_v44, %v2139_v52  ;;  %3130 = vrcp.f32 %v2092_v22  ;;  %vm2100_vm3 = vmor %vm2098_vm2, %vm2099_vm1  ;;  %vm2147_vm5 = vweird.f32 %v3127_v44  ;;  %v2119_v49 = vand.u32 2147483648, %v2092_v22 }
 0x5d6   : > { %v2095_v46 = vsub.f32 1.0, %v2094_v31  ;;  %v4189_v17 = vadd.f32 1.0, %v3129_v29  ;;  %vm4195_vm7 = vmor %vm2146_vm6, %vm2147_vm5  ;;  %v2117_v60 = vand.u32 2147483647, %v2092_v22  ;;  %vm2113_vm9 = vweird.f32 %v2092_v22 }
 0x5d7   : > { %v2143_v59 = vsub.f32 1.0, %v2142_v37  ;;  %v2120_v10 = vor.u32 1.1754944e-38, %v2119_v49  ;;  %v2201_v37 = vpop.permute.xlu1 %2200 }
 0x5d8   : > { %v2096_v23 = vmul.f32 %v3125_v47, %v2095_v46  ;;  %3132 = vrcp.f32 %v4189_v17  ;;  %vm2118_vm12 = vcmp.eq.f32.partialorder %v2117_v60, 8.507059e+37  ;;  %v2167_v4 = vand.u32 2147483648, %v4189_v17 }
 0x5d9   : > { %v2144_v28 = vmul.f32 %v3127_v44, %v2143_v59  ;;  %vm2161_vm14 = vweird.f32 %v4189_v17  ;;  %v2165_v13 = vand.u32 2147483647, %v4189_v17 }
 0x5da   : > { %v2097_v32 = vadd.f32 %v3125_v47, %v2096_v23  ;;  %v2168_v9 = vor.u32 1.1754944e-38, %v2167_v4  ;;  %v2272_v4 = vld [vmem:[%s4219_s18 + $0x8] sm:$0xf] }
 0x5db   : > { %v3131_v36 = vpop.eup %3130  ;;  %v2145_v61 = vadd.f32 %v3127_v44, %v2144_v28  ;;  %vm2166_vm0 = vcmp.eq.f32.partialorder %v2165_v13, 8.507059e+37 }
 0x5dc   : > { %v2101_v51 = vsel %vm2100_vm3, %v3125_v47, %v2097_v32  ;;  %v2109_v54 = vmul.f32 %v3131_v36, %v2092_v22  ;;  %vm2114_vm8 = vweird.f32 %v3131_v36 }
 0x5dd   : > { %v2106_v57 = vsel %vm2103_vm4, %v2105_v41, %v2101_v51  ;;  %v2149_v16 = vsel %vm4195_vm7, %v3127_v44, %v2145_v61  ;;  %vm2115_vm11 = vmor %vm2113_vm9, %vm2114_vm8  ;;  %v2273_v51 = vld [vmem:[%s4219_s18 + $0xc] sm:$0xff] }
 0x5de   : > { %v3133_v1 = vpop.eup %3132  ;;  %v2173_v8 = vmul.f32 %v2171_v48, %v2106_v57  ;;  %v2110_v6 = vsub.f32 1.0, %v2109_v54  ;;  %v2154_v15 = vsel %vm2151_vm10, %v2153_v62, %v2149_v16 }
 0x5df   : > { %v2157_v7 = vmul.f32 %v3133_v1, %v4189_v17  ;;  %vm2162_vm13 = vweird.f32 %v3133_v1  ;;  %v2181_v19 = vsub.f32 1.0, %v2154_v15  ;;  %v2185_v12 = vmul.f32 %v2154_v15, %v4178_v34  ;;  %v2218_v17 = vpop.permute.xlu0 %2217  ;;  %v2271_v34 = vld [vmem:[%s4219_s18] sm:$0xff] }
 0x5e0   : > { %v2177_v55 = vadd.f32 %v2175_v14, %v2173_v8  ;;  %v2111_v58 = vmul.f32 %v3131_v36, %v2110_v6  ;;  %vm2163_vm15 = vmor %vm2161_vm14, %vm2162_vm13  ;;  %v2221_v59 = vmul.f32 %v2218_v17, %v4180_v5  ;;  %v2319_v41 = vrot.slane %v2271_v34, 4 }
 0x5e1   : > { %v2158_v0 = vsub.f32 1.0, %v2157_v7  ;;  %v2320_v6 = vrot.slane %v2273_v51, 4 }
 0x5e2   : > { %3134 = vtanh.f32 %v2177_v55  ;;  %v2112_v39 = vadd.f32 %v3131_v36, %v2111_v58  ;;  %v2323_v54 = vunpack.c.l.bf16 %v2319_v41  ;;  %v2274_v41 = vld [vmem:[%s4219_s18 + $0x14] sm:$0xf] }
 0x5e3   : > { %v2159_v26 = vmul.f32 %v3133_v1, %v2158_v0  ;;  %v2324_v55 = vunpack.c.l.bf16 %v2320_v6 }
 0x5e4   : > { %v2116_v27 = vsel %vm2115_vm11, %v3131_v36, %v2112_v39  ;;  %v2275_v36 = vunpack.c.l.bf16 %v2271_v34 }
 0x5e5   : > { %v2121_v20 = vsel %vm2118_vm12, %v2120_v10, %v2116_v27  ;;  %v2160_v2 = vadd.f32 %v3133_v1, %v2159_v26 }
 0x5e6   : > { %v2174_v11 = vmul.f32 %v2172_v21, %v2121_v20 }
 0x5e7   : > { %v2164_v35 = vsel %vm2163_vm15, %v3133_v1, %v2160_v2  ;;  %v2276_v1 = vunpack.c.l.bf16 %v2273_v51 }
 0x5e8   : > { %v3135_v30 = vpop.eup %3134  ;;  %v2178_v33 = vadd.f32 %v2176_v24, %v2174_v11  ;;  %v2169_v18 = vsel %vm2166_vm0, %v2168_v9, %v2164_v35  ;;  %v2369_v9 = vunpack.c.l.bf16 %v2272_v4 }
 0x5e9   : > { %v2183_v63 = vmul.f32 %v3135_v30, %v2181_v19  ;;  %v2182_v22 = vsub.f32 1.0, %v2169_v18  ;;  %v2186_v29 = vmul.f32 %v2169_v18, %v4180_v5 }
 0x5ea   : > { %3136 = vtanh.f32 %v2178_v33 }
 0x5eb   : > { %v2187_v52 = vadd.f32 %v2185_v12, %v2183_v63  ;;  %v3159_v12 = vld [vmem:[%s3435_s17] ss:$0 sm:$0xff]  ;;  %s2932_s17 = sshll.u32 %s3356_s28, 4 }
 0x5ec   : > { %s2454_s28 = scalar_lea.hbm %s4369_s7, %s2932_s17 }
 0x5ed   : > { %v2203_v47 = vmul.f32 %v2196_v43, %v2187_v52  ;;  %s2457_s26 = sshll.u32 %s2454_s28, 4  ;;  %s4257_s26 = int_to_ptr.hbm [resolvable:$true] %s2457_s26 }
 0x5ef   : > { %2206 = vst [vmem:[%s3560_s25] sm:$0xff] %v2203_v47  ;;  %v4212_v25 = vadd.f32 %v2220_v53, %v2203_v47 }
 0x5f0   : > { %v3137_v44 = vpop.eup %3136 }
 0x5f1   : > { %v2184_v31 = vmul.f32 %v3137_v44, %v2182_v22 }
 0x5f3   : > { %v2188_v46 = vadd.f32 %v2186_v29, %v2184_v31 }
 0x5f5   : > { %v2204_v23 = vmul.f32 %v2201_v37, %v2188_v46 }
 0x5f7   : > { %2207 = vst [vmem:[%s3560_s25 + $0x8] sm:$0xff] %v2204_v23  ;;  %v4214_v28 = vadd.f32 %v2221_v59, %v2204_v23  ;;  %s2651_s25 = sshll.u32 %s3413_s19, 4 }
 0x5f8   : > { %s4243_s24 = scalar_lea.vmem [#allocation7], %s2651_s25 }
 0x5f9   : > { %v2225_v32 = vpack.c.bf16 %v4214_v28, %v4212_v25  ;;  %s2455_s23 = sshll.u32 %s4243_s24, 4  ;;  %s4255_s23 = int_to_ptr.vmem [resolvable:$true] %s2455_s23 }
 0x5fb   : > { %2234 = vmatmul.bf16.vlgmr.msrb.gmra.mxu1 %v2225_v32  ;;  %2248 = vmatmul.bf16.vlgmr.msrb.gmra.mxu2 %v2225_v32 }
 0x5fc   : > { %2262 = vmatmul.bf16.vlgmr.msra.gmra.mxu3 %v2225_v32 }
 0x678   : > { %v2235_v5 = vpop.f32.mrf.mxu1 }
 0x679   : > { %v2277_v38 = vadd.f32 %v2275_v36, %v2235_v5 }
 0x67b   : > { %v2872_v48 = vmul.f32 -1.442695, %v2277_v38 }
 0x67d   : > { %3138 = vpow2.f32 %v2872_v48 }
 0x67e   : > { %v2249_v57 = vpop.f32.mrf.mxu2 }
 0x67f   : > { %v2325_v61 = vadd.f32 %v2323_v54, %v2249_v57  ;;  %v2263_v21 = vpop.f32.mrf.mxu3 }
 0x680   : > { %v2237_v8 = vpop.f32.mrf.mxu1  ;;  %v2365_v35 = vadd.f32 %v3159_v12, %v2263_v21 }
 0x681   : > { %v2874_v14 = vmul.f32 -1.442695, %v2325_v61  ;;  %v2278_v45 = vadd.f32 %v2276_v1, %v2237_v8 }
 0x683   : > { %v3139_v3 = vpop.eup %3138  ;;  %3140 = vpow2.f32 %v2874_v14  ;;  %v2873_v49 = vmul.f32 -1.442695, %v2278_v45  ;;  %v2370_v45 = vunpack.c.l.bf16 %v2274_v41 }
 0x684   : > { %v2285_v7 = vadd.f32 1.0, %v3139_v3 }
 0x685   : > { %3142 = vpow2.f32 %v2873_v49 }
 0x686   : > { %3144 = vrcp.f32 %v2285_v7  ;;  %v2251_v56 = vpop.f32.mrf.mxu2  ;;  %v2298_v26 = vand.u32 2147483648, %v2285_v7  ;;  %v2296_v20 = vand.u32 2147483647, %v2285_v7  ;;  %vm2292_vm2 = vweird.f32 %v2285_v7 }
 0x687   : > { %v2326_v58 = vadd.f32 %v2324_v55, %v2251_v56  ;;  %v2265_v34 = vpop.f32.mrf.mxu3 }
 0x688   : > { %v2299_v13 = vor.u32 1.1754944e-38, %v2298_v26  ;;  %vm2297_vm4 = vcmp.eq.f32.partialorder %v2296_v20, 8.507059e+37  ;;  %v2366_v54 = vadd.f32 %v3159_v12, %v2265_v34 }
 0x689   : > { %v3141_v60 = vpop.eup %3140  ;;  %v2875_v16 = vmul.f32 -1.442695, %v2326_v58 }
 0x68a   : > { %v2333_v40 = vadd.f32 1.0, %v3141_v60  ;;  %v2390_v60 = vpop.permute.xlu1 %2389 }
 0x68b   : > { %v3143_v0 = vpop.eup %3142  ;;  %3146 = vpow2.f32 %v2875_v16 }
 0x68c   : > { %v3145_v62 = vpop.eup %3144  ;;  %3148 = vrcp.f32 %v2333_v40  ;;  %v2286_v42 = vadd.f32 1.0, %v3143_v0  ;;  %v2346_v47 = vand.u32 2147483648, %v2333_v40  ;;  %v2344_v44 = vand.u32 2147483647, %v2333_v40  ;;  %v2407_v0 = vpop.permute.xlu0 %2406 }
 0x68d   : > { %v2288_v39 = vmul.f32 %v3145_v62, %v2285_v7  ;;  %vm2293_vm1 = vweird.f32 %v3145_v62  ;;  %vm2340_vm6 = vweird.f32 %v2333_v40 }
 0x68e   : > { %3150 = vrcp.f32 %v2286_v42  ;;  %vm2294_vm3 = vmor %vm2292_vm2, %vm2293_vm1  ;;  %v2313_v46 = vand.u32 2147483648, %v2286_v42  ;;  %v2311_v53 = vand.u32 2147483647, %v2286_v42  ;;  %v2347_v59 = vor.u32 1.1754944e-38, %v2346_v47 }
 0x68f   : > { %v2289_v10 = vsub.f32 1.0, %v2288_v39  ;;  %vm2345_vm9 = vcmp.eq.f32.partialorder %v2344_v44, 8.507059e+37  ;;  %vm2307_vm10 = vweird.f32 %v2286_v42  ;;  %v2414_v39 = vmul.f32 %v2407_v0, %v4212_v25 }
 0x690   : > { %v2314_v48 = vor.u32 1.1754944e-38, %v2313_v46  ;;  %vm2312_vm12 = vcmp.eq.f32.partialorder %v2311_v53, 8.507059e+37 }
 0x691   : > { %v3147_v15 = vpop.eup %3146  ;;  %v2290_v27 = vmul.f32 %v3145_v62, %v2289_v10 }
 0x692   : > { %v3149_v2 = vpop.eup %3148  ;;  %v4223_v24 = vadd.f32 1.0, %v3147_v15  ;;  %v2412_v20 = vpop.permute.xlu1 %2411 }
 0x693   : > { %v2336_v11 = vmul.f32 %v3149_v2, %v2333_v40  ;;  %v2291_v19 = vadd.f32 %v3145_v62, %v2290_v27  ;;  %vm2341_vm5 = vweird.f32 %v3149_v2 }
 0x694   : > { %3152 = vrcp.f32 %v4223_v24  ;;  %v3151_v30 = vpop.eup %3150  ;;  %vm2342_vm7 = vmor %vm2340_vm6, %vm2341_vm5  ;;  %v2361_v8 = vand.u32 2147483648, %v4223_v24  ;;  %vm2355_vm14 = vweird.f32 %v4223_v24  ;;  %v2359_v49 = vand.u32 2147483647, %v4223_v24 }
 0x695   : > { %v2337_v33 = vsub.f32 1.0, %v2336_v11  ;;  %v2295_v63 = vsel %vm2294_vm3, %v3145_v62, %v2291_v19  ;;  %v2303_v52 = vmul.f32 %v3151_v30, %v2286_v42  ;;  %vm2308_vm8 = vweird.f32 %v3151_v30 }
 0x696   : > { %v2300_v43 = vsel %vm2297_vm4, %v2299_v13, %v2295_v63  ;;  %vm2309_vm11 = vmor %vm2307_vm10, %vm2308_vm8  ;;  %v2362_v40 = vor.u32 1.1754944e-38, %v2361_v8  ;;  %vm2360_vm0 = vcmp.eq.f32.partialorder %v2359_v49, 8.507059e+37  ;;  %v2415_v11 = vmul.f32 %v2412_v20, %v4214_v28 }
 0x697   : > { %v2338_v18 = vmul.f32 %v3149_v2, %v2337_v33  ;;  %v2367_v22 = vmul.f32 %v2365_v35, %v2300_v43  ;;  %v2304_v31 = vsub.f32 1.0, %v2303_v52 }
 0x699   : > { %v2339_v29 = vadd.f32 %v3149_v2, %v2338_v18  ;;  %v2371_v37 = vadd.f32 %v2369_v9, %v2367_v22  ;;  %v2305_v50 = vmul.f32 %v3151_v30, %v2304_v31 }
 0x69a   : > { %v3153_v17 = vpop.eup %3152 }
 0x69b   : > { %v2343_v23 = vsel %vm2342_vm7, %v3149_v2, %v2339_v29  ;;  %3154 = vtanh.f32 %v2371_v37  ;;  %v2351_v32 = vmul.f32 %v3153_v17, %v4223_v24  ;;  %v2306_v36 = vadd.f32 %v3151_v30, %v2305_v50  ;;  %v2395_v2 = vpop.permute.xlu2 %2394 }
 0x69c   : > { %v2348_v5 = vsel %vm2345_vm9, %v2347_v59, %v2343_v23  ;;  %vm2356_vm13 = vweird.f32 %v3153_v17 }
 0x69d   : > { %v2352_v38 = vsub.f32 1.0, %v2351_v32  ;;  %v2310_v51 = vsel %vm2309_vm11, %v3151_v30, %v2306_v36  ;;  %v2375_v1 = vsub.f32 1.0, %v2348_v5  ;;  %v2379_v55 = vmul.f32 %v2348_v5, %v4212_v25  ;;  %vm2357_vm15 = vmor %vm2355_vm14, %vm2356_vm13 }
 0x69e   : > { %v2315_v61 = vsel %vm2312_vm12, %v2314_v48, %v2310_v51 }
 0x69f   : > { %v2353_v57 = vmul.f32 %v3153_v17, %v2352_v38  ;;  %v2368_v14 = vmul.f32 %v2366_v54, %v2315_v61 }
 0x6a1   : > { %v3155_v6 = vpop.eup %3154  ;;  %v2354_v3 = vadd.f32 %v3153_v17, %v2353_v57  ;;  %v2372_v56 = vadd.f32 %v2370_v45, %v2368_v14 }
 0x6a2   : > { %v2377_v7 = vmul.f32 %v3155_v6, %v2375_v1 }
 0x6a3   : > { %v2358_v58 = vsel %vm2357_vm15, %v3153_v17, %v2354_v3  ;;  %3156 = vtanh.f32 %v2372_v56 }
 0x6a4   : > { %v2381_v16 = vadd.f32 %v2379_v55, %v2377_v7  ;;  %v2363_v42 = vsel %vm2360_vm0, %v2362_v40, %v2358_v58 }
 0x6a5   : > { %v2376_v26 = vsub.f32 1.0, %v2363_v42  ;;  %v2380_v25 = vmul.f32 %v2363_v42, %v4214_v28 }
 0x6a6   : > { %v2397_v62 = vmul.f32 %v2390_v60, %v2381_v16 }
 0x6a8   : > { %2400 = vst [vmem:[%s3590_s5] sm:$0xff] %v2397_v62  ;;  %v2416_v10 = vadd.f32 %v2414_v39, %v2397_v62 }
 0x6a9   : > { %v3157_v15 = vpop.eup %3156 }
 0x6aa   : > { %2418 = vst [vmem:[%s4243_s24] sm:$0xff] %v2416_v10  ;;  %v2378_v21 = vmul.f32 %v3157_v15, %v2376_v26 }
 0x6ac   : > { %v2382_v27 = vadd.f32 %v2380_v25, %v2378_v21 }
 0x6ae   : > { %v2398_v24 = vmul.f32 %v2395_v2, %v2382_v27 }
 0x6b0   : > { %2401 = vst [vmem:[%s3590_s5 + $0x8] sm:$0xff] %v2398_v24  ;;  %v2417_v4 = vadd.f32 %v2415_v11, %v2398_v24 }
 0x6b1   : > { %3217 = shalt.err (!%p3214_p10)
}
 0x6b2   : > { %s3293_s5 = smov 128   ;;  %s3294_s18 = smov 8   ;;  %2419 = vst [vmem:[%s4243_s24 + $0x8] sm:$0xff] %v2417_v4 }
 0x6b3   : > { %2940 = dma.vmem_to_hbm [thread:$0]  (%p3383_p11), %s4250_s12, 2048, %s2441_s21, %s2421_s8, %s3293_s5, %s3293_s5, %s3294_s18  }
 0x6b4   : > { %s2426_s25 = scalar_lea.sflag [#allocation8], %s3413_s19  ;;  %s3232_s30 = sshra.s32 %s4257_s26, 4  ;;  %s3233_s30 = int_to_ptr.hbm [resolvable:$true] %s3232_s30 }
 0x6b5   : > { %s3234_s17 = scalar_lea.hbm %s3233_s30, 16  ;;  %s3238_s27 = scalar_lea.hbm %s4369_s7, 32 }
 0x6b6   : > { %p3235_p0 = scmp.ne.s32.totalorder %s3233_s30, %s3234_s17  ;;  %p3239_p13 = scmp.lt.s32.totalorder %s3233_s30, %s4369_s7 }
 0x6b7   : > { %p3240_p4 = scmp.lt.s32.totalorder %s3238_s27, %s3234_s17 }
 0x6b8   : > { %p3236_p1 = pnand %p3235_p0, %p3383_p11 }
 0x6b9   : > { %p3241_p6 = por %p3240_p4, %p3239_p13 }
 0x6ba   : > { %p3237_p2 = pneg %p3236_p1 }
 0x6bc   : > { %p3242_p3 = pnand %p3241_p6, %p3237_p2 }
 0x6be   : > { %3245 = shalt.err (!%p3242_p3)
}
 0x6bf   : > { %2941 = dma.vmem_to_hbm [thread:$0]  (%p3383_p11), %s4255_s23, 256, %s4257_s26, %s2426_s25, %s3293_s5, %s3293_s5, %s3294_s18  }
 0x6c0 PF: > { %s4371_s19 = sld [smem:[#allocation12_spill]]  ;;  %p2949_p5 = pnand %p2647_p9, %p3387_p12 }
 0x6c2   : > { %p2950_p7 = pneg %p2949_p5 }
 0x6c6   : > { %s2472_s28 = sand.u32 1, %s4371_s19  }
 0x6c7   : > { %s2473_s21 = scalar_lea.sflag [#allocation5], %s2472_s28 }
 0x6c8   : > { %3267 = dma.done.wait (%p2950_p7), %s2473_s21, 2048  }
 0x6c9   : > { %3269 = vsyncadd (%p2950_p7), %s2473_s21, 4294965248  ;;  %s2483_s8 = scalar_lea.sflag [#allocation8], %s2472_s28 }
 0x6ca   : > { %3271 = dma.done.wait (%p2950_p7), %s2483_s8, 256  }
 0x6cb   : > { %3273 = vsyncadd (%p2950_p7), %s2483_s8, 4294967040  ;;  %s4374_s27 = sld [smem:[#allocation16_spill]] }
 0x6cc   : > { %s4375_s24 = sld [smem:[#allocation13_spill]] }
 0x6cd   : > { %s4376_s25 = sld [smem:[#allocation14_spill]] }
 0x6ce   : > { %s4377_s26 = sld [smem:[#allocation17_spill]] }
 0x6d1   : > { %p24_p11 = scmp.ge.s32.totalorder %s4374_s27, 4  }
 0x6d3   :  { %26 = sbr.rel (!%p24_p11) target bundleno = 12 (0xc), region = 139 }
 0x6d8   :  { %2489 = vsyncpa [#allocation4], 1 }
 0x6d9   :  { %2491 = vsyncpa [#allocation4 + $0x1], 1 }
 0x6da   :  { %2492 = vsyncpa [#allocation5], 1 }
 0x6db   :  { %2494 = vsyncpa [#allocation5 + $0x1], 1 }
 0x6dc   :  { %2495 = vsyncpa [#allocation8], 1 }
 0x6dd   :  { %2497 = vsyncpa [#allocation8 + $0x1], 1 }

</bundles_post_ra>
